<compile_context>
chip_gen: v5e
topology: v5e:2x2
jax: 0.10.0
libtpu: 0.0.40
codegen_flags: <defaults>
</compile_context>

<pallas_src>
import jax
import jax.numpy as jnp
from jax import lax
from jax.experimental import pallas as pl
from jax.experimental.pallas import tpu as pltpu

num_iden = 0  # mirrors the PyTorch module's global counter


def _round_up(x, m):
    return (x + m - 1) // m * m


def _m_img(hp, wp):
    """Padded-grid output rows the kernel produces per image (multiple of 8 for aligned stores)."""
    h, w = hp - 3, wp - 2
    return _round_up((h - 1) * wp + w, 8)


# ----------------------------- Pallas kernels (hot path) ------------------------------------------

def _make_conv_kernel(wp, m_img, mode, ho=None, wo=None):
    """3x3 conv (+folded-BN bias +ReLU) as 9 shifted matmuls.  `mode` selects the accumulator seed:
       'plain'    -> zeros                               (conv1)
       'residual' -> bf16 identity tensor                (conv2, skip == empty nn.Sequential())
       'skip'     -> fused 1x1-conv+BN skip GEMM         (conv2; also emits max|identity| per channel)
    """
    taps = [(dy, dx) for dy in range(3) for dx in range(3)]

    def _accumulate_taps(x_ref, w_ref, acc_ref):
        for t, (dy, dx) in enumerate(taps):
            off = dy * wp + dx                     # static per-tap element (sublane) offset
            acc_ref[...] += jnp.dot(x_ref[pl.ds(off, m_img), :], w_ref[t],
                                    preferred_element_type=jnp.float32)

    if mode == "plain":
        def kernel(x_ref, w_ref, b_ref, o_ref, acc_ref):
            acc_ref[...] = jnp.zeros_like(acc_ref)
            _accumulate_taps(x_ref, w_ref, acc_ref)
            o_ref[...] = jnp.maximum(acc_ref[...] + b_ref[...], 0.0).astype(o_ref.dtype)
        return kernel

    if mode == "residual":
        def kernel(x_ref, w_ref, b_ref, r_ref, o_ref, acc_ref):
            acc_ref[...] = r_ref[...].astype(jnp.float32)          # bf16 identity seeds the acc
            _accumulate_taps(x_ref, w_ref, acc_ref)
            o_ref[...] = jnp.maximum(acc_ref[...] + b_ref[...], 0.0).astype(o_ref.dtype)
        return kernel

    assert mode == "skip" and ho is not None and wo is not None

    def kernel(x_ref, w_ref, b_ref, xs_ref, ws_ref, bs_ref, o_ref, iden_ref, acc_ref):
        # Fused 1x1-conv + folded-BN skip branch seeds the accumulator.
        seed = jnp.dot(xs_ref[...], ws_ref[...], preferred_element_type=jnp.float32) + bs_ref[...]
        # identity.any() support: per-channel max|identity| over the valid output pixels only.
        row = lax.broadcasted_iota(jnp.int32, (m_img, 1), 0)
        valid = (row < ho * wp) & (row % wp < wo)
        iden_ref[...] = jnp.max(jnp.abs(jnp.where(valid, seed, 0.0)), axis=0, keepdims=True)
        acc_ref[...] = seed
        _accumulate_taps(x_ref, w_ref, acc_ref)
        o_ref[...] = jnp.maximum(acc_ref[...] + b_ref[...], 0.0).astype(o_ref.dtype)
    return kernel


# ----------------------------- pallas_call wrapper -------------------------------------------------

def _pick_vmem_limit(need_bytes):
    try:
        phys = int(pltpu.get_tpu_info().vmem_capacity_bytes)
    except Exception:
        phys = 64 << 20                    # conservative (v7x-sized) fallback
    cap = int(phys * 0.85)                 # leave compiler headroom (matters most on v7x's 64 MiB)
    return int(max(min(2 * need_bytes + (8 << 20), cap), min(32 << 20, cap)))


def conv3x3_bn_relu(x_rows, hp, wp, w9, bias, *, residual=None, skip=None, ho=None, wo=None,
                    out_dtype=jnp.bfloat16):
    """Fused 3x3 conv + folded BN (+ skip / residual) + ReLU on a padded, row-flattened image.

    x_rows:   (N, hp*wp, Cin) bf16  zero-padded image, rows flattened (pad 1 top / 2 bottom / 1 l&r)
    w9:       (9, Cin, Coutp) bf16  BN-folded per-tap weights (tap = dy*3 + dx), Coutp % 128 == 0
    bias:     (1, Coutp) f32        BN-folded bias
    residual: (N, m_img, Coutp) bf16 identity laid out on the output padded grid (seeds the acc)
    skip:     (xs, ws, bs): xs (N, m_img, Cin_s) bf16, ws (Cin_s, Coutp) bf16, bs (1, Coutp) f32
    Returns (N, m_img, Coutp) bf16  [, (N, 1, Coutp) f32 max|identity| when `skip` is given].
    """
    n, hpwp, cin = x_rows.shape
    coutp = w9.shape[2]
    m_img = _m_img(hp, wp)
    assert hpwp == hp * wp and m_img + 2 * wp + 2 <= hpwp, (hp, wp, m_img)

    resident = dict(pipeline_mode=pl.Buffered(1))   # grid-invariant inputs: single resident copy
    in_specs = [
        pl.BlockSpec((None, hpwp, cin), lambda i: (i, 0, 0)),              # padded image, per step
        pl.BlockSpec((9, cin, coutp), lambda i: (0, 0, 0), **resident),    # folded weights, resident
        pl.BlockSpec((1, coutp), lambda i: (0, 0), **resident),            # folded bias, resident
    ]
    args = [x_rows, w9, bias]
    vmem_need = (2 * hpwp * cin * 2 + 9 * cin * coutp * 2 + coutp * 4
                 + 2 * m_img * coutp * 2 + m_img * coutp * 4)

    if skip is not None:
        xs, ws, bs = skip
        cin_s = xs.shape[2]
        in_specs += [
            pl.BlockSpec((None, m_img, cin_s), lambda i: (i, 0, 0)),
            pl.BlockSpec((cin_s, coutp), lambda i: (0, 0), **resident),
            pl.BlockSpec((1, coutp), lambda i: (0, 0), **resident),
        ]
        args += [xs, ws, bs]
        vmem_need += 2 * m_img * cin_s * 2 + cin_s * coutp * 2 + coutp * 4
        kernel = _make_conv_kernel(wp, m_img, "skip", ho=ho, wo=wo)
        out_shape = (jax.ShapeDtypeStruct((n, m_img, coutp), out_dtype),
                     jax.ShapeDtypeStruct((n, 1, coutp), jnp.float32))
        out_specs = (pl.BlockSpec((None, m_img, coutp), lambda i: (i, 0, 0)),
                     pl.BlockSpec((None, 1, coutp), lambda i: (i, 0, 0)))
    elif residual is not None:
        in_specs.append(pl.BlockSpec((None, m_img, coutp), lambda i: (i, 0, 0)))
        args.append(residual)
        vmem_need += 2 * m_img * coutp * 2
        kernel = _make_conv_kernel(wp, m_img, "residual")
        out_shape = jax.ShapeDtypeStruct((n, m_img, coutp), out_dtype)
        out_specs = pl.BlockSpec((None, m_img, coutp), lambda i: (i, 0, 0))
    else:
        kernel = _make_conv_kernel(wp, m_img, "plain")
        out_shape = jax.ShapeDtypeStruct((n, m_img, coutp), out_dtype)
        out_specs = pl.BlockSpec((None, m_img, coutp), lambda i: (i, 0, 0))

    return pl.pallas_call(
        kernel,
        out_shape=out_shape,
        grid_spec=pltpu.PrefetchScalarGridSpec(
            num_scalar_prefetch=0,
            grid=(n,),                                   # one padded image per grid step
            in_specs=in_specs,
            out_specs=out_specs,
            scratch_shapes=[pltpu.VMEM((m_img, coutp), jnp.float32)],
        ),
        compiler_params=pltpu.CompilerParams(
            dimension_semantics=("parallel",),           # images independent -> megacore / v7x 2 TCs
            vmem_limit_bytes=_pick_vmem_limit(vmem_need),
        ),
    )(*args)


# ----------------------------- plain-JAX glue (pads / reshapes only) -------------------------------

def _to_padded_rows(x):
    """(N,H,W,C) -> (N,(H+3)*(W+2),C): zero pad 1 top / 2 bottom / 1 left / 1 right, flatten rows."""
    n, h, w, c = x.shape
    hp, wp = h + 3, w + 2
    xp = jnp.pad(x, ((0, 0), (1, 2), (1, 1), (0, 0)))
    return xp.reshape(n, hp * wp, c), (hp, wp)


def _from_padded_rows(y, h, w, wp, stride, cout):
    """Extract the (strided) valid conv outputs from the padded-grid kernel output."""
    n = y.shape[0]
    rows = h * wp
    if y.shape[1] < rows:
        y = jnp.pad(y, ((0, 0), (0, rows - y.shape[1]), (0, 0)))
    y = y[:, :rows, :].reshape(n, h, wp, -1)
    return y[:, 0:h:stride, 0:w:stride, :cout]


def _on_out_grid(a, wp_out, m_rows):
    """Lay an (N,Ho,Wo,C) tensor out on conv2's padded output grid (row pitch wp_out, m_rows rows)."""
    n, ho, wo, c = a.shape
    a = jnp.pad(a, ((0, 0), (0, 0), (0, wp_out - wo), (0, 0))).reshape(n, ho * wp_out, c)
    if a.shape[1] < m_rows:
        a = jnp.pad(a, ((0, 0), (0, m_rows - a.shape[1]), (0, 0)))
    return a[:, :m_rows, :]


def _pad_last(a, size):
    pad = [(0, 0)] * (a.ndim - 1) + [(0, size - a.shape[-1])]
    return jnp.pad(a, pad)


def _fold_bn(gamma, beta, mean, var, eps=1e-5):
    scale = gamma / jnp.sqrt(var + eps)
    return scale, beta - mean * scale


def prepare_params(raw, stride, in_c, out_c):
    """Fold eval-mode BN into per-tap conv weights (scale) and per-channel biases; weights -> bf16."""
    s1, b1 = _fold_bn(*raw["bn1"])
    s2, b2 = _fold_bn(*raw["bn2"])
    params = {
        "w1": (jnp.transpose(raw["w1"], (2, 3, 1, 0)).reshape(9, in_c, out_c)
               * s1[None, None, :]).astype(jnp.bfloat16),
        "b1": b1,
        "w2": (jnp.transpose(raw["w2"], (2, 3, 1, 0)).reshape(9, out_c, out_c)
               * s2[None, None, :]).astype(jnp.bfloat16),
        "b2": b2,
    }
    if stride != 1 or in_c != out_c:
        ss, bs = _fold_bn(*raw["bnskip"])
        params["wskip"] = (raw["wskip"].reshape(out_c, in_c).T * ss[None, :]).astype(jnp.bfloat16)
        params["bskip"] = bs
    return params


def residual_block_apply(x_nchw, params, stride):
    """Pure, jittable forward. Returns (out_nchw_f32, identity_any_flag)."""
    x = jnp.transpose(x_nchw, (0, 2, 3, 1)).astype(jnp.float32)      # NCHW -> NHWC
    n, h, w, cin = x.shape
    cout = params["b1"].shape[0]
    coutp = _round_up(cout, 128)                                      # lane-dense output columns
    xb = x.astype(jnp.bfloat16)

    w1 = _pad_last(params["w1"], coutp)                               # (9, cin, coutp) bf16
    w2 = _pad_last(params["w2"], coutp)                               # (9, cout, coutp) bf16
    b1 = _pad_last(params["b1"].reshape(1, -1), coutp)                # (1, coutp) f32
    b2 = _pad_last(params["b2"].reshape(1, -1), coutp)

    ho = (h - 1) // stride + 1
    wo = (w - 1) // stride + 1

    # conv1 (3x3, stride) + BN1 + ReLU: dense on the padded grid, strided extraction in XLA.
    x_rows, (hp1, wp1) = _to_padded_rows(xb)
    y1 = conv3x3_bn_relu(x_rows, hp1, wp1, w1, b1)                    # (n, m1, coutp) bf16
    y1 = _from_padded_rows(y1, h, w, wp1, stride, cout)               # (n, ho, wo, cout) bf16

    # conv2 (3x3, s=1) + BN2 fused with the skip / identity branch, residual add and final ReLU.
    y1_rows, (hp2, wp2) = _to_padded_rows(y1)
    m2 = _m_img(hp2, wp2)
    if stride != 1 or cin != cout:
        xs = _on_out_grid(xb[:, ::stride, ::stride, :], wp2, m2)      # (n, m2, cin) bf16
        ws = _pad_last(params["wskip"], coutp)                        # (cin, coutp) bf16
        bs = _pad_last(params["bskip"].reshape(1, -1), coutp)         # (1, coutp) f32
        out, iden = conv3x3_bn_relu(y1_rows, hp2, wp2, w2, b2,
                                    skip=(xs, ws, bs), ho=ho, wo=wo)
        ident_flag = jnp.any(iden != 0.0)            # from the kernel-emitted max|identity| vector
    else:
        r = _on_out_grid(_pad_last(xb, coutp), wp2, m2)               # bf16 identity on the out grid
        out = conv3x3_bn_relu(y1_rows, hp2, wp2, w2, b2, residual=r)
        ident_flag = jnp.any(x != 0.0)                                # identity is x itself here

    out = _from_padded_rows(out, ho, wo, wp2, 1, cout)                # (n, ho, wo, cout) bf16
    out = jnp.transpose(out, (0, 3, 1, 2)).astype(jnp.float32)        # NHWC -> NCHW module interface
    return out, ident_flag


_jitted_apply = jax.jit(residual_block_apply, static_argnums=(2,))


def residual_block_forward(x_nchw, params, stride):
    """Thin wrapper reproducing the PyTorch global-counter side effect outside the jitted graph."""
    global num_iden
    out, flag = _jitted_apply(x_nchw, params, stride)
    out = jax.block_until_ready(out)
    if bool(flag):
        num_iden += 1
    return out


# ----------------------------- reference (for correctness check) ----------------------------------

def reference_forward(x, raw, stride, has_skip):
    def conv(x, w, s, pad):
        return lax.conv_general_dilated(x, w, (s, s), [(pad, pad), (pad, pad)],
                                        dimension_numbers=("NCHW", "OIHW", "NCHW"))

    def bn(x, g, b, m, v, eps=1e-5):
        g, b, m, v = [t[None, :, None, None] for t in (g, b, m, v)]
        return (x - m) / jnp.sqrt(v + eps) * g + b

    out = jnp.maximum(bn(conv(x, raw["w1"], stride, 1), *raw["bn1"]), 0.0)
    out = bn(conv(out, raw["w2"], 1, 1), *raw["bn2"])
    ident = bn(conv(x, raw["wskip"], stride, 0), *raw["bnskip"]) if has_skip else x
    return jnp.maximum(out + ident, 0.0)


# ----------------------------- main ----------------------------------------------------------------

if __name__ == "__main__":
    def run_case(key, n, in_c, out_c, h, w, stride):
        ks = jax.random.split(key, 20)
        x = jax.random.normal(ks[0], (n, in_c, h, w), jnp.float32)

        def bn_params(i, c):
            gamma = jax.random.uniform(ks[i], (c,), jnp.float32, 0.5, 1.5)
            beta = 0.1 * jax.random.normal(ks[i + 1], (c,), jnp.float32)
            mean = 0.1 * jax.random.normal(ks[i + 2], (c,), jnp.float32)
            var = jax.random.uniform(ks[i + 3], (c,), jnp.float32, 0.5, 1.5)
            return gamma, beta, mean, var

        raw = {
            "w1": 0.1 * jax.random.normal(ks[1], (out_c, in_c, 3, 3), jnp.float32),
            "w2": 0.1 * jax.random.normal(ks[2], (out_c, out_c, 3, 3), jnp.float32),
            "wskip": 0.1 * jax.random.normal(ks[3], (out_c, in_c, 1, 1), jnp.float32),
            "bn1": bn_params(4, out_c),
            "bn2": bn_params(8, out_c),
            "bnskip": bn_params(12, out_c),
        }
        has_skip = stride != 1 or in_c != out_c
        params = prepare_params(raw, stride, in_c, out_c)

        out = residual_block_forward(x, params, stride)
        ref = jax.block_until_ready(reference_forward(x, raw, stride, has_skip))
        assert out.shape == ref.shape, (out.shape, ref.shape)
        # tolerance accounts for bf16 MXU operands (accumulation stays in f32)
        if not bool(jnp.allclose(out, ref, rtol=3e-2, atol=3e-2)):
            err = float(jnp.max(jnp.abs(out - ref)))
            raise AssertionError(f"Pallas residual block mismatch (max abs err {err})")

    key = jax.random.PRNGKey(0)
    k1, k2 = jax.random.split(key)
    run_case(k1, n=2, in_c=4, out_c=8, h=16, w=16, stride=2)   # downsampling block (fused 1x1 skip)
    run_case(k2, n=2, in_c=8, out_c=8, h=16, w=16, stride=1)   # identity block (bf16 residual seed)
    print("KERNEL_OK")
</pallas_src>

<mosaic_0001>
module attributes {stable_mosaic.version = 11 : i64} {
  func.func @kernel(%arg0: i32, %arg1: memref<1x342x4xbf16, #tpu.memory_space<vmem>>, %arg2: memref<9x4x128xbf16, #tpu.memory_space<vmem>>, %arg3: memref<1x128xf32, #tpu.memory_space<vmem>>, %arg4: memref<1x288x128xbf16, #tpu.memory_space<vmem>>, %arg5: memref<288x128xf32, #tpu.memory_space<vmem>>) attributes {dimension_semantics = [#tpu.dimension_semantics<parallel>], iteration_bounds = array<i64: 2>, scalar_prefetch = 0 : i64, scratch_operands = 1 : i64, tpu.core_type = #tpu.core_type<tc>, window_params = [{transform_indices = @transform_0, window_bounds = array<i64: 1, 342, 4>}, {pipeline_mode = #tpu.pipeline_mode<synchronous>, transform_indices = @transform_1, window_bounds = array<i64: 9, 4, 128>}, {pipeline_mode = #tpu.pipeline_mode<synchronous>, transform_indices = @transform_2, window_bounds = array<i64: 1, 128>}, {transform_indices = @transform_3, window_bounds = array<i64: 1, 288, 128>}]} {
    %cst = arith.constant 0.000000e+00 : f32
    %0 = vector.broadcast %cst : f32 to vector<288x128xf32>
    %c0 = arith.constant 0 : index
    %c0_0 = arith.constant 0 : index
    %1 = vector.load %arg5[%c0, %c0_0] : memref<288x128xf32, #tpu.memory_space<vmem>>, vector<288x128xf32>
    tpu.vector_store %arg5[%c0, %c0_0], %0 {strides = array<i32>} : memref<288x128xf32, #tpu.memory_space<vmem>>, vector<288x128xf32>,
    %c0_1 = arith.constant 0 : index
    %c0_2 = arith.constant 0 : index
    %2 = vector.load %arg5[%c0_1, %c0_2] : memref<288x128xf32, #tpu.memory_space<vmem>>, vector<288x128xf32>
    %c0_3 = arith.constant 0 : index
    %c0_4 = arith.constant 0 : index
    %c0_5 = arith.constant 0 : index
    %3 = vector.load %arg1[%c0_3, %c0_4, %c0_5] : memref<1x342x4xbf16, #tpu.memory_space<vmem>>, vector<1x288x4xbf16>
    %4 = vector.shape_cast %3 : vector<1x288x4xbf16> to vector<288x4xbf16>
    %c0_6 = arith.constant 0 : index
    %c0_7 = arith.constant 0 : index
    %c0_8 = arith.constant 0 : index
    %5 = vector.load %arg2[%c0_6, %c0_7, %c0_8] : memref<9x4x128xbf16, #tpu.memory_space<vmem>>, vector<1x4x128xbf16>
    %6 = vector.shape_cast %5 : vector<1x4x128xbf16> to vector<4x128xbf16>
    %cst_9 = arith.constant dense<0.000000e+00> : vector<288x128xf32>
    %7 = tpu.matmul %4, %6, %cst_9 {dimension_numbers = #tpu.dot_dimension_numbers<[1], [0], [0], [1], [0, 0, 1, 1], [], []>} : vector<288x4xbf16>, vector<4x128xbf16>, vector<288x128xf32> -> vector<288x128xf32>
    %8 = arith.addf %2, %7 : vector<288x128xf32>
    %c0_10 = arith.constant 0 : index
    %c0_11 = arith.constant 0 : index
    %9 = vector.load %arg5[%c0_10, %c0_11] : memref<288x128xf32, #tpu.memory_space<vmem>>, vector<288x128xf32>
    tpu.vector_store %arg5[%c0_10, %c0_11], %8 {strides = array<i32>} : memref<288x128xf32, #tpu.memory_space<vmem>>, vector<288x128xf32>,
    %c0_12 = arith.constant 0 : index
    %c0_13 = arith.constant 0 : index
    %10 = vector.load %arg5[%c0_12, %c0_13] : memref<288x128xf32, #tpu.memory_space<vmem>>, vector<288x128xf32>
    %c0_14 = arith.constant 0 : index
    %c1 = arith.constant 1 : index
    %c0_15 = arith.constant 0 : index
    %11 = vector.load %arg1[%c0_14, %c1, %c0_15] : memref<1x342x4xbf16, #tpu.memory_space<vmem>>, vector<1x288x4xbf16>
    %12 = vector.shape_cast %11 : vector<1x288x4xbf16> to vector<288x4xbf16>
    %c1_16 = arith.constant 1 : index
    %c0_17 = arith.constant 0 : index
    %c0_18 = arith.constant 0 : index
    %13 = vector.load %arg2[%c1_16, %c0_17, %c0_18] : memref<9x4x128xbf16, #tpu.memory_space<vmem>>, vector<1x4x128xbf16>
    %14 = vector.shape_cast %13 : vector<1x4x128xbf16> to vector<4x128xbf16>
    %cst_19 = arith.constant dense<0.000000e+00> : vector<288x128xf32>
    %15 = tpu.matmul %12, %14, %cst_19 {dimension_numbers = #tpu.dot_dimension_numbers<[1], [0], [0], [1], [0, 0, 1, 1], [], []>} : vector<288x4xbf16>, vector<4x128xbf16>, vector<288x128xf32> -> vector<288x128xf32>
    %16 = arith.addf %10, %15 : vector<288x128xf32>
    %c0_20 = arith.constant 0 : index
    %c0_21 = arith.constant 0 : index
    %17 = vector.load %arg5[%c0_20, %c0_21] : memref<288x128xf32, #tpu.memory_space<vmem>>, vector<288x128xf32>
    tpu.vector_store %arg5[%c0_20, %c0_21], %16 {strides = array<i32>} : memref<288x128xf32, #tpu.memory_space<vmem>>, vector<288x128xf32>,
    %c0_22 = arith.constant 0 : index
    %c0_23 = arith.constant 0 : index
    %18 = vector.load %arg5[%c0_22, %c0_23] : memref<288x128xf32, #tpu.memory_space<vmem>>, vector<288x128xf32>
    %c0_24 = arith.constant 0 : index
    %c2 = arith.constant 2 : index
    %c0_25 = arith.constant 0 : index
    %19 = vector.load %arg1[%c0_24, %c2, %c0_25] : memref<1x342x4xbf16, #tpu.memory_space<vmem>>, vector<1x288x4xbf16>
    %20 = vector.shape_cast %19 : vector<1x288x4xbf16> to vector<288x4xbf16>
    %c2_26 = arith.constant 2 : index
    %c0_27 = arith.constant 0 : index
    %c0_28 = arith.constant 0 : index
    %21 = vector.load %arg2[%c2_26, %c0_27, %c0_28] : memref<9x4x128xbf16, #tpu.memory_space<vmem>>, vector<1x4x128xbf16>
    %22 = vector.shape_cast %21 : vector<1x4x128xbf16> to vector<4x128xbf16>
    %cst_29 = arith.constant dense<0.000000e+00> : vector<288x128xf32>
    %23 = tpu.matmul %20, %22, %cst_29 {dimension_numbers = #tpu.dot_dimension_numbers<[1], [0], [0], [1], [0, 0, 1, 1], [], []>} : vector<288x4xbf16>, vector<4x128xbf16>, vector<288x128xf32> -> vector<288x128xf32>
    %24 = arith.addf %18, %23 : vector<288x128xf32>
    %c0_30 = arith.constant 0 : index
    %c0_31 = arith.constant 0 : index
    %25 = vector.load %arg5[%c0_30, %c0_31] : memref<288x128xf32, #tpu.memory_space<vmem>>, vector<288x128xf32>
    tpu.vector_store %arg5[%c0_30, %c0_31], %24 {strides = array<i32>} : memref<288x128xf32, #tpu.memory_space<vmem>>, vector<288x128xf32>,
    %c0_32 = arith.constant 0 : index
    %c0_33 = arith.constant 0 : index
    %26 = vector.load %arg5[%c0_32, %c0_33] : memref<288x128xf32, #tpu.memory_space<vmem>>, vector<288x128xf32>
    %c0_34 = arith.constant 0 : index
    %c18 = arith.constant 18 : index
    %c0_35 = arith.constant 0 : index
    %27 = vector.load %arg1[%c0_34, %c18, %c0_35] : memref<1x342x4xbf16, #tpu.memory_space<vmem>>, vector<1x288x4xbf16>
    %28 = vector.shape_cast %27 : vector<1x288x4xbf16> to vector<288x4xbf16>
    %c3 = arith.constant 3 : index
    %c0_36 = arith.constant 0 : index
    %c0_37 = arith.constant 0 : index
    %29 = vector.load %arg2[%c3, %c0_36, %c0_37] : memref<9x4x128xbf16, #tpu.memory_space<vmem>>, vector<1x4x128xbf16>
    %30 = vector.shape_cast %29 : vector<1x4x128xbf16> to vector<4x128xbf16>
    %cst_38 = arith.constant dense<0.000000e+00> : vector<288x128xf32>
    %31 = tpu.matmul %28, %30, %cst_38 {dimension_numbers = #tpu.dot_dimension_numbers<[1], [0], [0], [1], [0, 0, 1, 1], [], []>} : vector<288x4xbf16>, vector<4x128xbf16>, vector<288x128xf32> -> vector<288x128xf32>
    %32 = arith.addf %26, %31 : vector<288x128xf32>
    %c0_39 = arith.constant 0 : index
    %c0_40 = arith.constant 0 : index
    %33 = vector.load %arg5[%c0_39, %c0_40] : memref<288x128xf32, #tpu.memory_space<vmem>>, vector<288x128xf32>
    tpu.vector_store %arg5[%c0_39, %c0_40], %32 {strides = array<i32>} : memref<288x128xf32, #tpu.memory_space<vmem>>, vector<288x128xf32>,
    %c0_41 = arith.constant 0 : index
    %c0_42 = arith.constant 0 : index
    %34 = vector.load %arg5[%c0_41, %c0_42] : memref<288x128xf32, #tpu.memory_space<vmem>>, vector<288x128xf32>
    %c0_43 = arith.constant 0 : index
    %c19 = arith.constant 19 : index
    %c0_44 = arith.constant 0 : index
    %35 = vector.load %arg1[%c0_43, %c19, %c0_44] : memref<1x342x4xbf16, #tpu.memory_space<vmem>>, vector<1x288x4xbf16>
    %36 = vector.shape_cast %35 : vector<1x288x4xbf16> to vector<288x4xbf16>
    %c4 = arith.constant 4 : index
    %c0_45 = arith.constant 0 : index
    %c0_46 = arith.constant 0 : index
    %37 = vector.load %arg2[%c4, %c0_45, %c0_46] : memref<9x4x128xbf16, #tpu.memory_space<vmem>>, vector<1x4x128xbf16>
    %38 = vector.shape_cast %37 : vector<1x4x128xbf16> to vector<4x128xbf16>
    %cst_47 = arith.constant dense<0.000000e+00> : vector<288x128xf32>
    %39 = tpu.matmul %36, %38, %cst_47 {dimension_numbers = #tpu.dot_dimension_numbers<[1], [0], [0], [1], [0, 0, 1, 1], [], []>} : vector<288x4xbf16>, vector<4x128xbf16>, vector<288x128xf32> -> vector<288x128xf32>
    %40 = arith.addf %34, %39 : vector<288x128xf32>
    %c0_48 = arith.constant 0 : index
    %c0_49 = arith.constant 0 : index
    %41 = vector.load %arg5[%c0_48, %c0_49] : memref<288x128xf32, #tpu.memory_space<vmem>>, vector<288x128xf32>
    tpu.vector_store %arg5[%c0_48, %c0_49], %40 {strides = array<i32>} : memref<288x128xf32, #tpu.memory_space<vmem>>, vector<288x128xf32>,
    %c0_50 = arith.constant 0 : index
    %c0_51 = arith.constant 0 : index
    %42 = vector.load %arg5[%c0_50, %c0_51] : memref<288x128xf32, #tpu.memory_space<vmem>>, vector<288x128xf32>
    %c0_52 = arith.constant 0 : index
    %c20 = arith.constant 20 : index
    %c0_53 = arith.constant 0 : index
    %43 = vector.load %arg1[%c0_52, %c20, %c0_53] : memref<1x342x4xbf16, #tpu.memory_space<vmem>>, vector<1x288x4xbf16>
    %44 = vector.shape_cast %43 : vector<1x288x4xbf16> to vector<288x4xbf16>
    %c5 = arith.constant 5 : index
    %c0_54 = arith.constant 0 : index
    %c0_55 = arith.constant 0 : index
    %45 = vector.load %arg2[%c5, %c0_54, %c0_55] : memref<9x4x128xbf16, #tpu.memory_space<vmem>>, vector<1x4x128xbf16>
    %46 = vector.shape_cast %45 : vector<1x4x128xbf16> to vector<4x128xbf16>
    %cst_56 = arith.constant dense<0.000000e+00> : vector<288x128xf32>
    %47 = tpu.matmul %44, %46, %cst_56 {dimension_numbers = #tpu.dot_dimension_numbers<[1], [0], [0], [1], [0, 0, 1, 1], [], []>} : vector<288x4xbf16>, vector<4x128xbf16>, vector<288x128xf32> -> vector<288x128xf32>
    %48 = arith.addf %42, %47 : vector<288x128xf32>
    %c0_57 = arith.constant 0 : index
    %c0_58 = arith.constant 0 : index
    %49 = vector.load %arg5[%c0_57, %c0_58] : memref<288x128xf32, #tpu.memory_space<vmem>>, vector<288x128xf32>
    tpu.vector_store %arg5[%c0_57, %c0_58], %48 {strides = array<i32>} : memref<288x128xf32, #tpu.memory_space<vmem>>, vector<288x128xf32>,
    %c0_59 = arith.constant 0 : index
    %c0_60 = arith.constant 0 : index
    %50 = vector.load %arg5[%c0_59, %c0_60] : memref<288x128xf32, #tpu.memory_space<vmem>>, vector<288x128xf32>
    %c0_61 = arith.constant 0 : index
    %c36 = arith.constant 36 : index
    %c0_62 = arith.constant 0 : index
    %51 = vector.load %arg1[%c0_61, %c36, %c0_62] : memref<1x342x4xbf16, #tpu.memory_space<vmem>>, vector<1x288x4xbf16>
    %52 = vector.shape_cast %51 : vector<1x288x4xbf16> to vector<288x4xbf16>
    %c6 = arith.constant 6 : index
    %c0_63 = arith.constant 0 : index
    %c0_64 = arith.constant 0 : index
    %53 = vector.load %arg2[%c6, %c0_63, %c0_64] : memref<9x4x128xbf16, #tpu.memory_space<vmem>>, vector<1x4x128xbf16>
    %54 = vector.shape_cast %53 : vector<1x4x128xbf16> to vector<4x128xbf16>
    %cst_65 = arith.constant dense<0.000000e+00> : vector<288x128xf32>
    %55 = tpu.matmul %52, %54, %cst_65 {dimension_numbers = #tpu.dot_dimension_numbers<[1], [0], [0], [1], [0, 0, 1, 1], [], []>} : vector<288x4xbf16>, vector<4x128xbf16>, vector<288x128xf32> -> vector<288x128xf32>
    %56 = arith.addf %50, %55 : vector<288x128xf32>
    %c0_66 = arith.constant 0 : index
    %c0_67 = arith.constant 0 : index
    %57 = vector.load %arg5[%c0_66, %c0_67] : memref<288x128xf32, #tpu.memory_space<vmem>>, vector<288x128xf32>
    tpu.vector_store %arg5[%c0_66, %c0_67], %56 {strides = array<i32>} : memref<288x128xf32, #tpu.memory_space<vmem>>, vector<288x128xf32>,
    %c0_68 = arith.constant 0 : index
    %c0_69 = arith.constant 0 : index
    %58 = vector.load %arg5[%c0_68, %c0_69] : memref<288x128xf32, #tpu.memory_space<vmem>>, vector<288x128xf32>
    %c0_70 = arith.constant 0 : index
    %c37 = arith.constant 37 : index
    %c0_71 = arith.constant 0 : index
    %59 = vector.load %arg1[%c0_70, %c37, %c0_71] : memref<1x342x4xbf16, #tpu.memory_space<vmem>>, vector<1x288x4xbf16>
    %60 = vector.shape_cast %59 : vector<1x288x4xbf16> to vector<288x4xbf16>
    %c7 = arith.constant 7 : index
    %c0_72 = arith.constant 0 : index
    %c0_73 = arith.constant 0 : index
    %61 = vector.load %arg2[%c7, %c0_72, %c0_73] : memref<9x4x128xbf16, #tpu.memory_space<vmem>>, vector<1x4x128xbf16>
    %62 = vector.shape_cast %61 : vector<1x4x128xbf16> to vector<4x128xbf16>
    %cst_74 = arith.constant dense<0.000000e+00> : vector<288x128xf32>
    %63 = tpu.matmul %60, %62, %cst_74 {dimension_numbers = #tpu.dot_dimension_numbers<[1], [0], [0], [1], [0, 0, 1, 1], [], []>} : vector<288x4xbf16>, vector<4x128xbf16>, vector<288x128xf32> -> vector<288x128xf32>
    %64 = arith.addf %58, %63 : vector<288x128xf32>
    %c0_75 = arith.constant 0 : index
    %c0_76 = arith.constant 0 : index
    %65 = vector.load %arg5[%c0_75, %c0_76] : memref<288x128xf32, #tpu.memory_space<vmem>>, vector<288x128xf32>
    tpu.vector_store %arg5[%c0_75, %c0_76], %64 {strides = array<i32>} : memref<288x128xf32, #tpu.memory_space<vmem>>, vector<288x128xf32>,
    %c0_77 = arith.constant 0 : index
    %c0_78 = arith.constant 0 : index
    %66 = vector.load %arg5[%c0_77, %c0_78] : memref<288x128xf32, #tpu.memory_space<vmem>>, vector<288x128xf32>
    %c0_79 = arith.constant 0 : index
    %c38 = arith.constant 38 : index
    %c0_80 = arith.constant 0 : index
    %67 = vector.load %arg1[%c0_79, %c38, %c0_80] : memref<1x342x4xbf16, #tpu.memory_space<vmem>>, vector<1x288x4xbf16>
    %68 = vector.shape_cast %67 : vector<1x288x4xbf16> to vector<288x4xbf16>
    %c8 = arith.constant 8 : index
    %c0_81 = arith.constant 0 : index
    %c0_82 = arith.constant 0 : index
    %69 = vector.load %arg2[%c8, %c0_81, %c0_82] : memref<9x4x128xbf16, #tpu.memory_space<vmem>>, vector<1x4x128xbf16>
    %70 = vector.shape_cast %69 : vector<1x4x128xbf16> to vector<4x128xbf16>
    %cst_83 = arith.constant dense<0.000000e+00> : vector<288x128xf32>
    %71 = tpu.matmul %68, %70, %cst_83 {dimension_numbers = #tpu.dot_dimension_numbers<[1], [0], [0], [1], [0, 0, 1, 1], [], []>} : vector<288x4xbf16>, vector<4x128xbf16>, vector<288x128xf32> -> vector<288x128xf32>
    %72 = arith.addf %66, %71 : vector<288x128xf32>
    %c0_84 = arith.constant 0 : index
    %c0_85 = arith.constant 0 : index
    %73 = vector.load %arg5[%c0_84, %c0_85] : memref<288x128xf32, #tpu.memory_space<vmem>>, vector<288x128xf32>
    tpu.vector_store %arg5[%c0_84, %c0_85], %72 {strides = array<i32>} : memref<288x128xf32, #tpu.memory_space<vmem>>, vector<288x128xf32>,
    %c0_86 = arith.constant 0 : index
    %c0_87 = arith.constant 0 : index
    %74 = vector.load %arg5[%c0_86, %c0_87] : memref<288x128xf32, #tpu.memory_space<vmem>>, vector<288x128xf32>
    %c0_88 = arith.constant 0 : index
    %c0_89 = arith.constant 0 : index
    %75 = vector.load %arg3[%c0_88, %c0_89] : memref<1x128xf32, #tpu.memory_space<vmem>>, vector<1x128xf32>
    %76 = vector.broadcast %75 : vector<1x128xf32> to vector<288x128xf32>
    %77 = arith.addf %74, %76 : vector<288x128xf32>
    %cst_90 = arith.constant 0.000000e+00 : f32
    %78 = vector.broadcast %cst_90 : f32 to vector<288x128xf32>
    %79 = arith.maximumf %77, %78 : vector<288x128xf32>
    %80 = arith.truncf %79 : vector<288x128xf32> to vector<288x128xbf16>
    %c0_91 = arith.constant 0 : index
    %c0_92 = arith.constant 0 : index
    %c0_93 = arith.constant 0 : index
    %81 = vector.load %arg4[%c0_91, %c0_92, %c0_93] : memref<1x288x128xbf16, #tpu.memory_space<vmem>>, vector<1x288x128xbf16>
    %82 = vector.shape_cast %81 : vector<1x288x128xbf16> to vector<288x128xbf16>
    %83 = vector.shape_cast %80 : vector<288x128xbf16> to vector<1x288x128xbf16>
    tpu.vector_store %arg4[%c0_91, %c0_92, %c0_93], %83 {strides = array<i32>} : memref<1x288x128xbf16, #tpu.memory_space<vmem>>, vector<1x288x128xbf16>,
    return
  }
  func.func @transform_0(%arg0: i32) -> (i32, i32, i32) {
    %c0_i32 = arith.constant 0 : i32
    %c0_i32_0 = arith.constant 0 : i32
    %c0_i32_1 = arith.constant 0 : i32
    return %arg0, %c0_i32, %c0_i32_0 : i32, i32, i32
  }
  func.func @transform_1(%arg0: i32) -> (i32, i32, i32) {
    %c0_i32 = arith.constant 0 : i32
    %c0_i32_0 = arith.constant 0 : i32
    %c0_i32_1 = arith.constant 0 : i32
    %c0_i32_2 = arith.constant 0 : i32
    return %c0_i32, %c0_i32_0, %c0_i32_1 : i32, i32, i32
  }
  func.func @transform_2(%arg0: i32) -> (i32, i32) {
    %c0_i32 = arith.constant 0 : i32
    %c0_i32_0 = arith.constant 0 : i32
    %c0_i32_1 = arith.constant 0 : i32
    return %c0_i32, %c0_i32_0 : i32, i32
  }
  func.func @transform_3(%arg0: i32) -> (i32, i32, i32) {
    %c0_i32 = arith.constant 0 : i32
    %c0_i32_0 = arith.constant 0 : i32
    %c0_i32_1 = arith.constant 0 : i32
    return %arg0, %c0_i32, %c0_i32_0 : i32, i32, i32
  }
}

module attributes {stable_mosaic.version = 11 : i64} {
  func.func @kernel(%arg0: i32, %arg1: memref<1x110x8xbf16, #tpu.memory_space<vmem>>, %arg2: memref<9x8x128xbf16, #tpu.memory_space<vmem>>, %arg3: memref<1x128xf32, #tpu.memory_space<vmem>>, %arg4: memref<1x80x4xbf16, #tpu.memory_space<vmem>>, %arg5: memref<4x128xbf16, #tpu.memory_space<vmem>>, %arg6: memref<1x128xf32, #tpu.memory_space<vmem>>, %arg7: memref<1x80x128xbf16, #tpu.memory_space<vmem>>, %arg8: memref<1x1x128xf32, #tpu.memory_space<vmem>>, %arg9: memref<80x128xf32, #tpu.memory_space<vmem>>) attributes {dimension_semantics = [#tpu.dimension_semantics<parallel>], iteration_bounds = array<i64: 2>, scalar_prefetch = 0 : i64, scratch_operands = 1 : i64, tpu.core_type = #tpu.core_type<tc>, window_params = [{transform_indices = @transform_0, window_bounds = array<i64: 1, 110, 8>}, {pipeline_mode = #tpu.pipeline_mode<synchronous>, transform_indices = @transform_1, window_bounds = array<i64: 9, 8, 128>}, {pipeline_mode = #tpu.pipeline_mode<synchronous>, transform_indices = @transform_2, window_bounds = array<i64: 1, 128>}, {transform_indices = @transform_3, window_bounds = array<i64: 1, 80, 4>}, {pipeline_mode = #tpu.pipeline_mode<synchronous>, transform_indices = @transform_4, window_bounds = array<i64: 4, 128>}, {pipeline_mode = #tpu.pipeline_mode<synchronous>, transform_indices = @transform_5, window_bounds = array<i64: 1, 128>}, {transform_indices = @transform_6, window_bounds = array<i64: 1, 80, 128>}, {transform_indices = @transform_7, window_bounds = array<i64: 1, 1, 128>}]} {
    %c0 = arith.constant 0 : index
    %c0_0 = arith.constant 0 : index
    %c0_1 = arith.constant 0 : index
    %0 = vector.load %arg4[%c0, %c0_0, %c0_1] : memref<1x80x4xbf16, #tpu.memory_space<vmem>>, vector<1x80x4xbf16>
    %1 = vector.shape_cast %0 : vector<1x80x4xbf16> to vector<80x4xbf16>
    %c0_2 = arith.constant 0 : index
    %c0_3 = arith.constant 0 : index
    %2 = vector.load %arg5[%c0_2, %c0_3] : memref<4x128xbf16, #tpu.memory_space<vmem>>, vector<4x128xbf16>
    %cst = arith.constant dense<0.000000e+00> : vector<80x128xf32>
    %3 = tpu.matmul %1, %2, %cst {dimension_numbers = #tpu.dot_dimension_numbers<[1], [0], [0], [1], [0, 0, 1, 1], [], []>} : vector<80x4xbf16>, vector<4x128xbf16>, vector<80x128xf32> -> vector<80x128xf32>
    %c0_4 = arith.constant 0 : index
    %c0_5 = arith.constant 0 : index
    %4 = vector.load %arg6[%c0_4, %c0_5] : memref<1x128xf32, #tpu.memory_space<vmem>>, vector<1x128xf32>
    %5 = vector.broadcast %4 : vector<1x128xf32> to vector<80x128xf32>
    %6 = arith.addf %3, %5 : vector<80x128xf32>
    %7 = tpu.iota {dimensions = array<i32: 0>} : vector<80x1xi32>
    %c80_i32 = arith.constant 80 : i32
    %8 = vector.broadcast %c80_i32 : i32 to vector<80x1xi32>
    %9 = arith.cmpi slt, %7, %8 : vector<80x1xi32>
    %c10_i32 = arith.constant 10 : i32
    %c0_i32 = arith.constant 0 : i32
    %10 = arith.cmpi eq, %c10_i32, %c0_i32 : i32
    %c1_i32 = arith.constant 1 : i32
    %11 = arith.select %10, %c1_i32, %c10_i32 : i32
    %12 = vector.broadcast %11 : i32 to vector<80x1xi32>
    %13 = arith.remsi %7, %12 : vector<80x1xi32>
    %c0_i32_6 = arith.constant 0 : i32
    %14 = vector.broadcast %c0_i32_6 : i32 to vector<80x1xi32>
    %15 = arith.cmpi ne, %13, %14 : vector<80x1xi32>
    %c0_i32_7 = arith.constant 0 : i32
    %16 = vector.broadcast %c0_i32_7 : i32 to vector<80x1xi32>
    %17 = arith.cmpi slt, %13, %16 : vector<80x1xi32>
    %c0_i32_8 = arith.constant 0 : i32
    %18 = arith.cmpi slt, %11, %c0_i32_8 : i32
    %19 = vector.broadcast %18 : i1 to vector<80x1xi1>
    %20 = vector.broadcast %19 : vector<80x1xi1> to vector<80x1xi1>
    %21 = arith.xori %17, %20 : vector<80x1xi1>
    %22 = arith.andi %21, %15 : vector<80x1xi1>
    %23 = vector.broadcast %11 : i32 to vector<80x1xi32>
    %24 = arith.addi %13, %23 : vector<80x1xi32>
    %25 = arith.select %22, %24, %13 : vector<80x1xi1>, vector<80x1xi32>
    %c8_i32 = arith.constant 8 : i32
    %26 = vector.broadcast %c8_i32 : i32 to vector<80x1xi32>
    %27 = arith.cmpi slt, %25, %26 : vector<80x1xi32>
    %28 = arith.andi %9, %27 : vector<80x1xi1>
    %cst_9 = arith.constant 0.000000e+00 : f32
    %29 = vector.shape_cast %28 : vector<80x1xi1> to vector<80x1xi1>
    %30 = vector.broadcast %29 : vector<80x1xi1> to vector<80x128xi1>
    %31 = vector.broadcast %cst_9 : f32 to vector<80x128xf32>
    %32 = arith.select %30, %6, %31 : vector<80x128xi1>, vector<80x128xf32>
    %33 = math.absf %32 : vector<80x128xf32>
    %cst_10 = arith.constant dense<0xFF800000> : vector<128xf32>
    %34 = vector.multi_reduction <maximumf>, %33, %cst_10 [0] : vector<80x128xf32> to vector<128xf32>
    %35 = vector.shape_cast %34 : vector<128xf32> to vector<1x128xf32>
    %c0_11 = arith.constant 0 : index
    %c0_12 = arith.constant 0 : index
    %c0_13 = arith.constant 0 : index
    %36 = vector.load %arg8[%c0_11, %c0_12, %c0_13] : memref<1x1x128xf32, #tpu.memory_space<vmem>>, vector<1x1x128xf32>
    %37 = vector.shape_cast %36 : vector<1x1x128xf32> to vector<1x128xf32>
    %38 = vector.shape_cast %35 : vector<1x128xf32> to vector<1x1x128xf32>
    tpu.vector_store %arg8[%c0_11, %c0_12, %c0_13], %38 {strides = array<i32>} : memref<1x1x128xf32, #tpu.memory_space<vmem>>, vector<1x1x128xf32>,
    %c0_14 = arith.constant 0 : index
    %c0_15 = arith.constant 0 : index
    %39 = vector.load %arg9[%c0_14, %c0_15] : memref<80x128xf32, #tpu.memory_space<vmem>>, vector<80x128xf32>
    tpu.vector_store %arg9[%c0_14, %c0_15], %6 {strides = array<i32>} : memref<80x128xf32, #tpu.memory_space<vmem>>, vector<80x128xf32>,
    %c0_16 = arith.constant 0 : index
    %c0_17 = arith.constant 0 : index
    %40 = vector.load %arg9[%c0_16, %c0_17] : memref<80x128xf32, #tpu.memory_space<vmem>>, vector<80x128xf32>
    %c0_18 = arith.constant 0 : index
    %c0_19 = arith.constant 0 : index
    %c0_20 = arith.constant 0 : index
    %41 = vector.load %arg1[%c0_18, %c0_19, %c0_20] : memref<1x110x8xbf16, #tpu.memory_space<vmem>>, vector<1x80x8xbf16>
    %42 = vector.shape_cast %41 : vector<1x80x8xbf16> to vector<80x8xbf16>
    %c0_21 = arith.constant 0 : index
    %c0_22 = arith.constant 0 : index
    %c0_23 = arith.constant 0 : index
    %43 = vector.load %arg2[%c0_21, %c0_22, %c0_23] : memref<9x8x128xbf16, #tpu.memory_space<vmem>>, vector<1x8x128xbf16>
    %44 = vector.shape_cast %43 : vector<1x8x128xbf16> to vector<8x128xbf16>
    %cst_24 = arith.constant dense<0.000000e+00> : vector<80x128xf32>
    %45 = tpu.matmul %42, %44, %cst_24 {dimension_numbers = #tpu.dot_dimension_numbers<[1], [0], [0], [1], [0, 0, 1, 1], [], []>} : vector<80x8xbf16>, vector<8x128xbf16>, vector<80x128xf32> -> vector<80x128xf32>
    %46 = arith.addf %40, %45 : vector<80x128xf32>
    %c0_25 = arith.constant 0 : index
    %c0_26 = arith.constant 0 : index
    %47 = vector.load %arg9[%c0_25, %c0_26] : memref<80x128xf32, #tpu.memory_space<vmem>>, vector<80x128xf32>
    tpu.vector_store %arg9[%c0_25, %c0_26], %46 {strides = array<i32>} : memref<80x128xf32, #tpu.memory_space<vmem>>, vector<80x128xf32>,
    %c0_27 = arith.constant 0 : index
    %c0_28 = arith.constant 0 : index
    %48 = vector.load %arg9[%c0_27, %c0_28] : memref<80x128xf32, #tpu.memory_space<vmem>>, vector<80x128xf32>
    %c0_29 = arith.constant 0 : index
    %c1 = arith.constant 1 : index
    %c0_30 = arith.constant 0 : index
    %49 = vector.load %arg1[%c0_29, %c1, %c0_30] : memref<1x110x8xbf16, #tpu.memory_space<vmem>>, vector<1x80x8xbf16>
    %50 = vector.shape_cast %49 : vector<1x80x8xbf16> to vector<80x8xbf16>
    %c1_31 = arith.constant 1 : index
    %c0_32 = arith.constant 0 : index
    %c0_33 = arith.constant 0 : index
    %51 = vector.load %arg2[%c1_31, %c0_32, %c0_33] : memref<9x8x128xbf16, #tpu.memory_space<vmem>>, vector<1x8x128xbf16>
    %52 = vector.shape_cast %51 : vector<1x8x128xbf16> to vector<8x128xbf16>
    %cst_34 = arith.constant dense<0.000000e+00> : vector<80x128xf32>
    %53 = tpu.matmul %50, %52, %cst_34 {dimension_numbers = #tpu.dot_dimension_numbers<[1], [0], [0], [1], [0, 0, 1, 1], [], []>} : vector<80x8xbf16>, vector<8x128xbf16>, vector<80x128xf32> -> vector<80x128xf32>
    %54 = arith.addf %48, %53 : vector<80x128xf32>
    %c0_35 = arith.constant 0 : index
    %c0_36 = arith.constant 0 : index
    %55 = vector.load %arg9[%c0_35, %c0_36] : memref<80x128xf32, #tpu.memory_space<vmem>>, vector<80x128xf32>
    tpu.vector_store %arg9[%c0_35, %c0_36], %54 {strides = array<i32>} : memref<80x128xf32, #tpu.memory_space<vmem>>, vector<80x128xf32>,
    %c0_37 = arith.constant 0 : index
    %c0_38 = arith.constant 0 : index
    %56 = vector.load %arg9[%c0_37, %c0_38] : memref<80x128xf32, #tpu.memory_space<vmem>>, vector<80x128xf32>
    %c0_39 = arith.constant 0 : index
    %c2 = arith.constant 2 : index
    %c0_40 = arith.constant 0 : index
    %57 = vector.load %arg1[%c0_39, %c2, %c0_40] : memref<1x110x8xbf16, #tpu.memory_space<vmem>>, vector<1x80x8xbf16>
    %58 = vector.shape_cast %57 : vector<1x80x8xbf16> to vector<80x8xbf16>
    %c2_41 = arith.constant 2 : index
    %c0_42 = arith.constant 0 : index
    %c0_43 = arith.constant 0 : index
    %59 = vector.load %arg2[%c2_41, %c0_42, %c0_43] : memref<9x8x128xbf16, #tpu.memory_space<vmem>>, vector<1x8x128xbf16>
    %60 = vector.shape_cast %59 : vector<1x8x128xbf16> to vector<8x128xbf16>
    %cst_44 = arith.constant dense<0.000000e+00> : vector<80x128xf32>
    %61 = tpu.matmul %58, %60, %cst_44 {dimension_numbers = #tpu.dot_dimension_numbers<[1], [0], [0], [1], [0, 0, 1, 1], [], []>} : vector<80x8xbf16>, vector<8x128xbf16>, vector<80x128xf32> -> vector<80x128xf32>
    %62 = arith.addf %56, %61 : vector<80x128xf32>
    %c0_45 = arith.constant 0 : index
    %c0_46 = arith.constant 0 : index
    %63 = vector.load %arg9[%c0_45, %c0_46] : memref<80x128xf32, #tpu.memory_space<vmem>>, vector<80x128xf32>
    tpu.vector_store %arg9[%c0_45, %c0_46], %62 {strides = array<i32>} : memref<80x128xf32, #tpu.memory_space<vmem>>, vector<80x128xf32>,
    %c0_47 = arith.constant 0 : index
    %c0_48 = arith.constant 0 : index
    %64 = vector.load %arg9[%c0_47, %c0_48] : memref<80x128xf32, #tpu.memory_space<vmem>>, vector<80x128xf32>
    %c0_49 = arith.constant 0 : index
    %c10 = arith.constant 10 : index
    %c0_50 = arith.constant 0 : index
    %65 = vector.load %arg1[%c0_49, %c10, %c0_50] : memref<1x110x8xbf16, #tpu.memory_space<vmem>>, vector<1x80x8xbf16>
    %66 = vector.shape_cast %65 : vector<1x80x8xbf16> to vector<80x8xbf16>
    %c3 = arith.constant 3 : index
    %c0_51 = arith.constant 0 : index
    %c0_52 = arith.constant 0 : index
    %67 = vector.load %arg2[%c3, %c0_51, %c0_52] : memref<9x8x128xbf16, #tpu.memory_space<vmem>>, vector<1x8x128xbf16>
    %68 = vector.shape_cast %67 : vector<1x8x128xbf16> to vector<8x128xbf16>
    %cst_53 = arith.constant dense<0.000000e+00> : vector<80x128xf32>
    %69 = tpu.matmul %66, %68, %cst_53 {dimension_numbers = #tpu.dot_dimension_numbers<[1], [0], [0], [1], [0, 0, 1, 1], [], []>} : vector<80x8xbf16>, vector<8x128xbf16>, vector<80x128xf32> -> vector<80x128xf32>
    %70 = arith.addf %64, %69 : vector<80x128xf32>
    %c0_54 = arith.constant 0 : index
    %c0_55 = arith.constant 0 : index
    %71 = vector.load %arg9[%c0_54, %c0_55] : memref<80x128xf32, #tpu.memory_space<vmem>>, vector<80x128xf32>
    tpu.vector_store %arg9[%c0_54, %c0_55], %70 {strides = array<i32>} : memref<80x128xf32, #tpu.memory_space<vmem>>, vector<80x128xf32>,
    %c0_56 = arith.constant 0 : index
    %c0_57 = arith.constant 0 : index
    %72 = vector.load %arg9[%c0_56, %c0_57] : memref<80x128xf32, #tpu.memory_space<vmem>>, vector<80x128xf32>
    %c0_58 = arith.constant 0 : index
    %c11 = arith.constant 11 : index
    %c0_59 = arith.constant 0 : index
    %73 = vector.load %arg1[%c0_58, %c11, %c0_59] : memref<1x110x8xbf16, #tpu.memory_space<vmem>>, vector<1x80x8xbf16>
    %74 = vector.shape_cast %73 : vector<1x80x8xbf16> to vector<80x8xbf16>
    %c4 = arith.constant 4 : index
    %c0_60 = arith.constant 0 : index
    %c0_61 = arith.constant 0 : index
    %75 = vector.load %arg2[%c4, %c0_60, %c0_61] : memref<9x8x128xbf16, #tpu.memory_space<vmem>>, vector<1x8x128xbf16>
    %76 = vector.shape_cast %75 : vector<1x8x128xbf16> to vector<8x128xbf16>
    %cst_62 = arith.constant dense<0.000000e+00> : vector<80x128xf32>
    %77 = tpu.matmul %74, %76, %cst_62 {dimension_numbers = #tpu.dot_dimension_numbers<[1], [0], [0], [1], [0, 0, 1, 1], [], []>} : vector<80x8xbf16>, vector<8x128xbf16>, vector<80x128xf32> -> vector<80x128xf32>
    %78 = arith.addf %72, %77 : vector<80x128xf32>
    %c0_63 = arith.constant 0 : index
    %c0_64 = arith.constant 0 : index
    %79 = vector.load %arg9[%c0_63, %c0_64] : memref<80x128xf32, #tpu.memory_space<vmem>>, vector<80x128xf32>
    tpu.vector_store %arg9[%c0_63, %c0_64], %78 {strides = array<i32>} : memref<80x128xf32, #tpu.memory_space<vmem>>, vector<80x128xf32>,
    %c0_65 = arith.constant 0 : index
    %c0_66 = arith.constant 0 : index
    %80 = vector.load %arg9[%c0_65, %c0_66] : memref<80x128xf32, #tpu.memory_space<vmem>>, vector<80x128xf32>
    %c0_67 = arith.constant 0 : index
    %c12 = arith.constant 12 : index
    %c0_68 = arith.constant 0 : index
    %81 = vector.load %arg1[%c0_67, %c12, %c0_68] : memref<1x110x8xbf16, #tpu.memory_space<vmem>>, vector<1x80x8xbf16>
    %82 = vector.shape_cast %81 : vector<1x80x8xbf16> to vector<80x8xbf16>
    %c5 = arith.constant 5 : index
    %c0_69 = arith.constant 0 : index
    %c0_70 = arith.constant 0 : index
    %83 = vector.load %arg2[%c5, %c0_69, %c0_70] : memref<9x8x128xbf16, #tpu.memory_space<vmem>>, vector<1x8x128xbf16>
    %84 = vector.shape_cast %83 : vector<1x8x128xbf16> to vector<8x128xbf16>
    %cst_71 = arith.constant dense<0.000000e+00> : vector<80x128xf32>
    %85 = tpu.matmul %82, %84, %cst_71 {dimension_numbers = #tpu.dot_dimension_numbers<[1], [0], [0], [1], [0, 0, 1, 1], [], []>} : vector<80x8xbf16>, vector<8x128xbf16>, vector<80x128xf32> -> vector<80x128xf32>
    %86 = arith.addf %80, %85 : vector<80x128xf32>
    %c0_72 = arith.constant 0 : index
    %c0_73 = arith.constant 0 : index
    %87 = vector.load %arg9[%c0_72, %c0_73] : memref<80x128xf32, #tpu.memory_space<vmem>>, vector<80x128xf32>
    tpu.vector_store %arg9[%c0_72, %c0_73], %86 {strides = array<i32>} : memref<80x128xf32, #tpu.memory_space<vmem>>, vector<80x128xf32>,
    %c0_74 = arith.constant 0 : index
    %c0_75 = arith.constant 0 : index
    %88 = vector.load %arg9[%c0_74, %c0_75] : memref<80x128xf32, #tpu.memory_space<vmem>>, vector<80x128xf32>
    %c0_76 = arith.constant 0 : index
    %c20 = arith.constant 20 : index
    %c0_77 = arith.constant 0 : index
    %89 = vector.load %arg1[%c0_76, %c20, %c0_77] : memref<1x110x8xbf16, #tpu.memory_space<vmem>>, vector<1x80x8xbf16>
    %90 = vector.shape_cast %89 : vector<1x80x8xbf16> to vector<80x8xbf16>
    %c6 = arith.constant 6 : index
    %c0_78 = arith.constant 0 : index
    %c0_79 = arith.constant 0 : index
    %91 = vector.load %arg2[%c6, %c0_78, %c0_79] : memref<9x8x128xbf16, #tpu.memory_space<vmem>>, vector<1x8x128xbf16>
    %92 = vector.shape_cast %91 : vector<1x8x128xbf16> to vector<8x128xbf16>
    %cst_80 = arith.constant dense<0.000000e+00> : vector<80x128xf32>
    %93 = tpu.matmul %90, %92, %cst_80 {dimension_numbers = #tpu.dot_dimension_numbers<[1], [0], [0], [1], [0, 0, 1, 1], [], []>} : vector<80x8xbf16>, vector<8x128xbf16>, vector<80x128xf32> -> vector<80x128xf32>
    %94 = arith.addf %88, %93 : vector<80x128xf32>
    %c0_81 = arith.constant 0 : index
    %c0_82 = arith.constant 0 : index
    %95 = vector.load %arg9[%c0_81, %c0_82] : memref<80x128xf32, #tpu.memory_space<vmem>>, vector<80x128xf32>
    tpu.vector_store %arg9[%c0_81, %c0_82], %94 {strides = array<i32>} : memref<80x128xf32, #tpu.memory_space<vmem>>, vector<80x128xf32>,
    %c0_83 = arith.constant 0 : index
    %c0_84 = arith.constant 0 : index
    %96 = vector.load %arg9[%c0_83, %c0_84] : memref<80x128xf32, #tpu.memory_space<vmem>>, vector<80x128xf32>
    %c0_85 = arith.constant 0 : index
    %c21 = arith.constant 21 : index
    %c0_86 = arith.constant 0 : index
    %97 = vector.load %arg1[%c0_85, %c21, %c0_86] : memref<1x110x8xbf16, #tpu.memory_space<vmem>>, vector<1x80x8xbf16>
    %98 = vector.shape_cast %97 : vector<1x80x8xbf16> to vector<80x8xbf16>
    %c7 = arith.constant 7 : index
    %c0_87 = arith.constant 0 : index
    %c0_88 = arith.constant 0 : index
    %99 = vector.load %arg2[%c7, %c0_87, %c0_88] : memref<9x8x128xbf16, #tpu.memory_space<vmem>>, vector<1x8x128xbf16>
    %100 = vector.shape_cast %99 : vector<1x8x128xbf16> to vector<8x128xbf16>
    %cst_89 = arith.constant dense<0.000000e+00> : vector<80x128xf32>
    %101 = tpu.matmul %98, %100, %cst_89 {dimension_numbers = #tpu.dot_dimension_numbers<[1], [0], [0], [1], [0, 0, 1, 1], [], []>} : vector<80x8xbf16>, vector<8x128xbf16>, vector<80x128xf32> -> vector<80x128xf32>
    %102 = arith.addf %96, %101 : vector<80x128xf32>
    %c0_90 = arith.constant 0 : index
    %c0_91 = arith.constant 0 : index
    %103 = vector.load %arg9[%c0_90, %c0_91] : memref<80x128xf32, #tpu.memory_space<vmem>>, vector<80x128xf32>
    tpu.vector_store %arg9[%c0_90, %c0_91], %102 {strides = array<i32>} : memref<80x128xf32, #tpu.memory_space<vmem>>, vector<80x128xf32>,
    %c0_92 = arith.constant 0 : index
    %c0_93 = arith.constant 0 : index
    %104 = vector.load %arg9[%c0_92, %c0_93] : memref<80x128xf32, #tpu.memory_space<vmem>>, vector<80x128xf32>
    %c0_94 = arith.constant 0 : index
    %c22 = arith.constant 22 : index
    %c0_95 = arith.constant 0 : index
    %105 = vector.load %arg1[%c0_94, %c22, %c0_95] : memref<1x110x8xbf16, #tpu.memory_space<vmem>>, vector<1x80x8xbf16>
    %106 = vector.shape_cast %105 : vector<1x80x8xbf16> to vector<80x8xbf16>
    %c8 = arith.constant 8 : index
    %c0_96 = arith.constant 0 : index
    %c0_97 = arith.constant 0 : index
    %107 = vector.load %arg2[%c8, %c0_96, %c0_97] : memref<9x8x128xbf16, #tpu.memory_space<vmem>>, vector<1x8x128xbf16>
    %108 = vector.shape_cast %107 : vector<1x8x128xbf16> to vector<8x128xbf16>
    %cst_98 = arith.constant dense<0.000000e+00> : vector<80x128xf32>
    %109 = tpu.matmul %106, %108, %cst_98 {dimension_numbers = #tpu.dot_dimension_numbers<[1], [0], [0], [1], [0, 0, 1, 1], [], []>} : vector<80x8xbf16>, vector<8x128xbf16>, vector<80x128xf32> -> vector<80x128xf32>
    %110 = arith.addf %104, %109 : vector<80x128xf32>
    %c0_99 = arith.constant 0 : index
    %c0_100 = arith.constant 0 : index
    %111 = vector.load %arg9[%c0_99, %c0_100] : memref<80x128xf32, #tpu.memory_space<vmem>>, vector<80x128xf32>
    tpu.vector_store %arg9[%c0_99, %c0_100], %110 {strides = array<i32>} : memref<80x128xf32, #tpu.memory_space<vmem>>, vector<80x128xf32>,
    %c0_101 = arith.constant 0 : index
    %c0_102 = arith.constant 0 : index
    %112 = vector.load %arg9[%c0_101, %c0_102] : memref<80x128xf32, #tpu.memory_space<vmem>>, vector<80x128xf32>
    %c0_103 = arith.constant 0 : index
    %c0_104 = arith.constant 0 : index
    %113 = vector.load %arg3[%c0_103, %c0_104] : memref<1x128xf32, #tpu.memory_space<vmem>>, vector<1x128xf32>
    %114 = vector.broadcast %113 : vector<1x128xf32> to vector<80x128xf32>
    %115 = arith.addf %112, %114 : vector<80x128xf32>
    %cst_105 = arith.constant 0.000000e+00 : f32
    %116 = vector.broadcast %cst_105 : f32 to vector<80x128xf32>
    %117 = arith.maximumf %115, %116 : vector<80x128xf32>
    %118 = arith.truncf %117 : vector<80x128xf32> to vector<80x128xbf16>
    %c0_106 = arith.constant 0 : index
    %c0_107 = arith.constant 0 : index
    %c0_108 = arith.constant 0 : index
    %119 = vector.load %arg7[%c0_106, %c0_107, %c0_108] : memref<1x80x128xbf16, #tpu.memory_space<vmem>>, vector<1x80x128xbf16>
    %120 = vector.shape_cast %119 : vector<1x80x128xbf16> to vector<80x128xbf16>
    %121 = vector.shape_cast %118 : vector<80x128xbf16> to vector<1x80x128xbf16>
    tpu.vector_store %arg7[%c0_106, %c0_107, %c0_108], %121 {strides = array<i32>} : memref<1x80x128xbf16, #tpu.memory_space<vmem>>, vector<1x80x128xbf16>,
    return
  }
  func.func @transform_0(%arg0: i32) -> (i32, i32, i32) {
    %c0_i32 = arith.constant 0 : i32
    %c0_i32_0 = arith.constant 0 : i32
    %c0_i32_1 = arith.constant 0 : i32
    return %arg0, %c0_i32, %c0_i32_0 : i32, i32, i32
  }
  func.func @transform_1(%arg0: i32) -> (i32, i32, i32) {
    %c0_i32 = arith.constant 0 : i32
    %c0_i32_0 = arith.constant 0 : i32
    %c0_i32_1 = arith.constant 0 : i32
    %c0_i32_2 = arith.constant 0 : i32
    return %c0_i32, %c0_i32_0, %c0_i32_1 : i32, i32, i32
  }
  func.func @transform_2(%arg0: i32) -> (i32, i32) {
    %c0_i32 = arith.constant 0 : i32
    %c0_i32_0 = arith.constant 0 : i32
    %c0_i32_1 = arith.constant 0 : i32
    return %c0_i32, %c0_i32_0 : i32, i32
  }
  func.func @transform_3(%arg0: i32) -> (i32, i32, i32) {
    %c0_i32 = arith.constant 0 : i32
    %c0_i32_0 = arith.constant 0 : i32
    %c0_i32_1 = arith.constant 0 : i32
    return %arg0, %c0_i32, %c0_i32_0 : i32, i32, i32
  }
  func.func @transform_4(%arg0: i32) -> (i32, i32) {
    %c0_i32 = arith.constant 0 : i32
    %c0_i32_0 = arith.constant 0 : i32
    %c0_i32_1 = arith.constant 0 : i32
    return %c0_i32, %c0_i32_0 : i32, i32
  }
  func.func @transform_5(%arg0: i32) -> (i32, i32) {
    %c0_i32 = arith.constant 0 : i32
    %c0_i32_0 = arith.constant 0 : i32
    %c0_i32_1 = arith.constant 0 : i32
    return %c0_i32, %c0_i32_0 : i32, i32
  }
  func.func @transform_6(%arg0: i32) -> (i32, i32, i32) {
    %c0_i32 = arith.constant 0 : i32
    %c0_i32_0 = arith.constant 0 : i32
    %c0_i32_1 = arith.constant 0 : i32
    return %arg0, %c0_i32, %c0_i32_0 : i32, i32, i32
  }
  func.func @transform_7(%arg0: i32) -> (i32, i32, i32) {
    %c0_i32 = arith.constant 0 : i32
    %c0_i32_0 = arith.constant 0 : i32
    %c0_i32_1 = arith.constant 0 : i32
    return %arg0, %c0_i32, %c0_i32_0 : i32, i32, i32
  }
}

</mosaic_0001>

<bundles_post_ra>
// kernel: residual_block_apply.3
= control target key start
LH: loop header
LB: loop body
LE: loop exit
PB: predicated region body
PF: predicated region fallthrough
CT: control target
= control target key end

     0   :  { %s2722_s24 = smov 0   ;;  %s3571_s0 = inlined_call_operand.vmem [shape: bf16[2,110,8], index: 0, kind: input, shape index: {}]   ;;  %s3572_s1 = inlined_call_operand.vmem [shape: bf16[9,8,128], index: 1, kind: input, shape index: {}]   ;;  %s3573_s2 = inlined_call_operand.vmem [shape: f32[1,128], index: 2, kind: input, shape index: {}]   ;;  %s3574_s3 = inlined_call_operand.vmem [shape: bf16[2,80,4], index: 3, kind: input, shape index: {}]   ;;  %s3575_s4 = inlined_call_operand.vmem [shape: bf16[4,128], index: 4, kind: input, shape index: {}]   ;;  %s3576_s5 = inlined_call_operand.vmem [shape: f32[1,128], index: 5, kind: input, shape index: {}]   ;;  %s3577_s6 = inlined_call_operand.vmem [shape: bf16[2,80,128], index: 6, kind: output, shape index: {0}]   ;;  %s3578_s7 = inlined_call_operand.vmem [shape: f32[2,1,128], index: 7, kind: output, shape index: {1}]  }
   0x1 LB: > { %s2311_s25 = sadd.s32 4294967295, %s2679_s24   ;;  %p2315_p0 = scmp.ge.s32.totalorder %s2679_s24, 1  ;;  %s2679_s24 = sphi %s2722_s24, %s18_s24  }
   0x2   : > { %p250_p1 = scmp.lt.s32.totalorder %s2679_s24, 3 }
   0x4   : > { %p251_p2 = pnand %p2315_p0, %p250_p1 }
   0x5   : > { %p290_p3 = scmp.lt.s32.totalorder (!%p251_p2), %s2311_s25, 1 }
   0x6   : > { %254 = sbr.rel (%p251_p2) target bundleno = 357 (0x165), region = 44 }
   0xb   : > { %v319_v0 = vld [vmem:[%s3575_s4] sm:$0x3]  ;;  %vm365_vm0 = vcmask 1041408   ;;  %vm912_vm1 = vcmask 1043456   ;;  %v2421_v4 = vld [vmem:[%s3572_s1 + $0xc] sm:$0xf] }
   0xc   : > { %v870_v1 = vld [vmem:[%s3572_s1] sm:$0xf]  ;;  %v367_v2 = vsel %vm365_vm0, %v319_v0, 0  ;;  %v2447_v5 = vld [vmem:[%s3572_s1 + $0x10] sm:$0xf]  ;;  %s3618_s25 = smov (!%p290_p3, %s2311_s25), 1 }
   0xd   : > { %v914_v3 = vsel %vm912_vm1, %v870_v1, 0  ;;  %376 = vmatpush.bf16.msra.mxu0 %v367_v2  ;;  %2658 = vmatpush.bf16.msra.mxu2 %v367_v2  ;;  %v2369_v6 = vld [vmem:[%s3572_s1 + $0x4] sm:$0xf]  ;;  %v1351_v7 = vsel %vm912_vm1, %v2421_v4, 0  ;;  %v1528_v8 = vsel %vm912_vm1, %v2447_v5, 0  ;;  %s2660_s15 = smul.u32 56, %s3618_s25  ;;  %s307_s14 = scalar_lea.vmem %s3578_s7, %s3618_s25 }
   0xe   : > { %923 = vmatpush.bf16.msra.mxu1 %v914_v3  ;;  %2659 = vmatpush.bf16.msra.mxu3 %v914_v3  ;;  %v1082_v9 = vsel %vm912_vm1, %v2369_v6, 0  ;;  %v2395_v10 = vld [vmem:[%s3572_s1 + $0x8] sm:$0xf]  ;;  %s2661_s16 = smul.u32 40, %s3618_s25  ;;  %vm896_vm2 = vcmask 64512   ;;  %vm349_vm3 = vcmask 31744  }
   0xf   : > { %v1217_v11 = vsel %vm912_vm1, %v2395_v10, 0  ;;  %s2760_s19 = scalar_lea.vmem %s3571_s0, %s2660_s15  ;;  %v2473_v16 = vld [vmem:[%s3572_s1 + $0x14] sm:$0xf]  ;;  %v2499_v18 = vld [vmem:[%s3572_s1 + $0x18] sm:$0xf]  ;;  %vm1189_vm4 = vcmask 1046528  }
  0x10   : > { %s2767_s22 = scalar_lea.vmem %s3574_s3, %s2661_s16  ;;  %v2584_v12 = vld [vmem:[%s2760_s19] sm:$0xff]  ;;  %v2587_v13 = vld [vmem:[%s2760_s19 + $0x18] sm:$0xff]  ;;  %v1663_v17 = vsel %vm912_vm1, %v2473_v16, 0  ;;  %v1797_v19 = vsel %vm912_vm1, %v2499_v18, 0  ;;  %v2585_v20 = vld [vmem:[%s2760_s19 + $0x8] sm:$0xff]  ;;  %vm1635_vm10 = vcmask 1045504   ;;  %s3546_s20 = scalar_lea.vmem %s3577_s6, %s2661_s16 }
  0x11   : > { %1360 = vmatpush.bf16.msrb.mxu0 %v1351_v7  ;;  %1091 = vmatpush.bf16.msrb.mxu2 %v1082_v9  ;;  %v2579_v14 = vld [vmem:[%s2767_s22] sm:$0xff]  ;;  %v2582_v15 = vld [vmem:[%s2767_s22 + $0x18] sm:$0xff]  ;;  %v2580_v22 = vld [vmem:[%s2767_s22 + $0x8] sm:$0xff]  ;;  %vm1021_vm5 = vsmask.f32 7424 }
  0x12   : > { %1537 = vmatpush.bf16.msrb.mxu1 %v1528_v8  ;;  %1226 = vmatpush.bf16.msrb.mxu3 %v1217_v11  ;;  %v2588_v21 = vld [vmem:[%s2760_s19 + $0x20] sm:$0xff]  ;;  %v2525_v26 = vld [vmem:[%s3572_s1 + $0x1c] sm:$0xf]  ;;  %v2590_v28 = vld [vmem:[%s2760_s19 + $0x8] sm:$0xff]  ;;  %vm1458_vm6 = vsmask.f32 6400 }
  0x13   : > { %2364 = vmatmul.msk.bf16.vlgmr.msra.gmra.mxu1 %vm896_vm2, %v2584_v12  ;;  %2367 = vmatmul.msk.bf16.vlgmr.msra.gmra.mxu3 %vm896_vm2, %v2587_v13  ;;  %v2583_v23 = vld [vmem:[%s2767_s22 + $0x20] sm:$0xff]  ;;  %v1974_v31 = vsel %vm912_vm1, %v2525_v26, 0  ;;  %v2595_v33 = vld [vmem:[%s2760_s19 + $0x8] sm:$0xff]  ;;  %v1030_v37 = vshll.u32 %v2590_v28, 16  ;;  %v2586_v44 = vld [vmem:[%s2760_s19 + $0x10] sm:$0xff]  ;;  %v1034_v57 = vshrl.u32 %v2590_v28, 16 }
  0x14   : > { %2339 = vmatmul.msk.bf16.vlgmr.msra.gmra.mxu0 %vm349_vm3, %v2579_v14  ;;  %2342 = vmatmul.msk.bf16.vlgmr.msra.gmra.mxu2 %vm349_vm3, %v2582_v15  ;;  %v2589_v24 = vld [vmem:[%s2760_s19] sm:$0xff]  ;;  %v1191_v39 = vrot.slane %v2595_v33, 1  ;;  %v2604_v43 = vld [vmem:[%s2760_s19 + $0x4] sm:$0xf0]  ;;  %v2581_v45 = vld [vmem:[%s2767_s22 + $0x10] sm:$0xff] }
  0x15   : > { %1672 = vmatpush.bf16.msra.mxu2 %v1663_v17  ;;  %v2398_v25 = vld [vmem:[%s2760_s19] sm:$0xe]  ;;  %v1025_v29 = vshll.u32 %v2589_v24, 16  ;;  %v2594_v30 = vld [vmem:[%s2760_s19] sm:$0xf0]  ;;  %1983 = vmatpush.bf16.msra.mxu0 %v1974_v31  ;;  %v1023_v35 = vshrl.u32 %v2589_v24, 16 }
  0x16   : > { %1806 = vmatpush.bf16.msra.mxu3 %v1797_v19  ;;  %v2551_v27 = vld [vmem:[%s3572_s1 + $0x20] sm:$0xf]  ;;  %v2399_v34 = vor.u32 %v2594_v30, %v2398_v25  ;;  %v1032_v41 = vrot.slane %v1030_v37, 1  ;;  %v2450_v42 = vld [vmem:[%s2760_s19 + $0x4] sm:$0xe]  ;;  %v2605_v47 = vld [vmem:[%s2760_s19 + $0xc] sm:$0xff] }
  0x17   : > { %v2109_v32 = vsel %vm912_vm1, %v2551_v27, 0  ;;  %v1027_v36 = vrot.slane %v1025_v29, 1  ;;  %v2451_v48 = vor.u32 %v2604_v43, %v2450_v42  ;;  %v1468_v52 = vshrl.u32 %v2605_v47, 16  ;;  %v2591_v54 = vld [vmem:[%s2760_s19 + $0x10] sm:$0xff]  ;;  %v2424_v55 = vld [vmem:[%s2760_s19 + $0x4] sm:$0xe] }
  0x18   : > { %2118 = vmatpush.bf16.msra.mxu1 %v2109_v32  ;;  %v1190_v38 = vrot.slane %v2399_v34, 1  ;;  %v1471_v53 = vshll.u32 %v2605_v47, 16  ;;  %v2599_v56 = vld [vmem:[%s2760_s19 + $0x4] sm:$0xf0]  ;;  %v2596_v58 = vld [vmem:[%s2760_s19 + $0x10] sm:$0xff]  ;;  %v1038_v63 = vshll.u32 %v2591_v54, 16  ;;  %v1036_v2 = vor.u32 %v1034_v57, %v1032_v41 }
  0x19   : > { %v1028_v40 = vor.u32 %v1027_v36, %v1023_v35  ;;  %v1460_v50 = vshrl.u32 %v2451_v48, 16  ;;  %v1463_v51 = vshll.u32 %v2451_v48, 16  ;;  %v1470_v61 = vrot.slane %v1468_v52, 1  ;;  %v2600_v0 = vld [vmem:[%s2760_s19 + $0xc] sm:$0xff]  ;;  %v2606_v11 = vld [vmem:[%s2760_s19 + $0x14] sm:$0xff]  ;;  %v2607_v29 = vld [vmem:[%s2760_s19 + $0x1c] sm:$0xff] }
  0x1a   : > { %v1192_v46 = vsel %vm1189_vm4, %v1190_v38, %v1191_v39  ;;  %v1473_v62 = vrot.slane %v1471_v53, 2  ;;  %v2425_v1 = vor.u32 %v2599_v56, %v2424_v55  ;;  %v1193_v3 = vrot.slane %v2596_v58, 1  ;;  %v2592_v16 = vld [vmem:[%s2760_s19 + $0x18] sm:$0xff]  ;;  %v990_v28 = vld [vmem:[%s2760_s19 + $0x28] sm:$0x1]  ;;  %v2593_v35 = vld [vmem:[%s2760_s19 + $0x20] sm:$0xff] }
  0x1b   : > { %v1033_v49 = vsel %vm1021_vm5, %v1028_v40, %v1032_v41  ;;  %v1462_v59 = vrot.slane %v1460_v50, 1  ;;  %v1465_v60 = vrot.slane %v1463_v51, 2  ;;  %v1040_v6 = vrot.slane %v1038_v63, 1  ;;  %v2597_v17 = vld [vmem:[%s2760_s19 + $0x18] sm:$0xff]  ;;  %v1158_v38 = vld [vmem:[%s2760_s19 + $0x28] sm:$0x1] }
  0x1c   : > { %v1474_v5 = vor.u32 %v1473_v62, %v1470_v61  ;;  %v1324_v7 = vrot.slane %v2425_v1, 1  ;;  %v1325_v8 = vrot.slane %v2600_v0, 1  ;;  %v1194_v9 = vsel %vm1189_vm4, %v1191_v39, %v1193_v3  ;;  %v2608_v40 = vld [vmem:[%s2760_s19 + $0x24] sm:$0xff]  ;;  %v2602_v48 = vld [vmem:[%s2760_s19 + $0x1c] sm:$0xff]  ;;  %v1427_v50 = vld [vmem:[%s2760_s19 + $0x2c] sm:$0x3] }
  0x1d   : > { %v1466_v4 = vor.u32 %v1465_v60, %v1462_v59  ;;  %v1041_v12 = vsel %vm1021_vm5, %v1036_v2, %v1040_v6  ;;  %v1477_v14 = vshrl.u32 %v2606_v11, 16  ;;  %v1480_v15 = vshll.u32 %v2606_v11, 16  ;;  %v2857_v61 = vld [vmem:[%s2760_s19 + $0x24] sm:$0xff]  ;;  %v1293_v0 = vld [vmem:[%s2760_s19 + $0x2c] sm:$0x1] }
  0x1e   : > { %v1326_v13 = vsel %vm1189_vm4, %v1324_v7, %v1325_v8  ;;  %v1014_v34 = vunpack.c.l.b16 %v990_v28  ;;  %v1486_v36 = vshrl.u32 %v2607_v29, 16  ;;  %v1489_v37 = vshll.u32 %v2607_v29, 16 }
  0x1f   : > { %v1475_v10 = vsel %vm1458_vm6, %v1466_v4, %v1474_v5  ;;  %v1479_v18 = vrot.slane %v1477_v14, 1  ;;  %v1482_v19 = vrot.slane %v1480_v15, 2  ;;  %v1182_v41 = vunpack.c.l.b16 %v1158_v38 }
  0x20   : > { %v1020_v39 = vpack.c.b16 %v1014_v34, %v1014_v34  ;;  %v403_v42 = vlaneseq  ;;  %v1054_v43 = vshll.u32 %v2593_v35, 16  ;;  %v1050_v47 = vshrl.u32 %v2592_v16, 16 }
  0x21   : > { %v1483_v24 = vor.u32 %v1482_v19, %v1479_v18  ;;  %v1495_v53 = vshrl.u32 %v2608_v40, 16  ;;  %v1451_v55 = vunpack.c.l.b16 %v1427_v50  ;;  %v1188_v56 = vpack.c.b16 %v1182_v41, %v1182_v41 }
  0x22   : > { %v2853_v51 = vshrl.u32 %v403_v42, 7  ;;  %v1062_v52 = vshll.u32 %v1020_v39, 16  ;;  %v1056_v58 = vrot.slane %v1054_v43, 1  ;;  %v1329_v63 = vrot.slane %v2602_v48, 1  ;;  %v2502_v39 = vld [vmem:[%s2760_s19 + $0x8] sm:$0xc] }
  0x23   : > { %2365 = vmatmul.msk.bf16.gmra.mxu1 %vm896_vm2, %v2585_v20  ;;  %2368 = vmatmul.msk.bf16.gmra.mxu3 %vm896_vm2, %v2588_v21  ;;  %v1042_v20 = vshrl.u32 %v2591_v54, 16  ;;  %v1046_v21 = vshll.u32 %v2592_v16, 16  ;;  %v1484_v31 = vsel %vm1458_vm6, %v1474_v5, %v1483_v24  ;;  %v1498_v54 = vshll.u32 %v2608_v40, 16  ;;  %v2614_v40 = vld [vmem:[%s2760_s19 + $0x8] sm:$0xf0] }
  0x24   : > { %2340 = vmatmul.msk.bf16.gmra.mxu0 %vm349_vm3, %v2580_v22  ;;  %2343 = vmatmul.msk.bf16.gmra.mxu2 %vm349_vm3, %v2583_v23  ;;  %v2834_v22 = vld [vmem:[%s2760_s19 + $0x14] sm:$0xff]  ;;  %v1195_v23 = vrot.slane %v2597_v17, 1  ;;  %v427_v57 = vand.u32 65535, %v2853_v51  ;;  %v1457_v1 = vpack.c.b16 %v1451_v55, %v1451_v55  ;;  %v428_v2 = vshrl.u32 %v2853_v51, 16 }
  0x25   : > { %v1044_v25 = vor.u32 %v1042_v20, %v1040_v6  ;;  %v1048_v26 = vrot.slane %v1046_v21, 1  ;;  %v1327_v27 = vrot.slane %v2834_v22, 1  ;;  %v1064_v4 = vrot.slane %v1062_v52, 1  ;;  %v2476_v21 = vld [vmem:[%s2760_s19 + $0x4] sm:$0xc] }
  0x26   : > { %v1196_v30 = vsel %vm1189_vm4, %v1193_v3, %v1195_v23  ;;  %v1497_v5 = vrot.slane %v1495_v53, 1  ;;  %v1500_v6 = vrot.slane %v1498_v54, 2  ;;  %v1199_v7 = vrot.slane %v1188_v56, 1 }
  0x27   : > { %v1049_v32 = vsel %vm1021_vm5, %v1044_v25, %v1048_v26  ;;  %v1328_v33 = vsel %vm1189_vm4, %v1325_v8, %v1327_v27  ;;  %v1052_v62 = vor.u32 %v1050_v47, %v1048_v26  ;;  %v431_v8 = vmul.u32 52428, %v427_v57 }
  0x28   : > { %v1331_v11 = vrot.slane %v2857_v61, 1  ;;  %v1507_v14 = vshll.u32 %v1457_v1, 16  ;;  %v430_v15 = vmul.u32 52429, %v427_v57  ;;  %v432_v16 = vmul.u32 52429, %v428_v2 }
  0x29   : > { %v1057_v17 = vsel %vm1021_vm5, %v1052_v62, %v1056_v58  ;;  %v1330_v18 = vsel %vm1189_vm4, %v1327_v27, %v1329_v63  ;;  %v2869_v20 = vor.u32 %v1500_v6, %v1497_v5  ;;  %v434_v25 = vshll.u32 %v431_v8, 16  ;;  %v2619_v62 = vld [vmem:[%s2760_s19 + $0x8] sm:$0xf0] }
  0x2a   : > { %v436_v26 = vshll.u32 %v432_v16, 16  ;;  %v2881_v27 = vsel %vm1189_vm4, %v1329_v63, %v1331_v11  ;;  %v2884_v29 = vadd.s32 48, %v2853_v51  ;;  %v435_v41 = vshrl.u32 %v431_v8, 16 }
  0x2b   : > { %vm438_vm7 = vc.u32 %v430_v15, %v434_v25  ;;  %v2897_v43 = vadd.s32 8, %v2853_v51  ;;  %v437_v50 = vshrl.u32 %v432_v16, 16  ;;  %v2503_v55 = vor.u32 %v2614_v40, %v2502_v39 }
  0x2c   : > { %v602_v38 = vshrl.u32 %v2884_v29, 16  ;;  %vm1904_vm14 = vsmask.f32 5376 }
  0x2e   : > { %v2902_v47 = vmul.u32 52429, %v602_v38  ;;  %v607_v6 = vmul.u32 52428, %v602_v38 }
  0x30   : > { %v610_v63 = vshll.u32 %v2902_v47, 16 }
  0x33   : > { %2366 = vmatmul.msk.bf16.gmra.mxu1 %vm896_vm2, %v2586_v44  ;;  %2416 = vmatmul.msk.bf16.vlgmr.msrb.gmra.mxu3 %vm896_vm2, %v1192_v46  ;;  %v2598_v44 = vld [vmem:[%s2760_s19 + $0x20] sm:$0xff]  ;;  %v1491_v46 = vrot.slane %v1489_v37, 2  ;;  %v601_v37 = vand.u32 65535, %v2884_v29 }
  0x34   : > { %2341 = vmatmul.msk.bf16.gmra.mxu0 %vm349_vm3, %v2581_v45  ;;  %2390 = vmatmul.msk.bf16.vlgmr.msrb.gmra.mxu2 %vm896_vm2, %v1033_v49  ;;  %v1488_v45 = vrot.slane %v1486_v36, 1  ;;  %v1058_v49 = vshrl.u32 %v2593_v35, 16  ;;  %v1197_v59 = vrot.slane %v2598_v44, 1  ;;  %v2681_v35 = vmov 0  }
  0x35   : > { %v439_v36 = vsel %vm438_vm7, 1, %v2681_v35 }
  0x36   : > { %v1492_v60 = vor.u32 %v1491_v46, %v1488_v45  ;;  %v1060_v3 = vor.u32 %v1058_v49, %v1056_v58  ;;  %v2873_v22 = vsel %vm1189_vm4, %v1197_v59, %v1199_v7  ;;  %v604_v45 = vmul.u32 52429, %v601_v37 }
  0x37   : > { %v2900_v46 = vmul.u32 52428, %v601_v37 }
  0x38   : > { %v2867_v19 = vsel %vm1021_vm5, %v1060_v3, %v1064_v4  ;;  %v1502_v48 = vsel %vm1458_vm6, %v1492_v60, %v2869_v20  ;;  %v457_v4 = vshrl.u32 %v2897_v43, 16 }
  0x39   : > { %v608_v56 = vshll.u32 %v2900_v46, 16  ;;  %v609_v38 = vshrl.u32 %v2900_v46, 16 }
  0x3b   : > { %vm612_vm9 = vc.u32 %v604_v45, %v608_v56  ;;  %v614_v3 = vadd.s32 %v608_v56, %v604_v45  ;;  %v2972_v45 = vadd.s32 16, %v2853_v51 }
  0x3c   : > { %v613_v7 = vsel %vm612_vm9, 1, %v2681_v35  ;;  %vm2081_vm9 = vcmask 1044480  }
  0x3d   : > { %vm2923_vm11 = vc.u32 %v614_v3, %v610_v63 }
  0x43   : > { %2417 = vmatmul.msk.bf16.gmra.mxu3 %vm896_vm2, %v1194_v9  ;;  %2468 = vmatmul.msk.bf16.vlgmr.msrb.gmra.mxu1 %vm896_vm2, %v1475_v10  ;;  %v1198_v9 = vsel %vm1189_vm4, %v1195_v23, %v1197_v59  ;;  %v1493_v10 = vsel %vm1458_vm6, %v1483_v24, %v1492_v60  ;;  %v2609_v23 = vld [vmem:[%s2760_s19 + $0x4] sm:$0xf0]  ;;  %v433_v24 = vmul.u32 52428, %v428_v2  ;;  %v2620_v60 = vld [vmem:[%s2760_s19 + $0x10] sm:$0xff] }
  0x44   : > { %2391 = vmatmul.msk.bf16.gmra.mxu2 %vm896_vm2, %v1041_v12  ;;  %2442 = vmatmul.msk.bf16.vlgmr.msrb.gmra.mxu0 %vm896_vm2, %v1326_v13  ;;  %v1317_v12 = vunpack.c.l.b16 %v1293_v0  ;;  %v1504_v13 = vshrl.u32 %v1457_v1, 16  ;;  %v2477_v34 = vor.u32 %v2609_v23, %v2476_v21  ;;  %v2528_v59 = vld [vmem:[%s2760_s19 + $0x8] sm:$0xc]  ;;  %v456_v0 = vand.u32 65535, %v2897_v43  ;;  %v2913_v1 = vld [vmem:[%s2760_s19 + $0x10] sm:$0xff] }
  0x45   : > { %v441_v42 = vadd.s32 %v439_v36, %v433_v24  ;;  %v2529_v2 = vor.u32 %v2619_v62, %v2528_v59  ;;  %v2930_v21 = vmul.u32 52429, %v457_v4  ;;  %v2933_v23 = vadd.s32 56, %v2853_v51  ;;  %v2945_v24 = vld [vmem:[%s2760_s19 + $0x14] sm:$0xff] }
  0x46   : > { %v1323_v28 = vpack.c.b16 %v1317_v12, %v1317_v12  ;;  %v1636_v53 = vrot.slane %v2477_v34, 2  ;;  %v1917_v12 = vshll.u32 %v2620_v60, 16  ;;  %v2927_v16 = vmul.u32 52428, %v456_v0 }
  0x47   : > { %v1906_v8 = vshrl.u32 %v2529_v2, 16  ;;  %v459_v39 = vmul.u32 52429, %v456_v0 }
  0x48   : > { %v1333_v49 = vrot.slane %v1323_v28, 1  ;;  %v2624_v28 = vld [vmem:[%s2760_s19 + $0x8] sm:$0xf0]  ;;  %v1919_v36 = vrot.slane %v1917_v12, 3  ;;  %v463_v40 = vshll.u32 %v2927_v16, 16  ;;  %v464_v56 = vshrl.u32 %v2927_v16, 16 }
  0x4a   : > { %vm467_vm12 = vc.u32 %v459_v39, %v463_v40 }
  0x53   : > { %2418 = vmatmul.msk.bf16.gmra.mxu3 %vm896_vm2, %v1196_v30  ;;  %2469 = vmatmul.msk.bf16.gmra.mxu1 %vm896_vm2, %v1484_v31  ;;  %v1506_v30 = vrot.slane %v1504_v13, 1  ;;  %v1509_v31 = vrot.slane %v1507_v14, 2  ;;  %v2921_v13 = vsel %vm1189_vm4, %v1331_v11, %v1333_v49  ;;  %v462_v49 = vmul.u32 52428, %v457_v4 }
  0x54   : > { %2392 = vmatmul.msk.bf16.gmra.mxu2 %vm896_vm2, %v1049_v32  ;;  %2443 = vmatmul.msk.bf16.gmra.mxu0 %vm896_vm2, %v1328_v33  ;;  %v440_v32 = vadd.s32 %v434_v25, %v430_v15  ;;  %v2889_v33 = vld [vmem:[%s2760_s19 + $0xc] sm:$0xff]  ;;  %v2947_v25 = vrot.slane %v1906_v8, 2  ;;  %v485_v4 = vand.u32 65535, %v2972_v45 }
  0x55   : > { %v1637_v54 = vrot.slane %v2889_v33, 2  ;;  %v1510_v57 = vor.u32 %v1509_v31, %v1506_v30  ;;  %v615_v30 = vadd.s32 %v613_v7, %v607_v6  ;;  %v2952_v31 = vld [vmem:[%s2760_s19 + $0x18] sm:$0xff]  ;;  %v2996_v15 = vld [vmem:[%s2760_s19 + $0x10] sm:$0xff] }
  0x56   : > { %vm442_vm8 = vc.u32 %v440_v32, %v436_v26  ;;  %v2554_v26 = vld [vmem:[%s2760_s19 + $0x8] sm:$0x8] }
  0x57   : > { %v443_v44 = vsel %vm442_vm8, 1, %v2681_v35  ;;  %v2937_v61 = vsel %vm1458_vm6, %v2869_v20, %v1510_v57  ;;  %v2942_v11 = vsel %vm1635_vm10, %v1636_v53, %v1637_v54  ;;  %v617_v20 = vsel %vm2923_vm11, 1, %v2681_v35 }
  0x58   : > { %v445_v52 = vadd.s32 %v443_v44, %v441_v42  ;;  %v611_v42 = vshrl.u32 %v2902_v47, 16  ;;  %v630_v44 = vand.u32 65535, %v2933_v23  ;;  %v2555_v46 = vor.u32 %v2624_v28, %v2554_v26 }
  0x59   : > { %v465_v53 = vshll.u32 %v2930_v21, 16  ;;  %v468_v57 = vsel %vm467_vm12, 1, %v2681_v35  ;;  %v488_v28 = vmul.u32 52429, %v485_v4 }
  0x5a   : > { %v446_v58 = vadd.s32 %v445_v52, %v435_v41  ;;  %v633_v59 = vmul.u32 52429, %v630_v44  ;;  %v470_v63 = vadd.s32 %v468_v57, %v462_v49  ;;  %v634_v0 = vmul.u32 52428, %v630_v44 }
  0x5b   : > { %v2083_v44 = vrot.slane %v2996_v15, 3  ;;  %v3325_v15 = vld [vmem:[%s2760_s19 + $0x20] sm:$0xff] }
  0x5c   : > { %v447_v5 = vadd.s32 %v446_v58, %v437_v50  ;;  %v1773_v50 = vrot.slane %v2952_v31, 2  ;;  %v631_v58 = vshrl.u32 %v2933_v23, 16  ;;  %v637_v8 = vshll.u32 %v634_v0, 16 }
  0x5e   : > { %v448_v14 = vshrl.u32 %v447_v5, 3  ;;  %v635_v3 = vmul.u32 52429, %v631_v58  ;;  %v636_v7 = vmul.u32 52428, %v631_v58  ;;  %vm641_vm15 = vc.u32 %v633_v59, %v637_v8 }
  0x5f   : > { %v642_v26 = vsel %vm641_vm15, 1, %v2681_v35 }
  0x60   : > { %v449_v37 = vmul.u32 10, %v448_v14  ;;  %v639_v12 = vshll.u32 %v635_v3, 16  ;;  %v486_v14 = vshrl.u32 %v2972_v45, 16 }
  0x63   : > { %2419 = vmatmul.msk.bf16.gmra.mxu3 %vm896_vm2, %v1198_v9  ;;  %2470 = vmatmul.msk.bf16.gmra.mxu1 %vm896_vm2, %v1493_v10  ;;  %v1909_v9 = vshll.u32 %v2529_v2, 16  ;;  %v1914_v10 = vshrl.u32 %v2620_v60, 16  ;;  %v466_v60 = vshrl.u32 %v2930_v21, 16  ;;  %v643_v21 = vadd.s32 %v637_v8, %v633_v59 }
  0x64   : > { %2393 = vmatmul.msk.bf16.gmra.mxu2 %vm896_vm2, %v1057_v17  ;;  %2444 = vmatmul.msk.bf16.gmra.mxu0 %vm896_vm2, %v1330_v18  ;;  %v1770_v17 = vrot.slane %v2503_v55, 2  ;;  %v1771_v18 = vrot.slane %v2913_v1, 2  ;;  %v2986_v55 = vsub.s32 %v2853_v51, %v449_v37  ;;  %v644_v37 = vadd.s32 %v642_v26, %v636_v7 }
  0x65   : > { %v2954_v32 = vrot.slane %v1909_v9, 3  ;;  %v1916_v34 = vrot.slane %v1914_v10, 2  ;;  %v2082_v9 = vrot.slane %v2555_v46, 3  ;;  %v638_v10 = vshrl.u32 %v634_v0, 16 }
  0x66   : > { %v2967_v41 = vsel %vm1635_vm10, %v1770_v17, %v1771_v18  ;;  %vm645_vm0 = vc.u32 %v643_v21, %v639_v12  ;;  %vm714_vm1 = vcmp.ne.s32.totalorder %v2986_v55, 0  ;;  %vm724_vm3 = vcmp.lt.s32.totalorder %v2986_v55, 0 }
  0x67   : > { %v1912_v47 = vor.u32 %v2954_v32, %v2947_v25  ;;  %v2982_v52 = vor.u32 %v1919_v36, %v1916_v34  ;;  %v490_v34 = vmul.u32 52429, %v486_v14  ;;  %vm3024_vm8 = vmand %vm724_vm3, %vm714_vm1  ;;  %v2084_v33 = vsel %vm2081_vm9, %v2082_v9, %v2083_v44 }
  0x68   : > { %v3076_v25 = vadd.s32 64, %v2853_v51  ;;  %v3079_v32 = vadd.s32 24, %v2853_v51 }
  0x6a   : > { %v514_v26 = vand.u32 65535, %v3079_v32 }
  0x73   : > { %2420 = vmatmul.msk.bf16.gmra.mxu3 %vm896_vm2, %v2873_v22  ;;  %2471 = vmatmul.msk.bf16.gmra.mxu1 %vm896_vm2, %v1502_v48  ;;  %v1639_v22 = vrot.slane %v2945_v24, 2  ;;  %v619_v48 = vadd.s32 %v617_v20, %v615_v30  ;;  %v489_v30 = vmul.u32 52428, %v485_v4  ;;  %v1774_v4 = vsel %vm1635_vm10, %v1771_v18, %v1773_v50 }
  0x74   : > { %2394 = vmatmul.msk.bf16.gmra.mxu2 %vm896_vm2, %v2867_v19  ;;  %2445 = vmatmul.msk.bf16.gmra.mxu0 %vm896_vm2, %v2881_v27  ;;  %v469_v27 = vadd.s32 %v463_v40, %v459_v39  ;;  %v491_v39 = vmul.u32 52428, %v486_v14  ;;  %v659_v14 = vand.u32 65535, %v3076_v25 }
  0x75   : > { %v620_v19 = vadd.s32 %v619_v48, %v609_v38  ;;  %v646_v38 = vsel %vm645_vm0, 1, %v2681_v35  ;;  %v492_v40 = vshll.u32 %v489_v30, 16  ;;  %v640_v48 = vshrl.u32 %v635_v3, 16 }
  0x76   : > { %vm471_vm13 = vc.u32 %v469_v27, %v465_v53  ;;  %v648_v49 = vadd.s32 %v646_v38, %v644_v37  ;;  %v3007_v53 = vld [vmem:[%s2760_s19 + $0x1c] sm:$0xff]  ;;  %v3048_v3 = vsel %vm1635_vm10, %v1637_v54, %v1639_v22  ;;  %v662_v24 = vmul.u32 52429, %v659_v14 }
  0x77   : > { %v621_v62 = vadd.s32 %v620_v19, %v611_v42  ;;  %v472_v2 = vsel %vm471_vm13, 1, %v2681_v35  ;;  %v494_v42 = vshll.u32 %v490_v34, 16  ;;  %vm496_vm4 = vc.u32 %v488_v28, %v492_v40 }
  0x78   : > { %v474_v6 = vadd.s32 %v472_v2, %v470_v63  ;;  %v493_v19 = vshrl.u32 %v489_v30, 16  ;;  %v497_v27 = vsel %vm496_vm4, 1, %v2681_v35  ;;  %v649_v57 = vadd.s32 %v648_v49, %v638_v10  ;;  %v3041_v2 = vld [vmem:[%s2760_s19 + $0x20] sm:$0xff] }
  0x79   : > { %v622_v5 = vshrl.u32 %v621_v62, 3  ;;  %v499_v58 = vadd.s32 %v497_v27, %v491_v39  ;;  %v495_v63 = vshrl.u32 %v490_v34, 16 }
  0x7a   : > { %v475_v17 = vadd.s32 %v474_v6, %v464_v56  ;;  %v2621_v6 = vld [vmem:[%s2760_s19 + $0x18] sm:$0xff] }
  0x7b   : > { %v623_v16 = vmul.u32 10, %v622_v5  ;;  %v3060_v5 = vsel %vm1904_vm14, %v1912_v47, %v2982_v52  ;;  %v1923_v10 = vshrl.u32 %v2621_v6, 16  ;;  %v1926_v12 = vshll.u32 %v2621_v6, 16 }
  0x7c   : > { %v476_v20 = vadd.s32 %v475_v17, %v466_v60  ;;  %v1641_v60 = vrot.slane %v3007_v53, 2 }
  0x7d   : > { %v3000_v36 = vsub.s32 %v2884_v29, %v623_v16  ;;  %v498_v29 = vadd.s32 %v492_v40, %v488_v28  ;;  %v660_v16 = vshrl.u32 %v3076_v25, 16  ;;  %v1925_v37 = vrot.slane %v1923_v10, 2 }
  0x7e   : > { %v477_v46 = vshrl.u32 %v476_v20, 3  ;;  %v3111_v20 = vld [vmem:[%s3576_s5] ss:$0 sm:$0xff]  ;;  %v3187_v10 = vadd.s32 72, %v2853_v51 }
  0x7f   : > { %vm720_vm5 = vcmp.ne.s32.totalorder %v3000_v36, 0  ;;  %vm730_vm6 = vcmp.lt.s32.totalorder %v3000_v36, 0  ;;  %vm500_vm7 = vc.u32 %v498_v29, %v494_v42  ;;  %v750_v59 = vadd.s32 10, %v3000_v36 }
  0x80   : > { %v478_v56 = vmul.u32 10, %v477_v46  ;;  %v501_v62 = vsel %vm500_vm7, 1, %v2681_v35  ;;  %vm3035_vm11 = vmand %vm730_vm6, %vm720_vm5  ;;  %v3097_v28 = vmul.u32 52429, %v660_v16  ;;  %v665_v38 = vmul.u32 52428, %v660_v16 }
  0x81   : > { %v503_v0 = vadd.s32 %v501_v62, %v499_v58  ;;  %v760_v18 = vsel %vm3035_vm11, %v750_v59, %v3000_v36  ;;  %v3118_v42 = vmul.u32 52428, %v514_v26 }
  0x82   : > { %v3067_v54 = vsub.s32 %v2897_v43, %v478_v56  ;;  %v3086_v43 = vsel %vm1635_vm10, %v1639_v22, %v1641_v60  ;;  %v663_v22 = vmul.u32 52428, %v659_v14  ;;  %v668_v40 = vshll.u32 %v3097_v28, 16  ;;  %v3141_v56 = vld [vmem:[%s2760_s19 + $0x18] sm:$0xff] }
  0x83   : > { %2472 = vmatmul.msk.bf16.gmra.mxu1 %vm896_vm2, %v2937_v61  ;;  %2520 = vmatmul.msk.bf16.vlgmr.msra.gmra.mxu3 %vm896_vm2, %v2967_v41  ;;  %v744_v41 = vadd.s32 10, %v2986_v55  ;;  %v504_v8 = vadd.s32 %v503_v0, %v493_v19  ;;  %vm3128_vm4 = vcmp.lt.s32.totalorder %v760_v18, 8  ;;  %v517_v61 = vmul.u32 52429, %v514_v26 }
  0x84   : > { %2446 = vmatmul.msk.bf16.gmra.mxu0 %vm896_vm2, %v2921_v13  ;;  %2494 = vmatmul.msk.bf16.vlgmr.msra.gmra.mxu2 %vm896_vm2, %v2942_v11  ;;  %v650_v11 = vadd.s32 %v649_v57, %v640_v48  ;;  %vm715_vm12 = vcmp.ne.s32.totalorder %v3067_v54, 0  ;;  %vm725_vm13 = vcmp.lt.s32.totalorder %v3067_v54, 0  ;;  %v745_v30 = vadd.s32 10, %v3067_v54 }
  0x85   : > { %v754_v1 = vsel %vm3024_vm8, %v744_v41, %v2986_v55  ;;  %v505_v9 = vadd.s32 %v504_v8, %v495_v63  ;;  %v1775_v55 = vrot.slane %v3041_v2, 2  ;;  %v666_v39 = vshll.u32 %v663_v22, 16  ;;  %vm3136_vm5 = vmand %vm725_vm13, %vm715_vm12 }
  0x86   : > { %v651_v7 = vshrl.u32 %v650_v11, 3  ;;  %vm3120_vm0 = vcmp.lt.s32.totalorder %v754_v1, 8  ;;  %v667_v57 = vshrl.u32 %v663_v22, 16  ;;  %v521_v63 = vshll.u32 %v3118_v42, 16 }
  0x87   : > { %v506_v21 = vshrl.u32 %v505_v9, 3  ;;  %v3105_v36 = vsel %vm1635_vm10, %v1773_v50, %v1775_v55  ;;  %v1928_v50 = vrot.slane %v1926_v12, 3  ;;  %vm670_vm3 = vc.u32 %v662_v24, %v666_v39 }
  0x88   : > { %v652_v47 = vmul.u32 10, %v651_v7  ;;  %v672_v29 = vadd.s32 %v666_v39, %v662_v24  ;;  %v671_v58 = vsel %vm670_vm3, 1, %v2681_v35  ;;  %v2085_v8 = vrot.slane %v3141_v56, 3 }
  0x89   : > { %v507_v34 = vmul.u32 10, %v506_v21  ;;  %v673_v62 = vadd.s32 %v671_v58, %v665_v38  ;;  %vm525_vm12 = vc.u32 %v517_v61, %v521_v63  ;;  %v527_v9 = vadd.s32 %v521_v63, %v517_v61 }
  0x8a   : > { %v3093_v17 = vsub.s32 %v2933_v23, %v652_v47  ;;  %v515_v23 = vshrl.u32 %v3079_v32, 16  ;;  %vm674_vm7 = vc.u32 %v672_v29, %v668_v40  ;;  %v526_v47 = vsel %vm525_vm12, 1, %v2681_v35 }
  0x8b   : > { %v3116_v31 = vsub.s32 %v2972_v45, %v507_v34  ;;  %v675_v13 = vsel %vm674_vm7, 1, %v2681_v35  ;;  %v3197_v21 = vor.u32 %v1928_v50, %v1925_v37  ;;  %v522_v38 = vshrl.u32 %v3118_v42, 16 }
  0x8c   : > { %vm721_vm15 = vcmp.ne.s32.totalorder %v3093_v17, 0  ;;  %vm731_vm1 = vcmp.lt.s32.totalorder %v3093_v17, 0  ;;  %v3126_v49 = vadd.s32 10, %v3093_v17  ;;  %v3144_v41 = vmul.u32 52429, %v515_v23 }
  0x8d   : > { %vm716_vm6 = vcmp.ne.s32.totalorder %v3116_v31, 0  ;;  %vm726_vm8 = vcmp.lt.s32.totalorder %v3116_v31, 0  ;;  %v520_v11 = vmul.u32 52428, %v515_v23  ;;  %vm3169_vm11 = vmand %vm731_vm1, %vm721_vm15  ;;  %v677_v7 = vadd.s32 %v675_v13, %v673_v62 }
  0x8e   : > { %vm3181_vm13 = vmand %vm726_vm8, %vm716_vm6  ;;  %v761_v16 = vsel %vm3169_vm11, %v3126_v49, %v3093_v17  ;;  %v689_v17 = vshrl.u32 %v3187_v10, 16  ;;  %v1930_v61 = vsel %vm1904_vm14, %v2982_v52, %v3197_v21  ;;  %v2086_v46 = vsel %vm2081_vm9, %v2083_v44, %v2085_v8 }
  0x8f   : > { %v678_v18 = vadd.s32 %v677_v7, %v667_v57  ;;  %v528_v26 = vadd.s32 %v526_v47, %v520_v11  ;;  %v3248_v7 = vld [vmem:[%s2760_s19 + $0x20] sm:$0xff] }
  0x90   : > { %v925_v48 = vpop.f32.mrf.mxu1  ;;  %v3223_v58 = vmul.u32 52429, %v689_v17  ;;  %v1932_v14 = vshrl.u32 %v3248_v7, 16 }
  0x91   : > { %v378_v19 = vpop.f32.mrf.mxu0 }
  0x92   : > { %v3147_v59 = vadd.f32 %v3111_v20, %v378_v19 }
  0x93   : > { %2521 = vmatmul.msk.bf16.gmra.mxu3 %vm896_vm2, %v1774_v4  ;;  %2572 = vmatmul.msk.bf16.vlgmr.msra.gmra.mxu1 %vm896_vm2, %v2084_v33  ;;  %v755_v4 = vsel %vm3136_vm5, %v745_v30, %v3067_v54  ;;  %v669_v33 = vshrl.u32 %v3097_v28, 16  ;;  %v688_v30 = vand.u32 65535, %v3187_v10 }
  0x94   : > { %v3156_v0 = vadd.f32 %v925_v48, %v3147_v59  ;;  %2495 = vmatmul.msk.bf16.gmra.mxu2 %vm896_vm2, %v3048_v3  ;;  %2546 = vmatmul.msk.bf16.vlgmr.msra.gmra.mxu0 %vm896_vm2, %v3060_v5  ;;  %v746_v3 = vadd.s32 10, %v3116_v31  ;;  %v523_v5 = vshll.u32 %v3144_v41, 16  ;;  %vm3189_vm15 = vcmp.lt.s32.totalorder %v755_v4, 8 }
  0x95   : > { %v679_v28 = vadd.s32 %v678_v18, %v669_v33  ;;  %v3211_v48 = vadd.s32 32, %v2853_v51  ;;  %v804_v49 = vsel %vm3120_vm0, %v3147_v59, 0.0  ;;  %v3217_v42 = vmul.u32 52428, %v688_v30 }
  0x96   : > { %v940_v1 = vpop.f32.mrf.mxu3  ;;  %vm529_vm1 = vc.u32 %v527_v9, %v523_v5  ;;  %v756_v23 = vsel %vm3181_vm13, %v746_v3, %v3116_v31  ;;  %v524_v31 = vshrl.u32 %v3144_v41, 16  ;;  %v691_v59 = vmul.u32 52429, %v688_v30 }
  0x97   : > { %v393_v12 = vpop.f32.mrf.mxu2  ;;  %v530_v39 = vsel %vm529_vm1, 1, %v2681_v35  ;;  %v680_v50 = vshrl.u32 %v679_v28, 3  ;;  %vm3233_vm0 = vcmp.lt.s32.totalorder %v761_v16, 8  ;;  %v695_v11 = vshll.u32 %v3217_v42, 16 }
  0x98   : > { %v394_v24 = vadd.f32 %v3111_v20, %v393_v12  ;;  %v927_v22 = vpop.f32.mrf.mxu1  ;;  %v532_v29 = vadd.s32 %v530_v39, %v528_v26  ;;  %v543_v52 = vand.u32 65535, %v3211_v48  ;;  %v814_v63 = vand.u32 2147483647, %v804_v49 }
  0x99   : > { %v380_v34 = vpop.f32.mrf.mxu0  ;;  %v681_v57 = vmul.u32 10, %v680_v50  ;;  %vm3242_vm3 = vcmp.lt.s32.totalorder %v756_v23, 8  ;;  %v544_v33 = vshrl.u32 %v3211_v48, 16  ;;  %v694_v5 = vmul.u32 52428, %v689_v17 }
  0x9a   : > { %v3207_v37 = vadd.f32 %v940_v1, %v394_v24  ;;  %v381_v40 = vadd.f32 %v3111_v20, %v380_v34  ;;  %v810_v19 = vsel %vm3128_vm4, %v394_v24, 0.0  ;;  %v533_v41 = vadd.s32 %v532_v29, %v522_v38 }
  0x9b   : > { %v3238_v13 = vsub.s32 %v3076_v25, %v681_v57  ;;  %v820_v4 = vand.u32 2147483647, %v810_v19  ;;  %v697_v1 = vshll.u32 %v3223_v58, 16  ;;  %vm699_vm6 = vc.u32 %v691_v59, %v695_v11 }
  0x9c   : > { %v3221_v45 = vadd.f32 %v927_v22, %v381_v40  ;;  %v534_v44 = vadd.s32 %v533_v41, %v524_v31  ;;  %v701_v47 = vadd.s32 %v695_v11, %v691_v59  ;;  %v805_v9 = vsel %vm3189_vm15, %v381_v40, 0.0 }
  0x9d   : > { %vm722_vm4 = vcmp.ne.s32.totalorder %v3238_v13, 0  ;;  %vm732_vm5 = vcmp.lt.s32.totalorder %v3238_v13, 0  ;;  %v3261_v26 = vmul.u32 52428, %v543_v52  ;;  %v752_v24 = vadd.s32 10, %v3238_v13 }
  0x9e   : > { %v942_v62 = vpop.f32.mrf.mxu3  ;;  %v535_v18 = vshrl.u32 %v534_v44, 3  ;;  %v700_v28 = vsel %vm699_vm6, 1, %v2681_v35  ;;  %vm3279_vm7 = vmand %vm732_vm5, %vm722_vm4  ;;  %v696_v34 = vshrl.u32 %v3217_v42, 16  ;;  %vm703_vm8 = vc.u32 %v701_v47, %v697_v1 }
  0x9f   : > { %v395_v6 = vpop.f32.mrf.mxu2  ;;  %v702_v23 = vadd.s32 %v700_v28, %v694_v5  ;;  %v826_v38 = vmax.f32 %v814_v63, %v820_v4  ;;  %v815_v39 = vand.u32 2147483647, %v805_v9  ;;  %v704_v17 = vsel %vm703_vm8, 1, %v2681_v35  ;;  %v3304_v4 = vld [vmem:[%s2760_s19 + $0x24] sm:$0xff] }
  0xa0   : > { %v396_v3 = vadd.f32 %v3111_v20, %v395_v6  ;;  %v930_v25 = vpop.f32.mrf.mxu1  ;;  %v536_v22 = vmul.u32 10, %v535_v18  ;;  %v546_v40 = vmul.u32 52429, %v543_v52  ;;  %v548_v31 = vmul.u32 52429, %v544_v33 }
  0xa1   : > { %v383_v54 = vpop.f32.mrf.mxu0  ;;  %v706_v49 = vadd.s32 %v704_v17, %v702_v23  ;;  %v550_v29 = vshll.u32 %v3261_v26, 16  ;;  %v762_v42 = vsel %vm3279_vm7, %v752_v24, %v3238_v13  ;;  %v3299_v52 = vmax.f32 %v815_v39, %v826_v38  ;;  %v1604_v23 = vld [vmem:[%s2760_s19 + $0x2c] sm:$0x3] }
  0xa2   : > { %v3256_v12 = vadd.f32 %v942_v62, %v396_v3  ;;  %v3259_v16 = vadd.f32 %v3111_v20, %v383_v54  ;;  %v3292_v57 = vsub.s32 %v3079_v32, %v536_v22  ;;  %v549_v62 = vmul.u32 52428, %v544_v33 }
  0xa3   : > { %2522 = vmatmul.msk.bf16.gmra.mxu3 %vm896_vm2, %v3105_v36  ;;  %2573 = vmatmul.msk.bf16.gmra.mxu1 %vm896_vm2, %v2086_v46  ;;  %v1935_v46 = vshll.u32 %v3248_v7, 16  ;;  %v707_v27 = vadd.s32 %v706_v49, %v696_v34  ;;  %v552_v11 = vshll.u32 %v548_v31, 16  ;;  %vm554_vm11 = vc.u32 %v546_v40, %v550_v29  ;;  %v3320_v7 = vld [vmem:[%s2760_s19 + $0x28] sm:$0xff] }
  0xa4   : > { %v3270_v30 = vadd.f32 %v930_v25, %v3259_v16  ;;  %2496 = vmatmul.msk.bf16.gmra.mxu2 %vm896_vm2, %v3086_v43  ;;  %2547 = vmatmul.msk.bf16.gmra.mxu0 %vm896_vm2, %v1930_v61  ;;  %v811_v43 = vsel %vm3233_vm0, %v396_v3, 0.0  ;;  %v698_v61 = vshrl.u32 %v3223_v58, 16  ;;  %v556_v32 = vadd.s32 %v550_v29, %v546_v40 }
  0xa5   : > { %v3301_v63 = vand.u32 2147483647, %v811_v43  ;;  %v806_v58 = vsel %vm3242_vm3, %v3259_v16, 0.0  ;;  %vm3309_vm12 = vcmp.lt.s32.totalorder %v762_v42, 8  ;;  %vm717_vm13 = vcmp.ne.s32.totalorder %v3292_v57, 0 }
  0xa6   : > { %v945_v50 = vpop.f32.mrf.mxu3  ;;  %v708_v3 = vadd.s32 %v707_v27, %v698_v61  ;;  %v555_v25 = vsel %vm554_vm11, 1, %v2681_v35  ;;  %vm558_vm15 = vc.u32 %v556_v32, %v552_v11  ;;  %v551_v1 = vshrl.u32 %v3261_v26, 16 }
  0xa7   : > { %v398_v19 = vpop.f32.mrf.mxu2  ;;  %v557_v54 = vadd.s32 %v555_v25, %v549_v62  ;;  %v559_v18 = vsel %vm558_vm15, 1, %v2681_v35  ;;  %vm727_vm1 = vcmp.lt.s32.totalorder %v3292_v57, 0  ;;  %v553_v9 = vshrl.u32 %v548_v31, 16  ;;  %v1739_v62 = vld [vmem:[%s2760_s19 + $0x30] sm:$0x3] }
  0xa8   : > { %v3297_v41 = vadd.f32 %v3111_v20, %v398_v19  ;;  %v932_v59 = vpop.f32.mrf.mxu1  ;;  %v709_v47 = vshrl.u32 %v708_v3, 3  ;;  %v1643_v16 = vrot.slane %v3304_v4, 2  ;;  %v1777_v28 = vrot.slane %v3320_v7, 2  ;;  %vm3368_vm0 = vmand %vm727_vm1, %vm717_vm13  ;;  %v2050_v7 = vld [vmem:[%s2760_s19 + $0x30] sm:$0x7] }
  0xa9   : > { %v385_v13 = vpop.f32.mrf.mxu0  ;;  %v561_v22 = vadd.s32 %v559_v18, %v557_v54  ;;  %v1934_v36 = vrot.slane %v1932_v14, 2  ;;  %v1937_v34 = vrot.slane %v1935_v46, 3  ;;  %v747_v38 = vadd.s32 10, %v3292_v57 }
  0xaa   : > { %v3314_v44 = vadd.f32 %v945_v50, %v3297_v41  ;;  %v3317_v33 = vadd.f32 %v3111_v20, %v385_v13  ;;  %v710_v26 = vmul.u32 10, %v709_v47  ;;  %v1644_v17 = vsel %vm1635_vm10, %v1641_v60, %v1643_v16 }
  0xab   : > { %v2087_v40 = vrot.slane %v3325_v15, 3  ;;  %v562_v50 = vadd.s32 %v561_v22, %v551_v1  ;;  %v1778_v14 = vsel %vm1635_vm10, %v1775_v55, %v1777_v28  ;;  %v3351_v31 = vor.u32 %v1937_v34, %v1934_v36 }
  0xac   : > { %v3328_v5 = vadd.f32 %v932_v59, %v3317_v33  ;;  %v3354_v29 = vsub.s32 %v3187_v10, %v710_v26  ;;  %v3362_v19 = vadd.s32 40, %v2853_v51  ;;  %v1628_v42 = vunpack.c.l.b16 %v1604_v23  ;;  %v2623_v26 = vld [vmem:[%s2760_s19 + $0x28] sm:$0xff] }
  0xad   : > { %v2088_v60 = vsel %vm2081_vm9, %v2085_v8, %v2087_v40  ;;  %v563_v8 = vadd.s32 %v562_v50, %v553_v9  ;;  %v1939_v51 = vsel %vm1904_vm14, %v3197_v21, %v3351_v31  ;;  %v831_v10 = vmax.f32 %v3301_v63, %v3299_v52  ;;  %v3428_v50 = vld [vmem:[%s2760_s19 + $0x28] sm:$0xff] }
  0xae   : > { %v947_v24 = vpop.f32.mrf.mxu3  ;;  %v816_v61 = vand.u32 2147483647, %v806_v58  ;;  %vm723_vm3 = vcmp.ne.s32.totalorder %v3354_v29, 0  ;;  %v572_v46 = vand.u32 65535, %v3362_v19  ;;  %vm733_vm4 = vcmp.lt.s32.totalorder %v3354_v29, 0 }
  0xaf   : > { %v400_v39 = vpop.f32.mrf.mxu2  ;;  %v564_v59 = vshrl.u32 %v563_v8, 3  ;;  %v573_v21 = vshrl.u32 %v3362_v19, 16  ;;  %v812_v11 = vsel %vm3309_vm12, %v3297_v41, 0.0  ;;  %v757_v52 = vsel %vm3368_vm0, %v747_v38, %v3292_v57  ;;  %vm3408_vm5 = vmand %vm733_vm4, %vm723_vm3 }
  0xb0   : > { %v3344_v43 = vadd.f32 %v3111_v20, %v400_v39  ;;  %v935_v49 = vpop.f32.mrf.mxu1  ;;  %v575_v63 = vmul.u32 52429, %v572_v46  ;;  %v576_v13 = vmul.u32 52428, %v572_v46  ;;  %v753_v32 = vadd.s32 10, %v3354_v29 }
  0xb1   : > { %v388_v53 = vpop.f32.mrf.mxu0  ;;  %v565_v58 = vmul.u32 10, %v564_v59  ;;  %v577_v25 = vmul.u32 52429, %v573_v21  ;;  %v1634_v1 = vpack.c.b16 %v1628_v42, %v1628_v42  ;;  %v3402_v54 = vmax.f32 %v816_v61, %v831_v10 }
  0xb2   : > { %v3373_v55 = vadd.f32 %v947_v24, %v3344_v43  ;;  %v3376_v56 = vadd.f32 %v3111_v20, %v388_v53  ;;  %v579_v6 = vshll.u32 %v576_v13, 16  ;;  %v1763_v18 = vunpack.c.l.b16 %v1739_v62 }
  0xb3   : > { %2523 = vmatmul.msk.bf16.gmra.mxu3 %vm896_vm2, %v1778_v14  ;;  %2574 = vmatmul.msk.bf16.gmra.mxu1 %vm896_vm2, %v2088_v60  ;;  %v3413_v47 = vsub.s32 %v3211_v48, %v565_v58  ;;  %v578_v24 = vmul.u32 52428, %v573_v21  ;;  %v581_v22 = vshll.u32 %v577_v25, 16  ;;  %v3416_v34 = vand.u32 2147483647, %v812_v11 }
  0xb4   : > { %v3389_v27 = vadd.f32 %v935_v49, %v3376_v56  ;;  %2497 = vmatmul.msk.bf16.gmra.mxu2 %vm896_vm2, %v1644_v17  ;;  %2548 = vmatmul.msk.bf16.gmra.mxu0 %vm896_vm2, %v1939_v51  ;;  %vm3418_vm6 = vcmp.lt.s32.totalorder %v757_v52, 8  ;;  %vm583_vm7 = vc.u32 %v575_v63, %v579_v6  ;;  %v585_v39 = vadd.s32 %v579_v6, %v575_v63 }
  0xb5   : > { %v763_v48 = vsel %vm3408_vm5, %v753_v32, %v3354_v29  ;;  %vm718_vm8 = vcmp.ne.s32.totalorder %v3413_v47, 0  ;;  %v1645_v17 = vrot.slane %v1634_v1, 2  ;;  %v584_v53 = vsel %vm583_vm7, 1, %v2681_v35  ;;  %v1873_v29 = vld [vmem:[%s2760_s19 + $0x30] sm:$0x7] }
  0xb6   : > { %v1228_v3 = vpop.f32.mrf.mxu3  ;;  %vm587_vm11 = vc.u32 %v585_v39, %v581_v22  ;;  %vm728_vm12 = vcmp.lt.s32.totalorder %v3413_v47, 0  ;;  %v586_v60 = vadd.s32 %v584_v53, %v578_v24  ;;  %v1769_v2 = vpack.c.b16 %v1763_v18, %v1763_v18 }
  0xb7   : > { %v1093_v57 = vpop.f32.mrf.mxu2  ;;  %v588_v42 = vsel %vm587_vm11, 1, %v2681_v35  ;;  %v582_v8 = vshrl.u32 %v577_v25, 16  ;;  %v1941_v10 = vshrl.u32 %v2623_v26, 16  ;;  %v1944_v61 = vshll.u32 %v2623_v26, 16  ;;  %vm3449_vm13 = vmand %vm728_vm12, %vm718_vm8 }
  0xb8   : > { %v1118_v9 = vadd.f32 %v1093_v57, %v3156_v0  ;;  %v937_v36 = vpop.f32.mrf.mxu1  ;;  %v580_v0 = vshrl.u32 %v576_v13, 16  ;;  %v748_v46 = vadd.s32 10, %v3413_v47  ;;  %v1779_v21 = vrot.slane %v1769_v2, 2 }
  0xb9   : > { %v390_v38 = vpop.f32.mrf.mxu0  ;;  %v2089_v62 = vrot.slane %v3428_v50, 3  ;;  %v807_v11 = vsel %vm3418_vm6, %v3317_v33, 0.0  ;;  %v1943_v63 = vrot.slane %v1941_v10, 2  ;;  %v1946_v13 = vrot.slane %v1944_v61, 3 }
  0xba   : > { %v1253_v49 = vadd.f32 %v1228_v3, %v1118_v9  ;;  %v3431_v14 = vadd.f32 %v3111_v20, %v390_v38  ;;  %v590_v20 = vadd.s32 %v588_v42, %v586_v60  ;;  %v1897_v32 = vunpack.c.l.b16 %v1873_v29 }
  0xbb   : > { %v1780_v33 = vsel %vm1635_vm10, %v1777_v28, %v1779_v21  ;;  %v2090_v1 = vsel %vm2081_vm9, %v2087_v40, %v2089_v62  ;;  %vm3462_vm15 = vcmp.lt.s32.totalorder %v763_v48, 8  ;;  %v1947_v6 = vor.u32 %v1946_v13, %v1943_v63 }
  0xbc   : > { %v3438_v51 = vadd.f32 %v937_v36, %v3431_v14  ;;  %v591_v58 = vadd.s32 %v590_v20, %v580_v0  ;;  %v1903_v18 = vpack.c.b16 %v1897_v32, %v1897_v32  ;;  %v758_v28 = vsel %vm3449_vm13, %v748_v46, %v3413_v47 }
  0xbd   : > { %v828_v40 = vmax.f32 %v3402_v54, %v3416_v34  ;;  %v1948_v4 = vsel %vm1904_vm14, %v3351_v31, %v1947_v6  ;;  %v2074_v47 = vunpack.c.l.b16 %v2050_v7  ;;  %v817_v54 = vand.u32 2147483647, %v807_v11 }
  0xbe   : > { %v1230_v59 = vpop.f32.mrf.mxu3  ;;  %v592_v9 = vadd.s32 %v591_v58, %v582_v8  ;;  %v1950_v31 = vshrl.u32 %v1903_v18, 16  ;;  %v1953_v23 = vshll.u32 %v1903_v18, 16 }
  0xbf   : > { %v1095_v52 = vpop.f32.mrf.mxu2  ;;  %v2080_v53 = vpack.c.b16 %v2074_v47, %v2074_v47  ;;  %v825_v60 = vmax.f32 %v817_v54, %v828_v40 }
  0xc0   : > { %v1119_v3 = vadd.f32 %v1095_v52, %v3221_v45  ;;  %v1539_v25 = vpop.f32.mrf.mxu1  ;;  %v1646_v45 = vsel %vm1635_vm10, %v1643_v16, %v1645_v17  ;;  %v813_v16 = vsel %vm3462_vm15, %v3344_v43, 0.0  ;;  %v593_v22 = vshrl.u32 %v592_v9, 3 }
  0xc1   : > { %v1362_v57 = vpop.f32.mrf.mxu0  ;;  %vm3486_vm10 = vcmp.lt.s32.totalorder %v758_v28, 8  ;;  %v823_v26 = vand.u32 2147483647, %v813_v16  ;;  %v1952_v2 = vrot.slane %v1950_v31, 2  ;;  %v1955_v29 = vrot.slane %v1953_v23, 3 }
  0xc2   : > { %v1254_v15 = vadd.f32 %v1230_v59, %v1119_v3  ;;  %v1387_v24 = vadd.f32 %v1362_v57, %v1253_v49  ;;  %v594_v38 = vmul.u32 10, %v593_v22  ;;  %v808_v43 = vsel %vm3486_vm10, %v3376_v56, 0.0 }
  0xc3   : > { %2524 = vmatmul.msk.bf16.gmra.mxu3 %vm896_vm2, %v1780_v33  ;;  %2575 = vmatmul.msk.bf16.gmra.mxu1 %vm896_vm2, %v2090_v1  ;;  %v829_v61 = vmax.f32 %v825_v60, %v823_v26  ;;  %v818_v46 = vand.u32 2147483647, %v808_v43  ;;  %v2091_v56 = vrot.slane %v2080_v53, 3 }
  0xc4   : > { %v3482_v36 = vadd.f32 %v1539_v25, %v1387_v24  ;;  %2498 = vmatmul.msk.bf16.gmra.mxu2 %vm896_vm2, %v1646_v45  ;;  %2549 = vmatmul.msk.bf16.gmra.mxu0 %vm896_vm2, %v1948_v4  ;;  %v595_v0 = vsub.s32 %v3362_v19, %v594_v38 }
  0xc5   : > { %v830_v35 = vmax.f32 %v818_v46, %v829_v61  ;;  %v2092_v58 = vsel %vm2081_vm9, %v2089_v62, %v2091_v56 }
  0xc6   : > { %v1233_v39 = vpop.f32.mrf.mxu3  ;;  %vm719_vm1 = vcmp.ne.s32.totalorder %v595_v0, 0  ;;  %vm729_vm0 = vcmp.lt.s32.totalorder %v595_v0, 0  ;;  %v749_v8 = vadd.s32 10, %v595_v0 }
  0xc7   : > { %v1098_v48 = vpop.f32.mrf.mxu2  ;;  %vm739_vm3 = vmand %vm729_vm0, %vm719_vm1 }
  0xc8   : > { %v1120_v17 = vadd.f32 %v1098_v48, %v3270_v30  ;;  %v1541_v49 = vpop.f32.mrf.mxu1  ;;  %v759_v59 = vsel %vm739_vm3, %v749_v8, %v595_v0  ;;  %v1956_v30 = vor.u32 %v1955_v29, %v1952_v2 }
  0xc9   : > { %v1364_v42 = vpop.f32.mrf.mxu0  ;;  %vm769_vm4 = vcmp.lt.s32.totalorder %v759_v59, 8 }
  0xca   : > { %v1255_v10 = vadd.f32 %v1233_v39, %v1120_v17  ;;  %v1388_v20 = vadd.f32 %v1364_v42, %v1254_v15  ;;  %v809_v21 = vsel %vm769_vm4, %v3431_v14, 0.0  ;;  %v1957_v33 = vsel %vm1904_vm14, %v1947_v6, %v1956_v30 }
  0xcb   : > { %v819_v52 = vand.u32 2147483647, %v809_v21 }
  0xcc   : > { %v3495_v19 = vadd.f32 %v1541_v49, %v1388_v20 }
  0xcd   : > { %v832_v3 = vmax.f32 %v830_v35, %v819_v52 }
  0xce   : > { %v1235_v11 = vpop.f32.mrf.mxu3 }
  0xcf   : > { %v1100_v63 = vpop.f32.mrf.mxu2  ;;  %v833_v57 = vrot.slane %v832_v3, 4 }
  0xd0   : > { %v1121_v13 = vadd.f32 %v1100_v63, %v3328_v5  ;;  %v1544_v32 = vpop.f32.mrf.mxu1 }
  0xd1   : > { %v1367_v25 = vpop.f32.mrf.mxu0  ;;  %v834_v5 = vmax.f32 %v832_v3, %v833_v57 }
  0xd2   : > { %v1256_v1 = vadd.f32 %v1235_v11, %v1121_v13  ;;  %v1389_v41 = vadd.f32 %v1367_v25, %v1255_v10 }
  0xd3   : > { %2576 = vmatmul.msk.bf16.gmra.mxu1 %vm896_vm2, %v2092_v58  ;;  %v835_v18 = vrot.slane %v834_v5, 2 }
  0xd4   : > { %v3504_v14 = vadd.f32 %v1544_v32, %v1389_v41  ;;  %2550 = vmatmul.msk.bf16.gmra.mxu0 %vm896_vm2, %v1957_v33 }
  0xd5   : > { %v836_v28 = vmax.f32 %v834_v5, %v835_v18 }
  0xd6   : > { %v1238_v45 = vpop.f32.mrf.mxu3 }
  0xd7   : > { %v1103_v50 = vpop.f32.mrf.mxu2  ;;  %v837_v24 = vrot.slane %v836_v28, 1 }
  0xd8   : > { %v1122_v62 = vadd.f32 %v1103_v50, %v3389_v27  ;;  %v1546_v7 = vpop.f32.mrf.mxu1 }
  0xd9   : > { %v1369_v9 = vpop.f32.mrf.mxu0  ;;  %v838_v4 = vmax.f32 %v836_v28, %v837_v24  ;;  %v3536_v24 = vld [vmem:[%s3573_s2] ss:$0 sm:$0xff] }
  0xda   : > { %v1257_v6 = vadd.f32 %v1238_v45, %v1122_v62  ;;  %v1390_v15 = vadd.f32 %v1369_v9, %v1256_v1 }
  0xdb   : > { %839 = vst [vmem:[%s307_s14] sm:$0x1] %v838_v4 }
  0xdc   : > { %v3512_v40 = vadd.f32 %v1546_v7, %v1390_v15 }
  0xde   : > { %v1240_v16 = vpop.f32.mrf.mxu3 }
  0xdf   : > { %v1105_v22 = vpop.f32.mrf.mxu2 }
  0xe0   : > { %v1123_v47 = vadd.f32 %v1105_v22, %v3438_v51  ;;  %v1549_v54 = vpop.f32.mrf.mxu1 }
  0xe1   : > { %v1372_v27 = vpop.f32.mrf.mxu0 }
  0xe2   : > { %v1258_v34 = vadd.f32 %v1240_v16, %v1123_v47  ;;  %v1391_v31 = vadd.f32 %v1372_v27, %v1257_v6 }
  0xe4   : > { %v3515_v23 = vadd.f32 %v1549_v54, %v1391_v31 }
  0xe6   : > { %v1243_v38 = vpop.f32.mrf.mxu3 }
  0xe7   : > { %v1108_v39 = vpop.f32.mrf.mxu2 }
  0xe8   : > { %v1124_v26 = vadd.f32 %v1108_v39, %v3207_v37  ;;  %v1551_v48 = vpop.f32.mrf.mxu1 }
  0xe9   : > { %v1374_v43 = vpop.f32.mrf.mxu0 }
  0xea   : > { %v1259_v0 = vadd.f32 %v1243_v38, %v1124_v26  ;;  %v1392_v17 = vadd.f32 %v1374_v43, %v1258_v34 }
  0xec   : > { %v3518_v49 = vadd.f32 %v1551_v48, %v1392_v17 }
  0xee   : > { %v1245_v53 = vpop.f32.mrf.mxu3 }
  0xef   : > { %v1110_v60 = vpop.f32.mrf.mxu2 }
  0xf0   : > { %v1125_v51 = vadd.f32 %v1110_v60, %v3256_v12  ;;  %v1554_v42 = vpop.f32.mrf.mxu1 }
  0xf1   : > { %v1377_v2 = vpop.f32.mrf.mxu0 }
  0xf2   : > { %v1260_v29 = vadd.f32 %v1245_v53, %v1125_v51  ;;  %v1393_v8 = vadd.f32 %v1377_v2, %v1259_v0 }
  0xf4   : > { %v3521_v10 = vadd.f32 %v1554_v42, %v1393_v8 }
  0xf6   : > { %v1248_v61 = vpop.f32.mrf.mxu3 }
  0xf7   : > { %v1113_v46 = vpop.f32.mrf.mxu2 }
  0xf8   : > { %v1126_v37 = vadd.f32 %v1113_v46, %v3314_v44  ;;  %v1556_v20 = vpop.f32.mrf.mxu1 }
  0xf9   : > { %v1379_v59 = vpop.f32.mrf.mxu0 }
  0xfa   : > { %v1261_v56 = vadd.f32 %v1248_v61, %v1126_v37  ;;  %v1394_v30 = vadd.f32 %v1379_v59, %v1260_v29 }
  0xfc   : > { %v3524_v21 = vadd.f32 %v1556_v20, %v1394_v30 }
  0xfe   : > { %v1250_v11 = vpop.f32.mrf.mxu3 }
  0xff   : > { %v1115_v35 = vpop.f32.mrf.mxu2 }
 0x100   : > { %v1127_v12 = vadd.f32 %v1115_v35, %v3373_v55  ;;  %v1559_v52 = vpop.f32.mrf.mxu1 }
 0x101   : > { %v1382_v63 = vpop.f32.mrf.mxu0 }
 0x102   : > { %v1262_v13 = vadd.f32 %v1250_v11, %v1127_v12  ;;  %v1395_v32 = vadd.f32 %v1382_v63, %v1261_v56 }
 0x104   : > { %v3527_v58 = vadd.f32 %v1559_v52, %v1395_v32 }
 0x106   : > { %v1808_v3 = vpop.f32.mrf.mxu3 }
 0x107   : > { %v1674_v25 = vpop.f32.mrf.mxu2 }
 0x108   : > { %v1561_v33 = vpop.f32.mrf.mxu1  ;;  %v1699_v57 = vadd.f32 %v1674_v25, %v3482_v36 }
 0x109   : > { %v1384_v44 = vpop.f32.mrf.mxu0 }
 0x10a   : > { %v1396_v1 = vadd.f32 %v1384_v44, %v1262_v13  ;;  %v1833_v55 = vadd.f32 %v1808_v3, %v1699_v57 }
 0x10c   : > { %v3529_v41 = vadd.f32 %v1561_v33, %v1396_v1 }
 0x10e   : > { %v1810_v5 = vpop.f32.mrf.mxu3 }
 0x10f   : > { %v1676_v45 = vpop.f32.mrf.mxu2 }
 0x110   : > { %v2120_v18 = vpop.f32.mrf.mxu1  ;;  %v1700_v62 = vadd.f32 %v1676_v45, %v3495_v19 }
 0x111   : > { %v1985_v50 = vpop.f32.mrf.mxu0 }
 0x112   : > { %v2010_v7 = vadd.f32 %v1985_v50, %v1833_v55  ;;  %v1834_v6 = vadd.f32 %v1810_v5, %v1700_v62 }
 0x114   : > { %v2145_v15 = vadd.f32 %v2120_v18, %v2010_v7 }
 0x116   : > { %v1813_v28 = vpop.f32.mrf.mxu3  ;;  %v2179_v22 = vadd.f32 %v3536_v24, %v2145_v15 }
 0x117   : > { %v1679_v9 = vpop.f32.mrf.mxu2 }
 0x118   : > { %v2122_v4 = vpop.f32.mrf.mxu1  ;;  %v1701_v54 = vadd.f32 %v1679_v9, %v3504_v14  ;;  %v2189_v31 = vmax.f32 %v2179_v22, 0.0 }
 0x119   : > { %v1987_v36 = vpop.f32.mrf.mxu0 }
 0x11a   : > { %v2011_v16 = vadd.f32 %v1987_v36, %v1834_v6  ;;  %v1835_v48 = vadd.f32 %v1813_v28, %v1701_v54 }
 0x11c   : > { %v2146_v47 = vadd.f32 %v2122_v4, %v2011_v16 }
 0x11e   : > { %v2180_v19 = vadd.f32 %v3536_v24, %v2146_v47  ;;  %v1815_v27 = vpop.f32.mrf.mxu3 }
 0x11f   : > { %v1681_v34 = vpop.f32.mrf.mxu2 }
 0x120   : > { %v2190_v38 = vmax.f32 %v2180_v19, 0.0  ;;  %v2125_v39 = vpop.f32.mrf.mxu1  ;;  %v1702_v14 = vadd.f32 %v1681_v34, %v3512_v40 }
 0x121   : > { %v1990_v26 = vpop.f32.mrf.mxu0 }
 0x122   : > { %v2632_v43 = vpack.c.bf16 %v2190_v38, %v2189_v31  ;;  %v2012_v0 = vadd.f32 %v1990_v26, %v1835_v48  ;;  %v1836_v60 = vadd.f32 %v1815_v27, %v1702_v14 }
 0x124   : > { %2633 = vst [vmem:[%s3546_s20] sm:$0xff] %v2632_v43   ;;  %v2147_v51 = vadd.f32 %v2125_v39, %v2012_v0 }
 0x126   : > { %v1818_v17 = vpop.f32.mrf.mxu3  ;;  %v2181_v8 = vadd.f32 %v3536_v24, %v2147_v51 }
 0x127   : > { %v1684_v53 = vpop.f32.mrf.mxu2 }
 0x128   : > { %v2127_v42 = vpop.f32.mrf.mxu1  ;;  %v1703_v46 = vadd.f32 %v1684_v53, %v3515_v23  ;;  %v2191_v56 = vmax.f32 %v2181_v8, 0.0 }
 0x129   : > { %v1992_v2 = vpop.f32.mrf.mxu0 }
 0x12a   : > { %v2013_v29 = vadd.f32 %v1992_v2, %v1836_v60  ;;  %v1837_v35 = vadd.f32 %v1818_v17, %v1703_v46 }
 0x12c   : > { %v2148_v61 = vadd.f32 %v2127_v42, %v2013_v29 }
 0x12e   : > { %v2182_v37 = vadd.f32 %v3536_v24, %v2148_v61  ;;  %v1820_v59 = vpop.f32.mrf.mxu3 }
 0x12f   : > { %v1686_v20 = vpop.f32.mrf.mxu2 }
 0x130   : > { %v2192_v40 = vmax.f32 %v2182_v37, 0.0  ;;  %v2130_v30 = vpop.f32.mrf.mxu1  ;;  %v1704_v52 = vadd.f32 %v1686_v20, %v3518_v49 }
 0x131   : > { %v1995_v11 = vpop.f32.mrf.mxu0 }
 0x132   : > { %v2637_v12 = vpack.c.bf16 %v2192_v40, %v2191_v56  ;;  %v2014_v63 = vadd.f32 %v1995_v11, %v1837_v35  ;;  %v1838_v32 = vadd.f32 %v1820_v59, %v1704_v52 }
 0x134   : > { %2654 = vst [vmem:[%s3546_s20 + $0x8] sm:$0xff] %v2637_v12   ;;  %v2149_v3 = vadd.f32 %v2130_v30, %v2014_v63 }
 0x136   : > { %v1823_v23 = vpop.f32.mrf.mxu3  ;;  %v2183_v1 = vadd.f32 %v3536_v24, %v2149_v3 }
 0x137   : > { %v1689_v13 = vpop.f32.mrf.mxu2 }
 0x138   : > { %v2132_v25 = vpop.f32.mrf.mxu1  ;;  %v1705_v5 = vadd.f32 %v1689_v13, %v3521_v10  ;;  %v2193_v50 = vmax.f32 %v2183_v1, 0.0 }
 0x139   : > { %v1997_v33 = vpop.f32.mrf.mxu0 }
 0x13a   : > { %v2015_v44 = vadd.f32 %v1997_v33, %v1838_v32  ;;  %v1839_v7 = vadd.f32 %v1823_v23, %v1705_v5 }
 0x13c   : > { %v2150_v57 = vadd.f32 %v2132_v25, %v2015_v44 }
 0x13e   : > { %v2184_v45 = vadd.f32 %v3536_v24, %v2150_v57  ;;  %v1825_v9 = vpop.f32.mrf.mxu3 }
 0x13f   : > { %v1691_v18 = vpop.f32.mrf.mxu2 }
 0x140   : > { %v2194_v55 = vmax.f32 %v2184_v45, 0.0  ;;  %v2135_v49 = vpop.f32.mrf.mxu1  ;;  %v1706_v6 = vadd.f32 %v1691_v18, %v3524_v21 }
 0x141   : > { %v2000_v62 = vpop.f32.mrf.mxu0 }
 0x142   : > { %v2642_v28 = vpack.c.bf16 %v2194_v55, %v2193_v50  ;;  %v2016_v15 = vadd.f32 %v2000_v62, %v1839_v7  ;;  %v1840_v36 = vadd.f32 %v1825_v9, %v1706_v6 }
 0x144   : > { %2655 = vst [vmem:[%s3546_s20 + $0x10] sm:$0xff] %v2642_v28   ;;  %v2151_v16 = vadd.f32 %v2135_v49, %v2016_v15 }
 0x146   : > { %v2185_v54 = vadd.f32 %v3536_v24, %v2151_v16  ;;  %v1828_v34 = vpop.f32.mrf.mxu3 }
 0x147   : > { %v1694_v4 = vpop.f32.mrf.mxu2 }
 0x148   : > { %v2137_v22 = vpop.f32.mrf.mxu1  ;;  %v1707_v19 = vadd.f32 %v1694_v4, %v3527_v58  ;;  %v2195_v38 = vmax.f32 %v2185_v54, 0.0 }
 0x149   : > { %v2002_v10 = vpop.f32.mrf.mxu0 }
 0x14a   : > { %v2017_v47 = vadd.f32 %v2002_v10, %v1840_v36  ;;  %v1841_v39 = vadd.f32 %v1828_v34, %v1707_v19 }
 0x14c   : > { %v2152_v27 = vadd.f32 %v2137_v22, %v2017_v47 }
 0x14e   : > { %v2186_v31 = vadd.f32 %v3536_v24, %v2152_v27  ;;  %v1830_v58 = vpop.f32.mrf.mxu3 }
 0x14f   : > { %v1696_v21 = vpop.f32.mrf.mxu2 }
 0x150   : > { %v2196_v26 = vmax.f32 %v2186_v31, 0.0  ;;  %v2140_v43 = vpop.f32.mrf.mxu1  ;;  %v1708_v17 = vadd.f32 %v1696_v21, %v3529_v41 }
 0x151   : > { %v2005_v48 = vpop.f32.mrf.mxu0 }
 0x152   : > { %v2647_v14 = vpack.c.bf16 %v2196_v26, %v2195_v38  ;;  %v2018_v0 = vadd.f32 %v2005_v48, %v1841_v39  ;;  %v1842_v51 = vadd.f32 %v1830_v58, %v1708_v17 }
 0x154   : > { %2656 = vst [vmem:[%s3546_s20 + $0x18] sm:$0xff] %v2647_v14   ;;  %v2153_v53 = vadd.f32 %v2140_v43, %v2018_v0 }
 0x156   : > { %v2187_v60 = vadd.f32 %v3536_v24, %v2153_v53 }
 0x158   : > { %v2142_v29 = vpop.f32.mrf.mxu1  ;;  %v2197_v46 = vmax.f32 %v2187_v60, 0.0 }
 0x159   : > { %v2007_v42 = vpop.f32.mrf.mxu0 }
 0x15a   : > { %v2019_v2 = vadd.f32 %v2007_v42, %v1842_v51 }
 0x15c   : > { %v2154_v8 = vadd.f32 %v2142_v29, %v2019_v2 }
 0x15e   : > { %v2188_v61 = vadd.f32 %v3536_v24, %v2154_v8 }
 0x160   : > { %v2198_v37 = vmax.f32 %v2188_v61, 0.0 }
 0x162   : > { %v2652_v20 = vpack.c.bf16 %v2198_v37, %v2197_v46 }
 0x164   : > { %2657 = vst [vmem:[%s3546_s20 + $0x20] sm:$0xff] %v2652_v20  }
 0x165 PF: > { %s18_s24 = sadd.s32 1, %s2679_s24  }
 0x166   : > { %p15_p4 = scmp.ge.s32.totalorder %s18_s24, 4  }
 0x168   :  { %17 = sbr.rel (!%p15_p4) target bundleno = 1 (0x1), region = 97 }

// kernel: residual_block_apply.2
= control target key start
LH: loop header
LB: loop body
LE: loop exit
PB: predicated region body
PF: predicated region fallthrough
CT: control target
= control target key end

     0   :  { %s5826_s12 = smov 0   ;;  %s6891_s0 = inlined_call_operand.vmem [shape: bf16[2,342,4], index: 0, kind: input, shape index: {}]   ;;  %s6892_s1 = inlined_call_operand.vmem [shape: bf16[9,4,128], index: 1, kind: input, shape index: {}]   ;;  %s6893_s2 = inlined_call_operand.vmem [shape: f32[1,128], index: 2, kind: input, shape index: {}]   ;;  %s6894_s3 = inlined_call_operand.vmem [shape: bf16[2,288,128], index: 3, kind: output, shape index: {}]  }
   0x1 LB: > { %s4687_s13 = sadd.s32 4294967295, %s5804_s12   ;;  %p4691_p0 = scmp.ge.s32.totalorder %s5804_s12, 1  ;;  %s5804_s12 = sphi %s5826_s12, %s13_s12  }
   0x2   : > { %p137_p1 = scmp.lt.s32.totalorder %s5804_s12, 3 }
   0x4   : > { %p138_p2 = pnand %p4691_p0, %p137_p1 }
   0x6   : > { %141 = sbr.rel (%p138_p2) target bundleno = 812 (0x32c), region = 32 }
   0xb   : > { %v280_v0 = vld [vmem:[%s6892_s1] sm:$0x3]  ;;  %vm426_vm0 = vcmask 1041408   ;;  %p161_p3 = scmp.lt.s32.totalorder %s4687_s13, 1  ;;  %v4875_v2 = vld [vmem:[%s6892_s1 + $0x4] sm:$0x3] }
   0xc   : > { %v428_v1 = vsel %vm426_vm0, %v280_v0, 0  ;;  %v4784_v3 = vld [vmem:[%s6892_s1 + $0x2] sm:$0x3]  ;;  %v1407_v4 = vsel %vm426_vm0, %v4875_v2, 0  ;;  %v5057_v6 = vld [vmem:[%s6892_s1 + $0x8] sm:$0x3] }
   0xd   : > { %5783 = vmatpush.bf16.msra.mxu1 %v428_v1  ;;  %5784 = vmatpush.bf16.msra.mxu2 %v428_v1  ;;  %s6916_s13 = smov (!%p161_p3, %s4687_s13), 1  ;;  %v973_v5 = vsel %vm426_vm0, %v4784_v3, 0  ;;  %v2407_v7 = vsel %vm426_vm0, %v5057_v6, 0  ;;  %vm371_vm1 = vcmask 31744   ;;  %v4966_v12 = vld [vmem:[%s6892_s1 + $0x6] sm:$0x3] }
   0xe   : > { %437 = vmatpush.bf16.msra.mxu0 %v428_v1  ;;  %s5786_s22 = smul.u32 172, %s6916_s13  ;;  %5785 = vmatpush.bf16.msra.mxu3 %v428_v1  ;;  %v1840_v13 = vsel %vm426_vm0, %v4966_v12, 0  ;;  %vm1314_vm2 = vcmask 1046528   ;;  %v5239_v32 = vld [vmem:[%s6892_s1 + $0xc] sm:$0x3]  ;;  %vm2748_vm6 = vcmask 1045504  }
   0xf   : > { %v3274_v33 = vsel %vm426_vm0, %v5239_v32, 0  ;;  %v5330_v34 = vld [vmem:[%s6892_s1 + $0xe] sm:$0x3]  ;;  %v5148_v35 = vld [vmem:[%s6892_s1 + $0xa] sm:$0x3]  ;;  %vm4182_vm7 = vcmask 1044480  }
  0x10   : > { %s5856_s25 = scalar_lea.vmem %s6891_s0, %s5786_s22  ;;  %v3841_v36 = vsel %vm426_vm0, %v5330_v34, 0  ;;  %v2841_v37 = vsel %vm426_vm0, %v5148_v35, 0  ;;  %v5421_v38 = vld [vmem:[%s6892_s1 + $0x10] sm:$0x3]  ;;  %vm769_vm3 = vsmask.f32 7424 }
  0x11   : > { %1416 = vmatpush.bf16.msrb.mxu2 %v1407_v4  ;;  %982 = vmatpush.bf16.msrb.mxu1 %v973_v5  ;;  %v5519_v8 = vld [vmem:[%s5856_s25 + $0x28] sm:$0xff]  ;;  %v5524_v9 = vld [vmem:[%s5856_s25 + $0x50] sm:$0xff]  ;;  %v5514_v10 = vld [vmem:[%s5856_s25] sm:$0xff]  ;;  %v4275_v39 = vsel %vm426_vm0, %v5421_v38, 0  ;;  %vm2181_vm4 = vsmask.f32 6400 }
  0x12   : > { %2416 = vmatpush.bf16.msrb.mxu0 %v2407_v7  ;;  %4771 = vmatmul.msk.bf16.vlgmr.msra.gmra.mxu1 %vm371_vm1, %v5519_v8  ;;  %v5529_v11 = vld [vmem:[%s5856_s25 + $0x78] sm:$0xff]  ;;  %v5520_v14 = vld [vmem:[%s5856_s25 + $0x30] sm:$0xff]  ;;  %v5515_v16 = vld [vmem:[%s5856_s25 + $0x8] sm:$0xff]  ;;  %vm3615_vm5 = vsmask.f32 5376  ;;  %s5787_s11 = smul.u32 144, %s6916_s13 }
  0x13   : > { %4776 = vmatmul.msk.bf16.vlgmr.msra.gmra.mxu2 %vm371_vm1, %v5524_v9  ;;  %4766 = vmatmul.msk.bf16.vlgmr.msra.gmra.mxu0 %vm371_vm1, %v5514_v10  ;;  %v5525_v15 = vld [vmem:[%s5856_s25 + $0x58] sm:$0xff]  ;;  %v5530_v17 = vld [vmem:[%s5856_s25 + $0x80] sm:$0xff]  ;;  %v5516_v20 = vld [vmem:[%s5856_s25 + $0x10] sm:$0xff] }
  0x14   : > { %4781 = vmatmul.msk.bf16.vlgmr.msra.gmra.mxu3 %vm371_vm1, %v5529_v11  ;;  %v5521_v18 = vld [vmem:[%s5856_s25 + $0x38] sm:$0xff]  ;;  %v5526_v19 = vld [vmem:[%s5856_s25 + $0x60] sm:$0xff]  ;;  %v5531_v21 = vld [vmem:[%s5856_s25 + $0x88] sm:$0xff]  ;;  %s6622_s13 = scalar_lea.vmem %s6894_s3, %s5787_s11 }
  0x15   : > { %1849 = vmatpush.bf16.msrb.mxu3 %v1840_v13  ;;  %v4969_v22 = vld [vmem:[%s5856_s25 + $0x8] sm:$0xe]  ;;  %v5568_v23 = vld [vmem:[%s5856_s25 + $0x8] sm:$0xf0]  ;;  %v5569_v24 = vld [vmem:[%s5856_s25 + $0x10] sm:$0xff]  ;;  %3283 = vmatpush.bf16.msra.mxu2 %v3274_v33 }
  0x16   : > { %v4970_v25 = vor.u32 %v5568_v23, %v4969_v22  ;;  %v1749_v27 = vrot.slane %v5569_v24, 1  ;;  %v5522_v28 = vld [vmem:[%s5856_s25 + $0x40] sm:$0xff]  ;;  %v5527_v29 = vld [vmem:[%s5856_s25 + $0x68] sm:$0xff]  ;;  %v5517_v30 = vld [vmem:[%s5856_s25 + $0x18] sm:$0xff]  ;;  %2850 = vmatpush.bf16.msra.mxu1 %v2841_v37  ;;  %4284 = vmatpush.bf16.msra.mxu0 %v4275_v39 }
  0x17   : > { %v5570_v40 = vld [vmem:[%s5856_s25 + $0x18] sm:$0xff]  ;;  %v5060_v41 = vld [vmem:[%s5856_s25 + $0x8] sm:$0xe]  ;;  %v5586_v42 = vld [vmem:[%s5856_s25 + $0x8] sm:$0xf0] }
  0x18   : > { %v1748_v26 = vrot.slane %v4970_v25, 1  ;;  %v1751_v43 = vrot.slane %v5570_v40, 1  ;;  %v5523_v44 = vld [vmem:[%s5856_s25 + $0x48] sm:$0xff]  ;;  %v5528_v45 = vld [vmem:[%s5856_s25 + $0x70] sm:$0xff]  ;;  %v5518_v46 = vld [vmem:[%s5856_s25 + $0x20] sm:$0xff]  ;;  %v5061_v49 = vor.u32 %v5586_v42, %v5060_v41 }
  0x19   : > { %3850 = vmatpush.bf16.msra.mxu3 %v3841_v36  ;;  %v5532_v47 = vld [vmem:[%s5856_s25] sm:$0xff]  ;;  %v5587_v48 = vld [vmem:[%s5856_s25 + $0x10] sm:$0xff]  ;;  %v5533_v51 = vld [vmem:[%s5856_s25 + $0x8] sm:$0xff] }
  0x1a   : > { %v1750_v31 = vsel %vm1314_vm2, %v1748_v26, %v1749_v27  ;;  %v1752_v50 = vsel %vm1314_vm2, %v1749_v27, %v1751_v43  ;;  %v773_v52 = vshll.u32 %v5532_v47, 16  ;;  %v4878_v53 = vld [vmem:[%s5856_s25] sm:$0xe]  ;;  %v5550_v54 = vld [vmem:[%s5856_s25] sm:$0xf0]  ;;  %v2183_v55 = vshrl.u32 %v5061_v49, 16 }
  0x1b   : > { %v2186_v56 = vshll.u32 %v5061_v49, 16  ;;  %v2191_v57 = vshrl.u32 %v5587_v48, 16  ;;  %v2194_v58 = vshll.u32 %v5587_v48, 16  ;;  %v771_v59 = vshrl.u32 %v5532_v47, 16  ;;  %v5551_v62 = vld [vmem:[%s5856_s25 + $0x8] sm:$0xff]  ;;  %v5571_v4 = vld [vmem:[%s5856_s25 + $0x20] sm:$0xff] }
  0x1c   : > { %v775_v60 = vrot.slane %v773_v52, 1  ;;  %v778_v61 = vshll.u32 %v5533_v51, 16  ;;  %v4879_v63 = vor.u32 %v5550_v54, %v4878_v53  ;;  %v2185_v0 = vrot.slane %v2183_v55, 1  ;;  %v5552_v22 = vld [vmem:[%s5856_s25 + $0x10] sm:$0xff]  ;;  %v5572_v25 = vld [vmem:[%s5856_s25 + $0x28] sm:$0xff]  ;;  %v5589_v34 = vld [vmem:[%s5856_s25 + $0x20] sm:$0xff] }
  0x1d   : > { %v2188_v1 = vrot.slane %v2186_v56, 2  ;;  %v2193_v2 = vrot.slane %v2191_v57, 1  ;;  %v2196_v3 = vrot.slane %v2194_v58, 2  ;;  %v1316_v8 = vrot.slane %v5551_v62, 1  ;;  %v5535_v36 = vld [vmem:[%s5856_s25 + $0x18] sm:$0xff]  ;;  %v5590_v53 = vld [vmem:[%s5856_s25 + $0x28] sm:$0xff] }
  0x1e   : > { %v776_v5 = vor.u32 %v775_v60, %v771_v59  ;;  %v780_v6 = vrot.slane %v778_v61, 1  ;;  %v1315_v7 = vrot.slane %v4879_v63, 1  ;;  %v1753_v11 = vrot.slane %v5571_v4, 1  ;;  %v5553_v41 = vld [vmem:[%s5856_s25 + $0x18] sm:$0xff]  ;;  %v5536_v55 = vld [vmem:[%s5856_s25 + $0x20] sm:$0xff] }
  0x1f   : > { %v2189_v9 = vor.u32 %v2188_v1, %v2185_v0  ;;  %v2197_v10 = vor.u32 %v2196_v3, %v2193_v2  ;;  %v2209_v37 = vshrl.u32 %v5589_v34, 16  ;;  %v2212_v38 = vshll.u32 %v5589_v34, 16  ;;  %v5554_v60 = vld [vmem:[%s5856_s25 + $0x20] sm:$0xff]  ;;  %v5574_v63 = vld [vmem:[%s5856_s25 + $0x38] sm:$0xff] }
  0x20   : > { %v781_v12 = vsel %vm769_vm3, %v776_v5, %v780_v6  ;;  %v1317_v13 = vsel %vm1314_vm2, %v1315_v7, %v1316_v8  ;;  %v794_v40 = vshll.u32 %v5535_v36, 16  ;;  %v1320_v47 = vrot.slane %v5553_v41, 1 }
  0x21   : > { %v2211_v42 = vrot.slane %v2209_v37, 1  ;;  %v2218_v56 = vshrl.u32 %v5590_v53, 16  ;;  %v2221_v57 = vshll.u32 %v5590_v53, 16  ;;  %v798_v58 = vshrl.u32 %v5535_v36, 16  ;;  %v5592_v37 = vld [vmem:[%s5856_s25 + $0x38] sm:$0xff] }
  0x22   : > { %4772 = vmatmul.msk.bf16.gmra.mxu1 %vm371_vm1, %v5520_v14  ;;  %v2198_v14 = vsel %vm2181_vm4, %v2189_v9, %v2197_v10  ;;  %v802_v59 = vshll.u32 %v5536_v55, 16  ;;  %v1322_v2 = vrot.slane %v5554_v60, 1  ;;  %v1759_v4 = vrot.slane %v5574_v63, 1 }
  0x23   : > { %4777 = vmatmul.msk.bf16.gmra.mxu2 %vm371_vm1, %v5525_v15  ;;  %4767 = vmatmul.msk.bf16.gmra.mxu0 %vm371_vm1, %v5515_v16  ;;  %v5588_v15 = vld [vmem:[%s5856_s25 + $0x18] sm:$0xff]  ;;  %v1754_v16 = vsel %vm1314_vm2, %v1751_v43, %v1753_v11  ;;  %v2214_v43 = vrot.slane %v2212_v38, 2  ;;  %v2220_v61 = vrot.slane %v2218_v56, 1  ;;  %v2223_v62 = vrot.slane %v2221_v57, 2 }
  0x24   : > { %4782 = vmatmul.msk.bf16.gmra.mxu3 %vm371_vm1, %v5530_v17  ;;  %v5534_v17 = vld [vmem:[%s5856_s25 + $0x10] sm:$0xff]  ;;  %v804_v1 = vrot.slane %v802_v59, 1  ;;  %v1323_v7 = vsel %vm1314_vm2, %v1320_v47, %v1322_v2  ;;  %v2239_v41 = vshll.u32 %v5592_v37, 16 }
  0x25   : > { %v790_v39 = vshrl.u32 %v5534_v17, 16  ;;  %v2215_v48 = vor.u32 %v2214_v43, %v2211_v42  ;;  %v2224_v3 = vor.u32 %v2223_v62, %v2220_v61 }
  0x27   : > { %v2225_v9 = vsel %vm2181_vm4, %v2215_v48, %v2224_v3 }
  0x32   : > { %4773 = vmatmul.msk.bf16.gmra.mxu1 %vm371_vm1, %v5521_v18  ;;  %v2200_v18 = vshrl.u32 %v5588_v15, 16 }
  0x33   : > { %4778 = vmatmul.msk.bf16.gmra.mxu2 %vm371_vm1, %v5526_v19  ;;  %4768 = vmatmul.msk.bf16.gmra.mxu0 %vm371_vm1, %v5516_v20  ;;  %v2203_v19 = vshll.u32 %v5588_v15, 16  ;;  %v782_v20 = vshrl.u32 %v5533_v51, 16 }
  0x34   : > { %4783 = vmatmul.msk.bf16.gmra.mxu3 %vm371_vm1, %v5531_v21  ;;  %v786_v21 = vshll.u32 %v5534_v17, 16  ;;  %v2202_v23 = vrot.slane %v2200_v18, 1  ;;  %v806_v17 = vshrl.u32 %v5536_v55, 16 }
  0x35   : > { %v2205_v24 = vrot.slane %v2203_v19, 2  ;;  %v784_v26 = vor.u32 %v782_v20, %v780_v6  ;;  %v5555_v19 = vld [vmem:[%s5856_s25 + $0x28] sm:$0xff] }
  0x36   : > { %v788_v27 = vrot.slane %v786_v21, 1 }
  0x42   : > { %4774 = vmatmul.msk.bf16.gmra.mxu1 %vm371_vm1, %v5522_v28  ;;  %v1318_v28 = vrot.slane %v5552_v22, 1 }
  0x43   : > { %4779 = vmatmul.msk.bf16.gmra.mxu2 %vm371_vm1, %v5527_v29  ;;  %4769 = vmatmul.msk.bf16.gmra.mxu0 %vm371_vm1, %v5517_v30  ;;  %v2206_v29 = vor.u32 %v2205_v24, %v2202_v23  ;;  %v1755_v30 = vrot.slane %v5572_v25, 1  ;;  %v5575_v24 = vld [vmem:[%s5856_s25 + $0x40] sm:$0xff]  ;;  %v808_v25 = vor.u32 %v806_v17, %v804_v1 }
  0x44   : > { %5039 = vmatmul.msk.bf16.vlgmr.msrb.gmra.mxu3 %vm371_vm1, %v1750_v31  ;;  %v789_v31 = vsel %vm769_vm3, %v784_v26, %v788_v27  ;;  %v1319_v32 = vsel %vm1314_vm2, %v1316_v8, %v1318_v28  ;;  %v1321_v51 = vsel %vm1314_vm2, %v1318_v28, %v1320_v47 }
  0x45   : > { %v2207_v33 = vsel %vm2181_vm4, %v2197_v10, %v2206_v29  ;;  %v1756_v35 = vsel %vm1314_vm2, %v1753_v11, %v1755_v30  ;;  %v2216_v52 = vsel %vm2181_vm4, %v2206_v29, %v2215_v48  ;;  %v5591_v10 = vld [vmem:[%s5856_s25 + $0x30] sm:$0xff] }
  0x52   : > { %4775 = vmatmul.msk.bf16.gmra.mxu1 %vm371_vm1, %v5523_v44  ;;  %v5573_v44 = vld [vmem:[%s5856_s25 + $0x30] sm:$0xff] }
  0x53   : > { %4780 = vmatmul.msk.bf16.gmra.mxu2 %vm371_vm1, %v5528_v45  ;;  %4770 = vmatmul.msk.bf16.gmra.mxu0 %vm371_vm1, %v5518_v46  ;;  %v792_v45 = vor.u32 %v790_v39, %v788_v27  ;;  %v796_v46 = vrot.slane %v794_v40, 1  ;;  %v1757_v49 = vrot.slane %v5573_v44, 1  ;;  %v1324_v27 = vrot.slane %v5555_v19, 1  ;;  %v5538_v39 = vld [vmem:[%s5856_s25 + $0x30] sm:$0xff] }
  0x54   : > { %5040 = vmatmul.msk.bf16.gmra.mxu3 %vm371_vm1, %v1752_v50  ;;  %v2236_v40 = vshrl.u32 %v5592_v37, 16  ;;  %v5594_v37 = vld [vmem:[%s5856_s25 + $0x48] sm:$0xff] }
  0x55   : > { %v797_v50 = vsel %vm769_vm3, %v792_v45, %v796_v46  ;;  %v1758_v54 = vsel %vm1314_vm2, %v1755_v30, %v1757_v49  ;;  %v800_v0 = vor.u32 %v798_v58, %v796_v46  ;;  %v1760_v11 = vsel %vm1314_vm2, %v1757_v49, %v1759_v4  ;;  %v5556_v46 = vld [vmem:[%s5856_s25 + $0x30] sm:$0xff] }
  0x56   : > { %v1761_v30 = vrot.slane %v5575_v24, 1  ;;  %v818_v45 = vshll.u32 %v5538_v39, 16  ;;  %v2238_v49 = vrot.slane %v2236_v40, 1  ;;  %v2254_v40 = vshrl.u32 %v5594_v37, 16 }
  0x57   : > { %v805_v6 = vsel %vm769_vm3, %v800_v0, %v804_v1  ;;  %v5593_v0 = vld [vmem:[%s5856_s25 + $0x40] sm:$0xff] }
  0x58   : > { %v1762_v38 = vsel %vm1314_vm2, %v1759_v4, %v1761_v30  ;;  %v820_v53 = vrot.slane %v818_v45, 1  ;;  %v2248_v4 = vshll.u32 %v5593_v0, 16 }
  0x5a   : > { %v2250_v17 = vrot.slane %v2248_v4, 2 }
  0x62   : > { %4857 = vmatmul.msk.bf16.vlgmr.msrb.gmra.mxu1 %vm371_vm1, %v781_v12  ;;  %v5537_v12 = vld [vmem:[%s5856_s25 + $0x28] sm:$0xff] }
  0x63   : > { %4948 = vmatmul.msk.bf16.vlgmr.msrb.gmra.mxu2 %vm371_vm1, %v1317_v13  ;;  %5130 = vmatmul.msk.bf16.vlgmr.msrb.gmra.mxu0 %vm371_vm1, %v2198_v14  ;;  %v2227_v13 = vshrl.u32 %v5591_v10, 16  ;;  %v2230_v14 = vshll.u32 %v5591_v10, 16  ;;  %v810_v18 = vshll.u32 %v5537_v12, 16  ;;  %v814_v44 = vshrl.u32 %v5537_v12, 16 }
  0x64   : > { %5041 = vmatmul.msk.bf16.gmra.mxu3 %vm371_vm1, %v1754_v16 }
  0x65   : > { %v2229_v22 = vrot.slane %v2227_v13, 1  ;;  %v2232_v23 = vrot.slane %v2230_v14, 2  ;;  %v812_v26 = vrot.slane %v810_v18, 1  ;;  %v5577_v18 = vld [vmem:[%s5856_s25 + $0x50] sm:$0xff] }
  0x67   : > { %v2233_v28 = vor.u32 %v2232_v23, %v2229_v22 }
  0x69   : > { %v2234_v36 = vsel %vm2181_vm4, %v2224_v3, %v2233_v28  ;;  %v2245_v3 = vshrl.u32 %v5593_v0, 16 }
  0x6b   : > { %v2247_v14 = vrot.slane %v2245_v3, 1 }
  0x6d   : > { %v2251_v24 = vor.u32 %v2250_v17, %v2247_v14  ;;  %v5595_v14 = vld [vmem:[%s5856_s25 + $0x50] sm:$0xff] }
  0x72   : > { %4858 = vmatmul.msk.bf16.gmra.mxu1 %vm371_vm1, %v789_v31 }
  0x73   : > { %4949 = vmatmul.msk.bf16.gmra.mxu2 %vm371_vm1, %v1319_v32  ;;  %5131 = vmatmul.msk.bf16.gmra.mxu0 %vm371_vm1, %v2207_v33  ;;  %v813_v32 = vsel %vm769_vm3, %v808_v25, %v812_v26  ;;  %v1325_v33 = vsel %vm1314_vm2, %v1322_v2, %v1324_v27  ;;  %v5539_v2 = vld [vmem:[%s5856_s25 + $0x38] sm:$0xff] }
  0x74   : > { %5042 = vmatmul.msk.bf16.gmra.mxu3 %vm371_vm1, %v1756_v35  ;;  %v826_v10 = vshll.u32 %v5539_v2, 16 }
  0x76   : > { %v828_v22 = vrot.slane %v826_v10, 1 }
  0x82   : > { %4859 = vmatmul.msk.bf16.gmra.mxu1 %vm371_vm1, %v797_v50  ;;  %v2241_v50 = vrot.slane %v2239_v41, 2  ;;  %v2257_v41 = vshll.u32 %v5594_v37, 16 }
  0x83   : > { %4950 = vmatmul.msk.bf16.gmra.mxu2 %vm371_vm1, %v1321_v51  ;;  %5132 = vmatmul.msk.bf16.gmra.mxu0 %vm371_vm1, %v2216_v52  ;;  %v5576_v51 = vld [vmem:[%s5856_s25 + $0x48] sm:$0xff]  ;;  %v816_v52 = vor.u32 %v814_v44, %v812_v26  ;;  %v1765_v26 = vrot.slane %v5577_v18, 1 }
  0x84   : > { %5043 = vmatmul.msk.bf16.gmra.mxu3 %vm371_vm1, %v1758_v54  ;;  %v1326_v54 = vrot.slane %v5556_v46, 1  ;;  %v2242_v55 = vor.u32 %v2241_v50, %v2238_v49  ;;  %v1763_v57 = vrot.slane %v5576_v51, 1  ;;  %v830_v46 = vshrl.u32 %v5539_v2, 16  ;;  %v5558_v50 = vld [vmem:[%s5856_s25 + $0x40] sm:$0xff]  ;;  %v5541_v18 = vld [vmem:[%s5856_s25 + $0x48] sm:$0xff] }
  0x85   : > { %v821_v59 = vsel %vm769_vm3, %v816_v52, %v820_v53 }
  0x86   : > { %v1327_v60 = vsel %vm1314_vm2, %v1324_v27, %v1326_v54  ;;  %v2243_v63 = vsel %vm2181_vm4, %v2233_v28, %v2242_v55  ;;  %v1764_v1 = vsel %vm1314_vm2, %v1761_v30, %v1763_v57 }
  0x8f   : > { %v5967_v5 = vpop.f32.mrf.mxu1 }
  0x90   : > { %v5971_v8 = vpop.f32.mrf.mxu0 }
  0x92   : > { %4860 = vmatmul.msk.bf16.gmra.mxu1 %vm371_vm1, %v805_v6 }
  0x93   : > { %4951 = vmatmul.msk.bf16.gmra.mxu2 %vm371_vm1, %v1323_v7  ;;  %5133 = vmatmul.msk.bf16.gmra.mxu0 %vm371_vm1, %v2225_v9  ;;  %v822_v9 = vshrl.u32 %v5538_v39, 16  ;;  %v5540_v39 = vld [vmem:[%s5856_s25 + $0x40] sm:$0xff] }
  0x94   : > { %5044 = vmatmul.msk.bf16.gmra.mxu3 %vm371_vm1, %v1760_v11  ;;  %v5557_v11 = vld [vmem:[%s5856_s25 + $0x38] sm:$0xff]  ;;  %v834_v49 = vshll.u32 %v5540_v39, 16 }
  0x95   : > { %v824_v19 = vor.u32 %v822_v9, %v820_v53  ;;  %v1328_v23 = vrot.slane %v5557_v11, 1  ;;  %v2256_v53 = vrot.slane %v2254_v40, 1 }
  0x96   : > { %v5981_v15 = vpop.f32.mrf.mxu2 }
  0x97   : > { %v5983_v16 = vpop.f32.mrf.mxu1  ;;  %v5986_v20 = vpop.f32.mrf.mxu3  ;;  %v829_v28 = vsel %vm769_vm3, %v824_v19, %v828_v22  ;;  %v1329_v30 = vsel %vm1314_vm2, %v1326_v54, %v1328_v23  ;;  %v2259_v54 = vrot.slane %v2257_v41, 2  ;;  %v2263_v19 = vshrl.u32 %v5595_v14, 16  ;;  %v5579_v41 = vld [vmem:[%s5856_s25 + $0x60] sm:$0xff] }
  0x98   : > { %v5988_v21 = vpop.f32.mrf.mxu0 }
  0x9e   : > { %v5991_v29 = vpop.f32.mrf.mxu2 }
  0x9f   : > { %v5993_v31 = vpop.f32.mrf.mxu1  ;;  %v5997_v34 = vpop.f32.mrf.mxu3 }
  0xa0   : > { %v5999_v35 = vpop.f32.mrf.mxu0 }
  0xa2   : > { %4861 = vmatmul.msk.bf16.gmra.mxu1 %vm371_vm1, %v813_v32 }
  0xa3   : > { %4952 = vmatmul.msk.bf16.gmra.mxu2 %vm371_vm1, %v1325_v33  ;;  %5134 = vmatmul.msk.bf16.gmra.mxu0 %vm371_vm1, %v2234_v36  ;;  %v2252_v36 = vsel %vm2181_vm4, %v2242_v55, %v2251_v24  ;;  %v5578_v55 = vld [vmem:[%s5856_s25 + $0x58] sm:$0xff] }
  0xa4   : > { %5045 = vmatmul.msk.bf16.gmra.mxu3 %vm371_vm1, %v1762_v38  ;;  %v1766_v38 = vsel %vm1314_vm2, %v1763_v57, %v1765_v26  ;;  %v832_v57 = vor.u32 %v830_v46, %v828_v22  ;;  %v2266_v22 = vshll.u32 %v5595_v14, 16 }
  0xa6   : > { %v6009_v42 = vpop.f32.mrf.mxu2  ;;  %v2268_v40 = vrot.slane %v2266_v22, 2 }
  0xa7   : > { %v6011_v43 = vpop.f32.mrf.mxu1  ;;  %v6014_v47 = vpop.f32.mrf.mxu3 }
  0xa8   : > { %6896 = vst [vmem:[#allocation3_spill] sm:$0xff] %v6014_v47  ;;  %v6016_v48 = vpop.f32.mrf.mxu0 }
  0xae   : > { %v6019_v56 = vpop.f32.mrf.mxu2 }
  0xaf   : > { %v6021_v58 = vpop.f32.mrf.mxu1  ;;  %v6025_v61 = vpop.f32.mrf.mxu3 }
  0xb0   : > { %6897 = vst [vmem:[#allocation4_spill] sm:$0xff] %v6025_v61  ;;  %v6027_v62 = vpop.f32.mrf.mxu0 }
  0xb2   : > { %4862 = vmatmul.msk.bf16.gmra.mxu1 %vm371_vm1, %v821_v59  ;;  %v836_v59 = vrot.slane %v834_v49, 1 }
  0xb3   : > { %4953 = vmatmul.msk.bf16.gmra.mxu2 %vm371_vm1, %v1327_v60  ;;  %5135 = vmatmul.msk.bf16.gmra.mxu0 %vm371_vm1, %v2243_v63  ;;  %v1330_v60 = vrot.slane %v5558_v50, 1  ;;  %v2260_v63 = vor.u32 %v2259_v54, %v2256_v53 }
  0xb4   : > { %5046 = vmatmul.msk.bf16.gmra.mxu3 %vm371_vm1, %v1764_v1  ;;  %v1767_v1 = vrot.slane %v5578_v55, 1  ;;  %v837_v2 = vsel %vm769_vm3, %v832_v57, %v836_v59  ;;  %v1769_v55 = vrot.slane %v5579_v41, 1 }
  0xb5   : > { %v1331_v4 = vsel %vm1314_vm2, %v1328_v23, %v1330_v60  ;;  %v2261_v11 = vsel %vm2181_vm4, %v2251_v24, %v2260_v63  ;;  %v838_v24 = vshrl.u32 %v5540_v39, 16 }
  0xb6   : > { %v6037_v6 = vpop.f32.mrf.mxu2  ;;  %v1768_v17 = vsel %vm1314_vm2, %v1765_v26, %v1767_v1 }
  0xb7   : > { %v6039_v7 = vpop.f32.mrf.mxu1  ;;  %v6042_v12 = vpop.f32.mrf.mxu3  ;;  %v840_v46 = vor.u32 %v838_v24, %v836_v59  ;;  %v1770_v59 = vsel %vm1314_vm2, %v1767_v1, %v1769_v55  ;;  %v5560_v1 = vld [vmem:[%s5856_s25 + $0x50] sm:$0xff] }
  0xb8   : > { %6898 = vst [vmem:[#allocation5_spill] sm:$0xff] %v6042_v12  ;;  %v6044_v13 = vpop.f32.mrf.mxu0 }
  0xbe   : > { %v6047_v25 = vpop.f32.mrf.mxu2 }
  0xbf   : > { %v6049_v27 = vpop.f32.mrf.mxu1  ;;  %v6053_v32 = vpop.f32.mrf.mxu3 }
  0xc0   : > { %6899 = vst [vmem:[#allocation6_spill] sm:$0xff] %v6053_v32  ;;  %v6055_v33 = vpop.f32.mrf.mxu0  ;;  %v5580_v32 = vld [vmem:[%s5856_s25 + $0x68] sm:$0xff] }
  0xc2   : > { %4863 = vmatmul.msk.bf16.gmra.mxu1 %vm371_vm1, %v829_v28 }
  0xc3   : > { %4954 = vmatmul.msk.bf16.gmra.mxu2 %vm371_vm1, %v1329_v30  ;;  %5136 = vmatmul.msk.bf16.gmra.mxu0 %vm371_vm1, %v2252_v36  ;;  %v842_v30 = vshll.u32 %v5541_v18, 16  ;;  %v5559_v36 = vld [vmem:[%s5856_s25 + $0x48] sm:$0xff] }
  0xc4   : > { %5047 = vmatmul.msk.bf16.gmra.mxu3 %vm371_vm1, %v1766_v38  ;;  %v2265_v38 = vrot.slane %v2263_v19, 1  ;;  %v1332_v50 = vrot.slane %v5559_v36, 1  ;;  %v5542_v19 = vld [vmem:[%s5856_s25 + $0x50] sm:$0xff] }
  0xc5   : > { %v844_v49 = vrot.slane %v842_v30, 1 }
  0xc6   : > { %v6065_v44 = vpop.f32.mrf.mxu2  ;;  %v2269_v53 = vor.u32 %v2268_v40, %v2265_v38  ;;  %v846_v38 = vshrl.u32 %v5541_v18, 16  ;;  %v850_v40 = vshll.u32 %v5542_v19, 16 }
  0xc7   : > { %v6067_v45 = vpop.f32.mrf.mxu1  ;;  %v6070_v51 = vpop.f32.mrf.mxu3  ;;  %v845_v39 = vsel %vm769_vm3, %v840_v46, %v844_v49 }
  0xc8   : > { %v6072_v52 = vpop.f32.mrf.mxu0  ;;  %v2270_v14 = vsel %vm2181_vm4, %v2260_v63, %v2269_v53 }
  0xce   : > { %v6075_v0 = vpop.f32.mrf.mxu2 }
  0xcf   : > { %v6077_v3 = vpop.f32.mrf.mxu1  ;;  %v6081_v9 = vpop.f32.mrf.mxu3 }
  0xd0   : > { %v6083_v10 = vpop.f32.mrf.mxu0 }
  0xd2   : > { %4864 = vmatmul.msk.bf16.gmra.mxu1 %vm371_vm1, %v837_v2  ;;  %v1333_v2 = vsel %vm1314_vm2, %v1330_v60, %v1332_v50 }
  0xd3   : > { %4955 = vmatmul.msk.bf16.gmra.mxu2 %vm371_vm1, %v1331_v4  ;;  %5137 = vmatmul.msk.bf16.gmra.mxu0 %vm371_vm1, %v2261_v11 }
  0xd4   : > { %5048 = vmatmul.msk.bf16.gmra.mxu3 %vm371_vm1, %v1768_v17  ;;  %v5596_v17 = vld [vmem:[%s5856_s25 + $0x58] sm:$0xff] }
  0xd5   : > { %v2272_v60 = vshrl.u32 %v5596_v17, 16  ;;  %v2275_v24 = vshll.u32 %v5596_v17, 16  ;;  %v1334_v17 = vrot.slane %v5560_v1, 1 }
  0xd6   : > { %v6093_v23 = vpop.f32.mrf.mxu2 }
  0xd7   : > { %v6095_v28 = vpop.f32.mrf.mxu1  ;;  %v6098_v26 = vpop.f32.mrf.mxu3 }
  0xd8   : > { %v6100_v37 = vpop.f32.mrf.mxu0 }
  0xde   : > { %v6103_v54 = vpop.f32.mrf.mxu2 }
  0xdf   : > { %v984_v57 = vpop.f32.mrf.mxu1  ;;  %v6107_v4 = vpop.f32.mrf.mxu3 }
  0xe0   : > { %v2418_v11 = vpop.f32.mrf.mxu0  ;;  %v1074_v22 = vadd.f32 %v984_v57, %v5971_v8  ;;  %v848_v8 = vor.u32 %v846_v38, %v844_v49  ;;  %v852_v57 = vrot.slane %v850_v40, 1  ;;  %v5597_v38 = vld [vmem:[%s5856_s25 + $0x60] sm:$0xff] }
  0xe2   : > { %4865 = vmatmul.msk.bf16.gmra.mxu1 %vm371_vm1, %v845_v39 }
  0xe3   : > { %4956 = vmatmul.msk.bf16.gmra.mxu2 %vm371_vm1, %v1333_v2  ;;  %5138 = vmatmul.msk.bf16.gmra.mxu0 %vm371_vm1, %v2270_v14  ;;  %v2274_v2 = vrot.slane %v2272_v60, 1  ;;  %v2277_v14 = vrot.slane %v2275_v24, 2  ;;  %v1335_v60 = vsel %vm1314_vm2, %v1332_v50, %v1334_v17  ;;  %v5543_v50 = vld [vmem:[%s5856_s25 + $0x58] sm:$0xff] }
  0xe4   : > { %5049 = vmatmul.msk.bf16.gmra.mxu3 %vm371_vm1, %v1770_v59 }
  0xe6   : > { %v1418_v30 = vpop.f32.mrf.mxu2 }
  0xe7   : > { %v1508_v63 = vadd.f32 %v1418_v30, %v1074_v22  ;;  %v986_v36 = vpop.f32.mrf.mxu1  ;;  %v6119_v41 = vpop.f32.mrf.mxu3  ;;  %v2278_v22 = vor.u32 %v2277_v14, %v2274_v2  ;;  %v1771_v30 = vrot.slane %v5580_v32, 1  ;;  %v5561_v2 = vld [vmem:[%s5856_s25 + $0x58] sm:$0xff] }
  0xe8   : > { %v2420_v39 = vpop.f32.mrf.mxu0  ;;  %v1075_v59 = vadd.f32 %v986_v36, %v5988_v21 }
  0xe9   : > { %v1941_v46 = vadd.f32 %v6070_v51, %v1508_v63  ;;  %v853_v51 = vsel %vm769_vm3, %v848_v8, %v852_v57  ;;  %v2279_v49 = vsel %vm2181_vm4, %v2269_v53, %v2278_v22  ;;  %v1772_v21 = vsel %vm1314_vm2, %v1769_v55, %v1771_v30 }
  0xea   : > { %v854_v55 = vshrl.u32 %v5542_v19, 16 }
  0xeb   : > { %v6123_v12 = vadd.f32 %v2418_v11, %v1941_v46  ;;  %v858_v46 = vshll.u32 %v5543_v50, 16 }
  0xee   : > { %v1420_v18 = vpop.f32.mrf.mxu2 }
  0xef   : > { %v1509_v61 = vadd.f32 %v1420_v18, %v1075_v59  ;;  %v989_v47 = vpop.f32.mrf.mxu1  ;;  %v6128_v24 = vpop.f32.mrf.mxu3 }
  0xf0   : > { %v2423_v63 = vpop.f32.mrf.mxu0  ;;  %v1076_v36 = vadd.f32 %v989_v47, %v5999_v35  ;;  %v856_v35 = vor.u32 %v854_v55, %v852_v57  ;;  %v860_v47 = vrot.slane %v858_v46, 1  ;;  %v5598_v55 = vld [vmem:[%s5856_s25 + $0x68] sm:$0xff] }
  0xf1   : > { %v1942_v11 = vadd.f32 %v6081_v9, %v1509_v61  ;;  %v2281_v61 = vshrl.u32 %v5597_v38, 16  ;;  %v2284_v9 = vshll.u32 %v5597_v38, 16 }
  0xf2   : > { %4866 = vmatmul.msk.bf16.gmra.mxu1 %vm371_vm1, %v853_v51  ;;  %v5581_v51 = vld [vmem:[%s5856_s25 + $0x70] sm:$0xff] }
  0xf3   : > { %4957 = vmatmul.msk.bf16.gmra.mxu2 %vm371_vm1, %v1335_v60  ;;  %v6136_v32 = vadd.f32 %v2420_v39, %v1942_v11  ;;  %5139 = vmatmul.msk.bf16.gmra.mxu0 %vm371_vm1, %v2279_v49  ;;  %v2283_v59 = vrot.slane %v2281_v61, 1  ;;  %v2286_v18 = vrot.slane %v2284_v9, 2  ;;  %v1336_v11 = vrot.slane %v5561_v2, 1 }
  0xf4   : > { %5050 = vmatmul.msk.bf16.gmra.mxu3 %vm371_vm1, %v1772_v21  ;;  %v1773_v21 = vrot.slane %v5581_v51, 1  ;;  %v2293_v2 = vshll.u32 %v5598_v55, 16  ;;  %v5562_v51 = vld [vmem:[%s5856_s25 + $0x60] sm:$0xff] }
  0xf5   : > { %v2287_v38 = vor.u32 %v2286_v18, %v2283_v59  ;;  %v1337_v61 = vsel %vm1314_vm2, %v1334_v17, %v1336_v11  ;;  %v5544_v17 = vld [vmem:[%s5856_s25 + $0x60] sm:$0xff] }
  0xf6   : > { %v1423_v53 = vpop.f32.mrf.mxu2  ;;  %v866_v18 = vshll.u32 %v5544_v17, 16 }
  0xf7   : > { %v1510_v40 = vadd.f32 %v1423_v53, %v1076_v36  ;;  %v991_v1 = vpop.f32.mrf.mxu1  ;;  %v6143_v14 = vpop.f32.mrf.mxu3  ;;  %v2288_v57 = vsel %vm2181_vm4, %v2278_v22, %v2287_v38 }
  0xf8   : > { %v2425_v8 = vpop.f32.mrf.mxu0  ;;  %v1077_v49 = vadd.f32 %v991_v1, %v6016_v48  ;;  %v1774_v48 = vsel %vm1314_vm2, %v1771_v30, %v1773_v21  ;;  %v862_v30 = vshrl.u32 %v5543_v50, 16 }
  0xf9   : > { %v1943_v39 = vadd.f32 %v6098_v26, %v1510_v40  ;;  %v861_v26 = vsel %vm769_vm3, %v856_v35, %v860_v47 }
  0xfb   : > { %v6147_v60 = vadd.f32 %v2423_v63, %v1943_v39 }
  0xfe   : > { %v1425_v19 = vpop.f32.mrf.mxu2 }
  0xff   : > { %v1511_v36 = vadd.f32 %v1425_v19, %v1077_v49  ;;  %v994_v53 = vpop.f32.mrf.mxu1  ;;  %v6152_v9 = vpop.f32.mrf.mxu3 }
 0x100   : > { %v2428_v40 = vpop.f32.mrf.mxu0  ;;  %v1078_v46 = vadd.f32 %v994_v53, %v6027_v62  ;;  %v864_v62 = vor.u32 %v862_v30, %v860_v47  ;;  %v868_v53 = vrot.slane %v866_v18, 1  ;;  %v5599_v30 = vld [vmem:[%s5856_s25 + $0x70] sm:$0xff] }
 0x101   : > { %v1944_v63 = vadd.f32 %v6107_v4, %v1511_v36  ;;  %v2290_v4 = vshrl.u32 %v5598_v55, 16  ;;  %v2295_v36 = vrot.slane %v2293_v2, 2 }
 0x102   : > { %4867 = vmatmul.msk.bf16.gmra.mxu1 %vm371_vm1, %v861_v26  ;;  %v5582_v26 = vld [vmem:[%s5856_s25 + $0x78] sm:$0xff] }
 0x103   : > { %4958 = vmatmul.msk.bf16.gmra.mxu2 %vm371_vm1, %v1337_v61  ;;  %v6160_v1 = vadd.f32 %v2425_v8, %v1944_v63  ;;  %5140 = vmatmul.msk.bf16.gmra.mxu0 %vm371_vm1, %v2288_v57  ;;  %v2292_v19 = vrot.slane %v2290_v4, 1  ;;  %v1338_v63 = vrot.slane %v5562_v51, 1  ;;  %v2302_v51 = vshll.u32 %v5599_v30, 16 }
 0x104   : > { %5051 = vmatmul.msk.bf16.gmra.mxu3 %vm371_vm1, %v1774_v48  ;;  %v1775_v48 = vrot.slane %v5582_v26, 1  ;;  %v5563_v26 = vld [vmem:[%s5856_s25 + $0x68] sm:$0xff] }
 0x105   : > { %v2296_v55 = vor.u32 %v2295_v36, %v2292_v19  ;;  %v1339_v4 = vsel %vm1314_vm2, %v1336_v11, %v1338_v63  ;;  %v5545_v11 = vld [vmem:[%s5856_s25 + $0x68] sm:$0xff] }
 0x106   : > { %v1428_v22 = vpop.f32.mrf.mxu2  ;;  %v874_v36 = vshll.u32 %v5545_v11, 16 }
 0x107   : > { %v1512_v39 = vadd.f32 %v1428_v22, %v1078_v46  ;;  %v996_v59 = vpop.f32.mrf.mxu1  ;;  %v6167_v35 = vpop.f32.mrf.mxu3  ;;  %v2297_v47 = vsel %vm2181_vm4, %v2287_v38, %v2296_v55 }
 0x108   : > { %v2430_v49 = vpop.f32.mrf.mxu0  ;;  %v1079_v57 = vadd.f32 %v996_v59, %v6044_v13  ;;  %v1776_v13 = vsel %vm1314_vm2, %v1773_v21, %v1775_v48  ;;  %v870_v21 = vshrl.u32 %v5544_v17, 16 }
 0x109   : > { %v1945_v8 = vadd.f32 %v6119_v41, %v1512_v39  ;;  %v869_v41 = vsel %vm769_vm3, %v864_v62, %v868_v53 }
 0x10b   : > { %v6171_v61 = vadd.f32 %v2428_v40, %v1945_v8 }
 0x10e   : > { %v1430_v50 = vpop.f32.mrf.mxu2 }
 0x10f   : > { %v1513_v46 = vadd.f32 %v1430_v50, %v1079_v57  ;;  %v999_v22 = vpop.f32.mrf.mxu1  ;;  %v6176_v2 = vpop.f32.mrf.mxu3 }
 0x110   : > { %v2433_v39 = vpop.f32.mrf.mxu0  ;;  %v1080_v18 = vadd.f32 %v999_v22, %v6055_v33  ;;  %v872_v33 = vor.u32 %v870_v21, %v868_v53  ;;  %v876_v22 = vrot.slane %v874_v36, 1  ;;  %v5600_v21 = vld [vmem:[%s5856_s25 + $0x78] sm:$0xff] }
 0x111   : > { %v1946_v40 = vadd.f32 %v6128_v24, %v1513_v46  ;;  %v2299_v24 = vshrl.u32 %v5599_v30, 16  ;;  %v2304_v46 = vrot.slane %v2302_v51, 2 }
 0x112   : > { %4868 = vmatmul.msk.bf16.gmra.mxu1 %vm371_vm1, %v869_v41  ;;  %v5583_v41 = vld [vmem:[%s5856_s25 + $0x80] sm:$0xff] }
 0x113   : > { %4959 = vmatmul.msk.bf16.gmra.mxu2 %vm371_vm1, %v1339_v4  ;;  %v6184_v59 = vadd.f32 %v2430_v49, %v1946_v40  ;;  %5141 = vmatmul.msk.bf16.gmra.mxu0 %vm371_vm1, %v2297_v47  ;;  %v2301_v50 = vrot.slane %v2299_v24, 1  ;;  %v1340_v40 = vrot.slane %v5563_v26, 1  ;;  %v2311_v26 = vshll.u32 %v5600_v21, 16 }
 0x114   : > { %5052 = vmatmul.msk.bf16.gmra.mxu3 %vm371_vm1, %v1776_v13  ;;  %v1777_v13 = vrot.slane %v5583_v41, 1  ;;  %v5564_v41 = vld [vmem:[%s5856_s25 + $0x70] sm:$0xff] }
 0x115   : > { %v2305_v30 = vor.u32 %v2304_v46, %v2301_v50  ;;  %v1341_v24 = vsel %vm1314_vm2, %v1338_v63, %v1340_v40  ;;  %v5546_v63 = vld [vmem:[%s5856_s25 + $0x70] sm:$0xff] }
 0x116   : > { %v1433_v38 = vpop.f32.mrf.mxu2  ;;  %v882_v46 = vshll.u32 %v5546_v63, 16 }
 0x117   : > { %v1514_v8 = vadd.f32 %v1433_v38, %v1080_v18  ;;  %v1001_v19 = vpop.f32.mrf.mxu1  ;;  %v6191_v62 = vpop.f32.mrf.mxu3  ;;  %v2306_v53 = vsel %vm2181_vm4, %v2296_v55, %v2305_v30 }
 0x118   : > { %v2435_v57 = vpop.f32.mrf.mxu0  ;;  %v1081_v47 = vadd.f32 %v1001_v19, %v6072_v52  ;;  %v1778_v52 = vsel %vm1314_vm2, %v1775_v48, %v1777_v13  ;;  %v878_v48 = vshrl.u32 %v5545_v11, 16 }
 0x119   : > { %v1947_v49 = vadd.f32 %v6143_v14, %v1514_v8  ;;  %v877_v14 = vsel %vm769_vm3, %v872_v33, %v876_v22 }
 0x11b   : > { %v6195_v4 = vadd.f32 %v2433_v39, %v1947_v49 }
 0x11e   : > { %v1435_v17 = vpop.f32.mrf.mxu2 }
 0x11f   : > { %v1515_v18 = vadd.f32 %v1435_v17, %v1081_v47  ;;  %v1004_v38 = vpop.f32.mrf.mxu1  ;;  %v6200_v51 = vpop.f32.mrf.mxu3 }
 0x120   : > { %v2438_v8 = vpop.f32.mrf.mxu0  ;;  %v1082_v36 = vadd.f32 %v1004_v38, %v6083_v10  ;;  %v880_v10 = vor.u32 %v878_v48, %v876_v22  ;;  %v884_v38 = vrot.slane %v882_v46, 1  ;;  %v5601_v48 = vld [vmem:[%s5856_s25 + $0x80] sm:$0xff] }
 0x121   : > { %v1948_v39 = vadd.f32 %v6152_v9, %v1515_v18  ;;  %v2308_v9 = vshrl.u32 %v5600_v21, 16  ;;  %v2313_v18 = vrot.slane %v2311_v26, 2 }
 0x122   : > { %4869 = vmatmul.msk.bf16.gmra.mxu1 %vm371_vm1, %v877_v14  ;;  %v5584_v14 = vld [vmem:[%s5856_s25 + $0x88] sm:$0xff] }
 0x123   : > { %4960 = vmatmul.msk.bf16.gmra.mxu2 %vm371_vm1, %v1341_v24  ;;  %v6208_v19 = vadd.f32 %v2435_v57, %v1948_v39  ;;  %5142 = vmatmul.msk.bf16.gmra.mxu0 %vm371_vm1, %v2306_v53  ;;  %v2310_v17 = vrot.slane %v2308_v9, 1  ;;  %v1342_v39 = vrot.slane %v5564_v41, 1  ;;  %v2320_v41 = vshll.u32 %v5601_v48, 16 }
 0x124   : > { %5053 = vmatmul.msk.bf16.gmra.mxu3 %vm371_vm1, %v1778_v52  ;;  %v1779_v52 = vrot.slane %v5584_v14, 1  ;;  %v5565_v14 = vld [vmem:[%s5856_s25 + $0x78] sm:$0xff] }
 0x125   : > { %v2314_v21 = vor.u32 %v2313_v18, %v2310_v17  ;;  %v1343_v9 = vsel %vm1314_vm2, %v1340_v40, %v1342_v39  ;;  %v5547_v40 = vld [vmem:[%s5856_s25 + $0x78] sm:$0xff] }
 0x126   : > { %v1438_v55 = vpop.f32.mrf.mxu2  ;;  %v890_v18 = vshll.u32 %v5547_v40, 16 }
 0x127   : > { %v1516_v49 = vadd.f32 %v1438_v55, %v1082_v36  ;;  %v1006_v50 = vpop.f32.mrf.mxu1  ;;  %v6215_v33 = vpop.f32.mrf.mxu3  ;;  %v2315_v22 = vsel %vm2181_vm4, %v2305_v30, %v2314_v21 }
 0x128   : > { %v2440_v47 = vpop.f32.mrf.mxu0  ;;  %v1083_v53 = vadd.f32 %v1006_v50, %v6100_v37  ;;  %v1780_v37 = vsel %vm1314_vm2, %v1777_v13, %v1779_v52  ;;  %v886_v13 = vshrl.u32 %v5546_v63, 16 }
 0x129   : > { %v1949_v57 = vadd.f32 %v6167_v35, %v1516_v49  ;;  %v885_v35 = vsel %vm769_vm3, %v880_v10, %v884_v38 }
 0x12b   : > { %v6219_v24 = vadd.f32 %v2438_v8, %v1949_v57 }
 0x12e   : > { %v1440_v11 = vpop.f32.mrf.mxu2 }
 0x12f   : > { %v1517_v36 = vadd.f32 %v1440_v11, %v1083_v53  ;;  %v1009_v55 = vpop.f32.mrf.mxu1  ;;  %v6224_v26 = vpop.f32.mrf.mxu3 }
 0x130   : > { %v2443_v49 = vpop.f32.mrf.mxu0  ;;  %v1084_v46 = vadd.f32 %v1009_v55, %v5967_v5  ;;  %v888_v5 = vor.u32 %v886_v13, %v884_v38  ;;  %v892_v55 = vrot.slane %v890_v18, 1  ;;  %v5602_v13 = vld [vmem:[%s5856_s25 + $0x88] sm:$0xff] }
 0x131   : > { %v1950_v8 = vadd.f32 %v6176_v2, %v1517_v36  ;;  %v2317_v2 = vshrl.u32 %v5601_v48, 16  ;;  %v2322_v36 = vrot.slane %v2320_v41, 2 }
 0x132   : > { %4870 = vmatmul.msk.bf16.gmra.mxu1 %vm371_vm1, %v885_v35  ;;  %v5585_v35 = vld [vmem:[%s5856_s25 + $0x90] sm:$0xff] }
 0x133   : > { %4961 = vmatmul.msk.bf16.gmra.mxu2 %vm371_vm1, %v1343_v9  ;;  %v6232_v50 = vadd.f32 %v2440_v47, %v1950_v8  ;;  %5143 = vmatmul.msk.bf16.gmra.mxu0 %vm371_vm1, %v2315_v22  ;;  %v2319_v11 = vrot.slane %v2317_v2, 1  ;;  %v1344_v8 = vrot.slane %v5565_v14, 1  ;;  %v2329_v14 = vshll.u32 %v5602_v13, 16 }
 0x134   : > { %5054 = vmatmul.msk.bf16.gmra.mxu3 %vm371_vm1, %v1780_v37  ;;  %v1781_v37 = vrot.slane %v5585_v35, 1  ;;  %v894_v35 = vshrl.u32 %v5547_v40, 16 }
 0x135   : > { %6900 = vst [vmem:[#allocation7_spill] sm:$0xff] %v6232_v50  ;;  %v2323_v48 = vor.u32 %v2322_v36, %v2319_v11  ;;  %v1345_v2 = vsel %vm1314_vm2, %v1342_v39, %v1344_v8  ;;  %v6260_v39 = vld [vmem:[%s5856_s25 + $0x80] sm:$0xff] }
 0x136   : > { %v1443_v30 = vpop.f32.mrf.mxu2 }
 0x137   : > { %v1518_v57 = vadd.f32 %v1443_v30, %v1084_v46  ;;  %v1011_v17 = vpop.f32.mrf.mxu1  ;;  %v6239_v10 = vpop.f32.mrf.mxu3 }
 0x138   : > { %v2445_v53 = vpop.f32.mrf.mxu0  ;;  %v1085_v22 = vadd.f32 %v1011_v17, %v5983_v16  ;;  %v1782_v16 = vsel %vm1314_vm2, %v1779_v52, %v1781_v37 }
 0x139   : > { %v1951_v47 = vadd.f32 %v6191_v62, %v1518_v57  ;;  %v893_v62 = vsel %vm769_vm3, %v888_v5, %v892_v55  ;;  %v2324_v57 = vsel %vm2181_vm4, %v2314_v21, %v2323_v48  ;;  %v1652_v21 = vld [vmem:[%s5856_s25 + $0x98] sm:$0x1]  ;;  %v898_v5 = vshll.u32 %v6260_v39, 16 }
 0x13a   : > { %v1728_v52 = vunpack.c.l.b16 %v1652_v21 }
 0x13b   : > { %v6243_v9 = vadd.f32 %v2443_v49, %v1951_v47 }
 0x13d   : > { %6901 = vst [vmem:[#allocation8_spill] sm:$0xff] %v6243_v9  ;;  %v673_v9 = vld [vmem:[%s5856_s25 + $0x90] sm:$0x1] }
 0x13e   : > { %v1445_v63 = vpop.f32.mrf.mxu2 }
 0x13f   : > { %v1519_v46 = vadd.f32 %v1445_v63, %v1085_v22  ;;  %v1014_v30 = vpop.f32.mrf.mxu1  ;;  %v6248_v41 = vpop.f32.mrf.mxu3 }
 0x140   : > { %v2448_v38 = vpop.f32.mrf.mxu0  ;;  %v1086_v18 = vadd.f32 %v1014_v30, %v5993_v31  ;;  %v2331_v30 = vrot.slane %v2329_v14, 2 }
 0x141   : > { %v1952_v49 = vadd.f32 %v6200_v51, %v1519_v46  ;;  %v2326_v51 = vshrl.u32 %v5602_v13, 16 }
 0x142   : > { %4871 = vmatmul.msk.bf16.gmra.mxu1 %vm371_vm1, %v893_v62  ;;  %v1747_v62 = vpack.c.b16 %v1728_v52, %v1728_v52 }
 0x143   : > { %4962 = vmatmul.msk.bf16.gmra.mxu2 %vm371_vm1, %v1345_v2  ;;  %v6256_v17 = vadd.f32 %v2445_v53, %v1952_v49  ;;  %5144 = vmatmul.msk.bf16.gmra.mxu0 %vm371_vm1, %v2324_v57  ;;  %v6267_v53 = vld [vmem:[%s5856_s25 + $0x80] sm:$0xff]  ;;  %v2328_v31 = vrot.slane %v2326_v51, 1  ;;  %v896_v49 = vor.u32 %v894_v35, %v892_v55  ;;  %v900_v57 = vrot.slane %v898_v5, 1  ;;  %v5333_v35 = vld [vmem:[%s5856_s25 + $0x10] sm:$0xc] }
 0x144   : > { %5055 = vmatmul.msk.bf16.gmra.mxu3 %vm371_vm1, %v1782_v16  ;;  %v6895_v13 = vrot.slane %v6267_v53, 1  ;;  %v1783_v21 = vrot.slane %v1747_v62, 1  ;;  %v5640_v5 = vld [vmem:[%s5856_s25 + $0x10] sm:$0xf0] }
 0x145   : > { %6902 = vst [vmem:[#allocation9_spill] sm:$0xff] %v6256_v17  ;;  %v6276_v16 = vor.u32 %v2331_v30, %v2328_v31  ;;  %v5334_v31 = vor.u32 %v5640_v5, %v5333_v35  ;;  %v2085_v35 = vld [vmem:[%s5856_s25 + $0x98] sm:$0x3] }
 0x146   : > { %v1448_v47 = vpop.f32.mrf.mxu2  ;;  %v1347_v55 = vsel %vm1314_vm2, %v1344_v8, %v6895_v13  ;;  %v6297_v8 = vld [vmem:[%s5856_s25 + $0x88] sm:$0xff] }
 0x147   : > { %v1520_v11 = vadd.f32 %v1448_v47, %v1086_v18  ;;  %v1016_v36 = vpop.f32.mrf.mxu1  ;;  %v6269_v22 = vpop.f32.mrf.mxu3  ;;  %v2333_v52 = vsel %vm2181_vm4, %v2323_v48, %v6276_v16 }
 0x148   : > { %v2450_v46 = vpop.f32.mrf.mxu0  ;;  %v1087_v40 = vadd.f32 %v1016_v36, %v6011_v43  ;;  %v1784_v36 = vsel %vm1314_vm2, %v1781_v37, %v1783_v21 }
 0x149   : > { %v1953_v63 = vadd.f32 %v6215_v33, %v1520_v11  ;;  %v5603_v11 = vld [vmem:[%s5856_s25 + $0x90] sm:$0xff] }
 0x14a   : > { %v2335_v30 = vshrl.u32 %v5603_v11, 16  ;;  %v2338_v62 = vshll.u32 %v5603_v11, 16 }
 0x14b   : > { %v6272_v2 = vadd.f32 %v2448_v38, %v1953_v63  ;;  %v901_v38 = vsel %vm769_vm3, %v896_v49, %v900_v57  ;;  %v3617_v49 = vshrl.u32 %v5334_v31, 16 }
 0x14c   : > { %v2337_v11 = vrot.slane %v2335_v30, 1 }
 0x14d   : > { %6903 = vst [vmem:[#allocation10_spill] sm:$0xff] %v6272_v2  ;;  %v3619_v5 = vrot.slane %v3617_v49, 2 }
 0x14e   : > { %v1450_v18 = vpop.f32.mrf.mxu2 }
 0x14f   : > { %v1521_v33 = vadd.f32 %v1450_v18, %v1087_v40  ;;  %v1019_v51 = vpop.f32.mrf.mxu1  ;;  %v6282_v14 = vpop.f32.mrf.mxu3  ;;  %v3620_v40 = vshll.u32 %v5334_v31, 16 }
 0x150   : > { %v2453_v47 = vpop.f32.mrf.mxu0  ;;  %v1088_v48 = vadd.f32 %v1019_v51, %v6021_v58 }
 0x151   : > { %v1954_v43 = vadd.f32 %v6224_v26, %v1521_v33  ;;  %v5641_v26 = vld [vmem:[%s5856_s25 + $0x18] sm:$0xff]  ;;  %v3622_v31 = vrot.slane %v3620_v40, 3 }
 0x152   : > { %4872 = vmatmul.msk.bf16.gmra.mxu1 %vm371_vm1, %v901_v38  ;;  %v3625_v18 = vshrl.u32 %v5641_v26, 16  ;;  %v902_v38 = vshrl.u32 %v6260_v39, 16 }
 0x153   : > { %4963 = vmatmul.msk.bf16.gmra.mxu2 %vm371_vm1, %v1347_v55  ;;  %v6293_v63 = vadd.f32 %v2450_v46, %v1954_v43  ;;  %5145 = vmatmul.msk.bf16.gmra.mxu0 %vm371_vm1, %v2333_v52  ;;  %v3628_v46 = vshll.u32 %v5641_v26, 16  ;;  %v906_v55 = vshll.u32 %v6297_v8, 16  ;;  %v6305_v43 = vld [vmem:[%s5856_s25 + $0x88] sm:$0xff]  ;;  %v3623_v30 = vor.u32 %v3622_v31, %v3619_v5 }
 0x154   : > { %5056 = vmatmul.msk.bf16.gmra.mxu3 %vm371_vm1, %v1784_v36  ;;  %v2340_v36 = vrot.slane %v2338_v62, 2  ;;  %v3627_v26 = vrot.slane %v3625_v18, 2  ;;  %v904_v39 = vor.u32 %v902_v38, %v900_v57  ;;  %v749_v18 = vunpack.c.l.b16 %v673_v9 }
 0x155   : > { %6904 = vst [vmem:[#allocation11_spill] sm:$0xff] %v6293_v63  ;;  %v908_v13 = vrot.slane %v906_v55, 1  ;;  %v1348_v63 = vrot.slane %v6305_v43, 1  ;;  %v1218_v55 = vld [vmem:[%s5856_s25 + $0x90] sm:$0x1] }
 0x156   : > { %v1453_v37 = vpop.f32.mrf.mxu2  ;;  %v2341_v17 = vor.u32 %v2340_v36, %v2337_v11  ;;  %v768_v9 = vpack.c.b16 %v749_v18, %v749_v18  ;;  %v5642_v11 = vld [vmem:[%s5856_s25 + $0x20] sm:$0xff] }
 0x157   : > { %v1522_v21 = vadd.f32 %v1453_v37, %v1088_v48  ;;  %v1021_v33 = vpop.f32.mrf.mxu1  ;;  %v6307_v52 = vpop.f32.mrf.mxu3  ;;  %v3630_v48 = vrot.slane %v3628_v46, 3  ;;  %v909_v40 = vsel %vm769_vm3, %v904_v39, %v908_v13  ;;  %v3637_v5 = vshll.u32 %v5642_v11, 16 }
 0x158   : > { %v2455_v51 = vpop.f32.mrf.mxu0  ;;  %v1089_v2 = vadd.f32 %v1021_v33, %v6039_v7  ;;  %v2342_v38 = vsel %vm2181_vm4, %v6276_v16, %v2341_v17 }
 0x159   : > { %v1955_v58 = vadd.f32 %v6239_v10, %v1522_v21  ;;  %v2161_v10 = vunpack.c.l.b16 %v2085_v35  ;;  %v3631_v62 = vor.u32 %v3630_v48, %v3627_v26  ;;  %v3634_v35 = vshrl.u32 %v5642_v11, 16 }
 0x15a   : > { %v910_v48 = vshrl.u32 %v6297_v8, 16 }
 0x15b   : > { %v6311_v37 = vadd.f32 %v2453_v47, %v1955_v58  ;;  %v6905_v47 = vrot.slane %v6267_v53, 1  ;;  %v3632_v43 = vsel %vm3615_vm5, %v3623_v30, %v3631_v62  ;;  %v1294_v58 = vunpack.c.l.b16 %v1218_v55 }
 0x15c   : > { %v912_v18 = vor.u32 %v910_v48, %v908_v13 }
 0x15d   : > { %v1349_v57 = vsel %vm1314_vm2, %v6905_v47, %v1348_v63  ;;  %v1313_v39 = vpack.c.b16 %v1294_v58, %v1294_v58  ;;  %v3639_v47 = vrot.slane %v3637_v5, 3  ;;  %v5242_v5 = vld [vmem:[%s5856_s25 + $0x10] sm:$0xc] }
 0x15e   : > { %v1455_v21 = vpop.f32.mrf.mxu2 }
 0x15f   : > { %v1523_v50 = vadd.f32 %v1455_v21, %v1089_v2  ;;  %v1024_v49 = vpop.f32.mrf.mxu1  ;;  %v6320_v46 = vpop.f32.mrf.mxu3  ;;  %v2180_v2 = vpack.c.b16 %v2161_v10, %v2161_v10 }
 0x160   : > { %v2458_v33 = vpop.f32.mrf.mxu0 }
 0x161   : > { %v1956_v7 = vadd.f32 %v6248_v41, %v1523_v50  ;;  %v1090_v50 = vadd.f32 %v1024_v49, %v6049_v27  ;;  %v2344_v41 = vshrl.u32 %v2180_v2, 16  ;;  %v2347_v36 = vshll.u32 %v2180_v2, 16 }
 0x162   : > { %4873 = vmatmul.msk.bf16.gmra.mxu1 %vm371_vm1, %v909_v40  ;;  %v3636_v49 = vrot.slane %v3634_v35, 2  ;;  %v5604_v35 = vld [vmem:[%s5856_s25 + $0x8] sm:$0xf0] }
 0x163   : > { %4964 = vmatmul.msk.bf16.gmra.mxu2 %vm371_vm1, %v1349_v57  ;;  %v6329_v53 = vadd.f32 %v2455_v51, %v1956_v7  ;;  %5146 = vmatmul.msk.bf16.gmra.mxu0 %vm371_vm1, %v2342_v38  ;;  %v914_v51 = vshll.u32 %v768_v9, 16  ;;  %v2346_v40 = vrot.slane %v2344_v41, 1  ;;  %v2349_v27 = vrot.slane %v2347_v36, 2 }
 0x164   : > { %5403 = vmatmul.msk.bf16.vlgmr.msra.gmra.mxu3 %vm371_vm1, %v3632_v43  ;;  %v1350_v38 = vrot.slane %v1313_v39, 1  ;;  %v3640_v43 = vor.u32 %v3639_v47, %v3636_v49 }
 0x165   : > { %v916_v7 = vrot.slane %v914_v51, 1  ;;  %v2350_v2 = vor.u32 %v2349_v27, %v2346_v40  ;;  %v5623_v27 = vld [vmem:[%s5856_s25 + $0x18] sm:$0xff] }
 0x166   : > { %v1458_v16 = vpop.f32.mrf.mxu2  ;;  %v3641_v41 = vsel %vm3615_vm5, %v3631_v62, %v3640_v43  ;;  %v5424_v62 = vld [vmem:[%s5856_s25 + $0x10] sm:$0x8] }
 0x167   : > { %v1524_v31 = vadd.f32 %v1458_v16, %v1090_v50  ;;  %v1026_v26 = vpop.f32.mrf.mxu1  ;;  %v6336_v10 = vpop.f32.mrf.mxu3  ;;  %v917_v58 = vsel %vm769_vm3, %v912_v18, %v916_v7  ;;  %v2351_v50 = vsel %vm2181_vm4, %v2341_v17, %v2350_v2  ;;  %v5643_v16 = vld [vmem:[%s5856_s25 + $0x28] sm:$0xff]  ;;  %v5659_v7 = vld [vmem:[%s5856_s25 + $0x18] sm:$0xff] }
 0x168   : > { %v2460_v30 = vpop.f32.mrf.mxu0  ;;  %v1091_v55 = vadd.f32 %v1026_v26, %v6067_v45  ;;  %v5658_v26 = vld [vmem:[%s5856_s25 + $0x10] sm:$0xf0]  ;;  %v3643_v48 = vshrl.u32 %v5643_v16, 16  ;;  %v3646_v51 = vshll.u32 %v5643_v16, 16 }
 0x169   : > { %v1957_v21 = vadd.f32 %v6269_v22, %v1524_v31  ;;  %v5622_v31 = vld [vmem:[%s5856_s25 + $0x10] sm:$0xf0] }
 0x16a   : > { %v5243_v49 = vor.u32 %v5622_v31, %v5242_v5  ;;  %v3648_v2 = vrot.slane %v3646_v51, 3 }
 0x16b   : > { %v6339_v57 = vadd.f32 %v2458_v33, %v1957_v21  ;;  %v1351_v33 = vsel %vm1314_vm2, %v1348_v63, %v1350_v38  ;;  %v5151_v63 = vld [vmem:[%s5856_s25 + $0x8] sm:$0xc]  ;;  %v5425_v38 = vor.u32 %v5658_v26, %v5424_v62 }
 0x16c   : > { %v5152_v40 = vor.u32 %v5604_v35, %v5151_v63 }
 0x16e   : > { %v1460_v8 = vpop.f32.mrf.mxu2 }
 0x16f   : > { %v1525_v9 = vadd.f32 %v1460_v8, %v1091_v55  ;;  %v1029_v22 = vpop.f32.mrf.mxu1  ;;  %v6344_v11 = vpop.f32.mrf.mxu3  ;;  %v3645_v55 = vrot.slane %v3643_v48, 2  ;;  %v5644_v48 = vld [vmem:[%s5856_s25 + $0x30] sm:$0xff] }
 0x170   : > { %v2463_v45 = vpop.f32.mrf.mxu0 }
 0x171   : > { %v1958_v13 = vadd.f32 %v6282_v14, %v1525_v9  ;;  %v1092_v14 = vadd.f32 %v1029_v22, %v6077_v3  ;;  %v2749_v9 = vrot.slane %v5152_v40, 2 }
 0x172   : > { %4874 = vmatmul.msk.bf16.gmra.mxu1 %vm371_vm1, %v917_v58  ;;  %v3182_v58 = vrot.slane %v5243_v49, 2 }
 0x173   : > { %4965 = vmatmul.msk.bf16.gmra.mxu2 %vm371_vm1, %v1351_v33  ;;  %v6351_v36 = vadd.f32 %v2460_v30, %v1958_v13  ;;  %5147 = vmatmul.msk.bf16.gmra.mxu0 %vm371_vm1, %v2351_v50  ;;  %v6364_v30 = vld [vmem:[%s5856_s25 + $0x10] sm:$0xff]  ;;  %v3183_v33 = vrot.slane %v5623_v27, 2  ;;  %v4183_v50 = vrot.slane %v5425_v38, 3  ;;  %v5624_v27 = vld [vmem:[%s5856_s25 + $0x20] sm:$0xff] }
 0x174   : > { %5404 = vmatmul.msk.bf16.gmra.mxu3 %vm371_vm1, %v3641_v41  ;;  %v2750_v22 = vrot.slane %v6364_v30, 2  ;;  %v4184_v41 = vrot.slane %v5659_v7, 3  ;;  %v5660_v7 = vld [vmem:[%s5856_s25 + $0x20] sm:$0xff] }
 0x176   : > { %v1463_v17 = vpop.f32.mrf.mxu2  ;;  %v2751_v35 = vsel %vm2748_vm6, %v2749_v9, %v2750_v22  ;;  %v3185_v9 = vrot.slane %v5624_v27, 2 }
 0x177   : > { %v1526_v39 = vadd.f32 %v1463_v17, %v1092_v14  ;;  %v1031_v21 = vpop.f32.mrf.mxu1  ;;  %v6367_v47 = vpop.f32.mrf.mxu3 }
 0x178   : > { %v2465_v18 = vpop.f32.mrf.mxu0  ;;  %v1093_v13 = vadd.f32 %v1031_v21, %v6095_v28  ;;  %v4185_v28 = vsel %vm4182_vm7, %v4183_v50, %v4184_v41  ;;  %v3655_v21 = vshll.u32 %v5644_v48, 16 }
 0x179   : > { %v1959_v3 = vadd.f32 %v6307_v52, %v1526_v39  ;;  %v3649_v52 = vor.u32 %v3648_v2, %v3645_v55  ;;  %v3652_v39 = vshrl.u32 %v5644_v48, 16 }
 0x17a   : > { %v3657_v55 = vrot.slane %v3655_v21, 3 }
 0x17b   : > { %v6371_v8 = vadd.f32 %v2463_v45, %v1959_v3  ;;  %v3184_v45 = vsel %vm2748_vm6, %v3182_v58, %v3183_v33  ;;  %v3650_v62 = vsel %vm3615_vm5, %v3640_v43, %v3649_v52  ;;  %v5606_v43 = vld [vmem:[%s5856_s25 + $0x18] sm:$0xff]  ;;  %v3654_v38 = vrot.slane %v3652_v39, 2  ;;  %v5625_v39 = vld [vmem:[%s5856_s25 + $0x28] sm:$0xff] }
 0x17e   : > { %v1465_v63 = vpop.f32.mrf.mxu2 }
 0x17f   : > { %v1527_v16 = vadd.f32 %v1465_v63, %v1093_v13  ;;  %v1034_v14 = vpop.f32.mrf.mxu1  ;;  %v6377_v5 = vpop.f32.mrf.mxu3  ;;  %v4186_v13 = vrot.slane %v5660_v7, 3  ;;  %v3658_v63 = vor.u32 %v3657_v55, %v3654_v38  ;;  %v3187_v7 = vrot.slane %v5625_v39, 2 }
 0x180   : > { %v2468_v17 = vpop.f32.mrf.mxu0  ;;  %v1094_v51 = vadd.f32 %v1034_v14, %v5981_v15  ;;  %v2752_v15 = vrot.slane %v5606_v43, 2  ;;  %v5661_v43 = vld [vmem:[%s5856_s25 + $0x28] sm:$0xff] }
 0x181   : > { %v1960_v31 = vadd.f32 %v6320_v46, %v1527_v16  ;;  %v4188_v55 = vrot.slane %v5661_v43, 3 }
 0x182   : > { %5221 = vmatmul.msk.bf16.vlgmr.msra.gmra.mxu1 %vm371_vm1, %v2751_v35  ;;  %v2753_v35 = vsel %vm2748_vm6, %v2750_v22, %v2752_v15  ;;  %v5645_v22 = vld [vmem:[%s5856_s25 + $0x38] sm:$0xff] }
 0x183   : > { %5312 = vmatmul.msk.bf16.vlgmr.msra.gmra.mxu2 %vm371_vm1, %v3184_v45  ;;  %v6384_v26 = vadd.f32 %v2465_v18, %v1960_v31  ;;  %5494 = vmatmul.msk.bf16.vlgmr.msra.gmra.mxu0 %vm371_vm1, %v4185_v28  ;;  %v4187_v28 = vsel %vm4182_vm7, %v4184_v41, %v4186_v13  ;;  %v3661_v48 = vshrl.u32 %v5645_v22, 16 }
 0x184   : > { %5405 = vmatmul.msk.bf16.gmra.mxu3 %vm371_vm1, %v3650_v62 }
 0x185   : > { %v3663_v27 = vrot.slane %v3661_v48, 2  ;;  %v5626_v48 = vld [vmem:[%s5856_s25 + $0x30] sm:$0xff] }
 0x186   : > { %v1468_v46 = vpop.f32.mrf.mxu2  ;;  %v3189_v43 = vrot.slane %v5626_v48, 2 }
 0x187   : > { %v1528_v30 = vadd.f32 %v1468_v46, %v1094_v51  ;;  %v1036_v40 = vpop.f32.mrf.mxu1  ;;  %v6392_v49 = vpop.f32.mrf.mxu3  ;;  %v3664_v51 = vshll.u32 %v5645_v22, 16 }
 0x188   : > { %v2470_v18 = vpop.f32.mrf.mxu0  ;;  %v1095_v58 = vadd.f32 %v1036_v40, %v5991_v29  ;;  %v3659_v29 = vsel %vm3615_vm5, %v3649_v52, %v3658_v63  ;;  %v5607_v52 = vld [vmem:[%s5856_s25 + $0x20] sm:$0xff] }
 0x189   : > { %v1961_v3 = vadd.f32 %v6336_v10, %v1528_v30  ;;  %v3186_v10 = vsel %vm2748_vm6, %v3183_v33, %v3185_v9 }
 0x18b   : > { %v6396_v2 = vadd.f32 %v2468_v17, %v1961_v3  ;;  %v3666_v3 = vrot.slane %v3664_v51, 3 }
 0x18e   : > { %v1470_v50 = vpop.f32.mrf.mxu2 }
 0x18f   : > { %v1529_v16 = vadd.f32 %v1470_v50, %v1095_v58  ;;  %v1039_v14 = vpop.f32.mrf.mxu1  ;;  %v6401_v45 = vpop.f32.mrf.mxu3  ;;  %v3667_v50 = vor.u32 %v3666_v3, %v3663_v27 }
 0x190   : > { %v2473_v17 = vpop.f32.mrf.mxu0  ;;  %v1096_v33 = vadd.f32 %v1039_v14, %v6009_v42  ;;  %v2754_v42 = vrot.slane %v5607_v52, 2  ;;  %v5662_v52 = vld [vmem:[%s5856_s25 + $0x30] sm:$0xff] }
 0x191   : > { %v1962_v31 = vadd.f32 %v6344_v11, %v1529_v16  ;;  %v4190_v3 = vrot.slane %v5662_v52, 3 }
 0x192   : > { %5222 = vmatmul.msk.bf16.gmra.mxu1 %vm371_vm1, %v2753_v35  ;;  %v2755_v35 = vsel %vm2748_vm6, %v2752_v15, %v2754_v42  ;;  %v5646_v15 = vld [vmem:[%s5856_s25 + $0x40] sm:$0xff] }
 0x193   : > { %5313 = vmatmul.msk.bf16.gmra.mxu2 %vm371_vm1, %v3186_v10  ;;  %v6408_v62 = vadd.f32 %v2470_v18, %v1962_v31  ;;  %5495 = vmatmul.msk.bf16.gmra.mxu0 %vm371_vm1, %v4187_v28  ;;  %v4189_v28 = vsel %vm4182_vm7, %v4186_v13, %v4188_v55  ;;  %v3670_v22 = vshrl.u32 %v5646_v15, 16 }
 0x194   : > { %5406 = vmatmul.msk.bf16.gmra.mxu3 %vm371_vm1, %v3659_v29 }
 0x195   : > { %v3672_v39 = vrot.slane %v3670_v22, 2  ;;  %v5627_v22 = vld [vmem:[%s5856_s25 + $0x38] sm:$0xff] }
 0x196   : > { %v1473_v11 = vpop.f32.mrf.mxu2  ;;  %v3191_v52 = vrot.slane %v5627_v22, 2 }
 0x197   : > { %v1530_v41 = vadd.f32 %v1473_v11, %v1096_v33  ;;  %v1041_v46 = vpop.f32.mrf.mxu1  ;;  %v6416_v21 = vpop.f32.mrf.mxu3  ;;  %v3673_v33 = vshll.u32 %v5646_v15, 16 }
 0x198   : > { %v2475_v40 = vpop.f32.mrf.mxu0  ;;  %v1097_v38 = vadd.f32 %v1041_v46, %v6019_v56  ;;  %v3668_v56 = vsel %vm3615_vm5, %v3658_v63, %v3667_v50  ;;  %v5608_v63 = vld [vmem:[%s5856_s25 + $0x28] sm:$0xff] }
 0x199   : > { %v1963_v30 = vadd.f32 %v6367_v47, %v1530_v41  ;;  %v3188_v47 = vsel %vm2748_vm6, %v3185_v9, %v3187_v7 }
 0x19b   : > { %v6420_v18 = vadd.f32 %v2473_v17, %v1963_v30  ;;  %v3675_v30 = vrot.slane %v3673_v33, 3 }
 0x19e   : > { %v1475_v58 = vpop.f32.mrf.mxu2 }
 0x19f   : > { %v1531_v16 = vadd.f32 %v1475_v58, %v1097_v38  ;;  %v1044_v14 = vpop.f32.mrf.mxu1  ;;  %v6425_v10 = vpop.f32.mrf.mxu3  ;;  %v3676_v58 = vor.u32 %v3675_v30, %v3672_v39 }
 0x1a0   : > { %v2478_v17 = vpop.f32.mrf.mxu0  ;;  %v1098_v9 = vadd.f32 %v1044_v14, %v6037_v6  ;;  %v2756_v6 = vrot.slane %v5608_v63, 2  ;;  %v5663_v63 = vld [vmem:[%s5856_s25 + $0x38] sm:$0xff] }
 0x1a1   : > { %v1964_v31 = vadd.f32 %v6377_v5, %v1531_v16  ;;  %v4192_v30 = vrot.slane %v5663_v63, 3 }
 0x1a2   : > { %5223 = vmatmul.msk.bf16.gmra.mxu1 %vm371_vm1, %v2755_v35  ;;  %v2757_v35 = vsel %vm2748_vm6, %v2754_v42, %v2756_v6  ;;  %v5647_v42 = vld [vmem:[%s5856_s25 + $0x48] sm:$0xff] }
 0x1a3   : > { %5314 = vmatmul.msk.bf16.gmra.mxu2 %vm371_vm1, %v3188_v47  ;;  %v6432_v29 = vadd.f32 %v2475_v40, %v1964_v31  ;;  %5496 = vmatmul.msk.bf16.gmra.mxu0 %vm371_vm1, %v4189_v28  ;;  %v4191_v28 = vsel %vm4182_vm7, %v4188_v55, %v4190_v3  ;;  %v3679_v15 = vshrl.u32 %v5647_v42, 16 }
 0x1a4   : > { %5407 = vmatmul.msk.bf16.gmra.mxu3 %vm371_vm1, %v3668_v56 }
 0x1a5   : > { %v3681_v48 = vrot.slane %v3679_v15, 2  ;;  %v5628_v15 = vld [vmem:[%s5856_s25 + $0x40] sm:$0xff] }
 0x1a6   : > { %v1478_v5 = vpop.f32.mrf.mxu2  ;;  %v3193_v63 = vrot.slane %v5628_v15, 2 }
 0x1a7   : > { %v1532_v13 = vadd.f32 %v1478_v5, %v1098_v9  ;;  %v1046_v11 = vpop.f32.mrf.mxu1  ;;  %v6440_v51 = vpop.f32.mrf.mxu3  ;;  %v3682_v9 = vshll.u32 %v5647_v42, 16 }
 0x1a8   : > { %v2480_v46 = vpop.f32.mrf.mxu0  ;;  %v1099_v27 = vadd.f32 %v1046_v11, %v6047_v25  ;;  %v3677_v25 = vsel %vm3615_vm5, %v3667_v50, %v3676_v58  ;;  %v5609_v50 = vld [vmem:[%s5856_s25 + $0x30] sm:$0xff] }
 0x1a9   : > { %v1965_v41 = vadd.f32 %v6392_v49, %v1532_v13  ;;  %v3190_v49 = vsel %vm2748_vm6, %v3187_v7, %v3189_v43 }
 0x1ab   : > { %v6444_v40 = vadd.f32 %v2478_v17, %v1965_v41  ;;  %v3684_v41 = vrot.slane %v3682_v9, 3 }
 0x1ae   : > { %v1480_v38 = vpop.f32.mrf.mxu2 }
 0x1af   : > { %v1533_v16 = vadd.f32 %v1480_v38, %v1099_v27  ;;  %v1049_v14 = vpop.f32.mrf.mxu1  ;;  %v6449_v47 = vpop.f32.mrf.mxu3  ;;  %v3685_v38 = vor.u32 %v3684_v41, %v3681_v48 }
 0x1b0   : > { %v2483_v17 = vpop.f32.mrf.mxu0  ;;  %v1100_v7 = vadd.f32 %v1049_v14, %v6065_v44  ;;  %v2758_v44 = vrot.slane %v5609_v50, 2  ;;  %v5664_v50 = vld [vmem:[%s5856_s25 + $0x40] sm:$0xff] }
 0x1b1   : > { %v1966_v31 = vadd.f32 %v6401_v45, %v1533_v16  ;;  %v4194_v41 = vrot.slane %v5664_v50, 3 }
 0x1b2   : > { %5224 = vmatmul.msk.bf16.gmra.mxu1 %vm371_vm1, %v2757_v35  ;;  %v2759_v35 = vsel %vm2748_vm6, %v2756_v6, %v2758_v44  ;;  %v5648_v6 = vld [vmem:[%s5856_s25 + $0x50] sm:$0xff] }
 0x1b3   : > { %5315 = vmatmul.msk.bf16.gmra.mxu2 %vm371_vm1, %v3190_v49  ;;  %v6456_v56 = vadd.f32 %v2480_v46, %v1966_v31  ;;  %5497 = vmatmul.msk.bf16.gmra.mxu0 %vm371_vm1, %v4191_v28  ;;  %v4193_v28 = vsel %vm4182_vm7, %v4190_v3, %v4192_v30  ;;  %v3688_v42 = vshrl.u32 %v5648_v6, 16 }
 0x1b4   : > { %5408 = vmatmul.msk.bf16.gmra.mxu3 %vm371_vm1, %v3677_v25 }
 0x1b5   : > { %v3690_v22 = vrot.slane %v3688_v42, 2  ;;  %v5629_v42 = vld [vmem:[%s5856_s25 + $0x48] sm:$0xff] }
 0x1b6   : > { %v1483_v45 = vpop.f32.mrf.mxu2  ;;  %v3195_v50 = vrot.slane %v5629_v42, 2  ;;  %v5666_v42 = vld [vmem:[%s5856_s25 + $0x50] sm:$0xff] }
 0x1b7   : > { %v1534_v55 = vadd.f32 %v1483_v45, %v1100_v7  ;;  %v1051_v5 = vpop.f32.mrf.mxu1  ;;  %v6464_v33 = vpop.f32.mrf.mxu3  ;;  %v3691_v7 = vshll.u32 %v5648_v6, 16 }
 0x1b8   : > { %v2485_v11 = vpop.f32.mrf.mxu0  ;;  %v1101_v39 = vadd.f32 %v1051_v5, %v6075_v0  ;;  %v3686_v0 = vsel %vm3615_vm5, %v3676_v58, %v3685_v38  ;;  %v5610_v58 = vld [vmem:[%s5856_s25 + $0x38] sm:$0xff] }
 0x1b9   : > { %v1967_v13 = vadd.f32 %v6416_v21, %v1534_v55  ;;  %v3192_v21 = vsel %vm2748_vm6, %v3189_v43, %v3191_v52 }
 0x1bb   : > { %v6468_v46 = vadd.f32 %v2483_v17, %v1967_v13  ;;  %v3693_v13 = vrot.slane %v3691_v7, 3 }
 0x1be   : > { %v1485_v27 = vpop.f32.mrf.mxu2 }
 0x1bf   : > { %v1535_v16 = vadd.f32 %v1485_v27, %v1101_v39  ;;  %v1054_v14 = vpop.f32.mrf.mxu1  ;;  %v6473_v49 = vpop.f32.mrf.mxu3  ;;  %v3694_v27 = vor.u32 %v3693_v13, %v3690_v22 }
 0x1c0   : > { %v2488_v17 = vpop.f32.mrf.mxu0  ;;  %v1102_v43 = vadd.f32 %v1054_v14, %v6093_v23  ;;  %v2760_v23 = vrot.slane %v5610_v58, 2  ;;  %v5665_v58 = vld [vmem:[%s5856_s25 + $0x48] sm:$0xff] }
 0x1c1   : > { %v1968_v31 = vadd.f32 %v6425_v10, %v1535_v16  ;;  %v4196_v13 = vrot.slane %v5665_v58, 3 }
 0x1c2   : > { %5225 = vmatmul.msk.bf16.gmra.mxu1 %vm371_vm1, %v2759_v35  ;;  %v2761_v35 = vsel %vm2748_vm6, %v2758_v44, %v2760_v23  ;;  %v5649_v44 = vld [vmem:[%s5856_s25 + $0x58] sm:$0xff] }
 0x1c3   : > { %5316 = vmatmul.msk.bf16.gmra.mxu2 %vm371_vm1, %v3192_v21  ;;  %v6480_v25 = vadd.f32 %v2485_v11, %v1968_v31  ;;  %5498 = vmatmul.msk.bf16.gmra.mxu0 %vm371_vm1, %v4193_v28  ;;  %v4195_v28 = vsel %vm4182_vm7, %v4192_v30, %v4194_v41  ;;  %v3697_v6 = vshrl.u32 %v5649_v44, 16 }
 0x1c4   : > { %5409 = vmatmul.msk.bf16.gmra.mxu3 %vm371_vm1, %v3686_v0 }
 0x1c5   : > { %v3699_v15 = vrot.slane %v3697_v6, 2 }
 0x1c6   : > { %v1488_v10 = vpop.f32.mrf.mxu2 }
 0x1c7   : > { %v1536_v3 = vadd.f32 %v1488_v10, %v1102_v43  ;;  %v1056_v45 = vpop.f32.mrf.mxu1  ;;  %v6488_v9 = vpop.f32.mrf.mxu3  ;;  %v3700_v43 = vshll.u32 %v5649_v44, 16 }
 0x1c8   : > { %v2490_v5 = vpop.f32.mrf.mxu0  ;;  %v1103_v48 = vadd.f32 %v1056_v45, %v6103_v54  ;;  %v3695_v54 = vsel %vm3615_vm5, %v3685_v38, %v3694_v27  ;;  %v5611_v38 = vld [vmem:[%s5856_s25 + $0x40] sm:$0xff] }
 0x1c9   : > { %v1969_v55 = vadd.f32 %v6440_v51, %v1536_v3  ;;  %v3194_v51 = vsel %vm2748_vm6, %v3191_v52, %v3193_v63 }
 0x1cb   : > { %v6492_v11 = vadd.f32 %v2488_v17, %v1969_v55  ;;  %v3702_v55 = vrot.slane %v3700_v43, 3  ;;  %v5630_v43 = vld [vmem:[%s5856_s25 + $0x50] sm:$0xff] }
 0x1ce   : > { %v1490_v39 = vpop.f32.mrf.mxu2 }
 0x1cf   : > { %v1537_v16 = vadd.f32 %v1490_v39, %v1103_v48  ;;  %v1059_v14 = vpop.f32.mrf.mxu1  ;;  %v6497_v21 = vpop.f32.mrf.mxu3  ;;  %v3703_v39 = vor.u32 %v3702_v55, %v3699_v15  ;;  %v3197_v55 = vrot.slane %v5630_v43, 2 }
 0x1d0   : > { %v2493_v17 = vpop.f32.mrf.mxu0  ;;  %v1104_v52 = vadd.f32 %v1059_v14, %v5986_v20  ;;  %v2762_v20 = vrot.slane %v5611_v38, 2 }
 0x1d1   : > { %v1970_v31 = vadd.f32 %v6449_v47, %v1537_v16 }
 0x1d2   : > { %5226 = vmatmul.msk.bf16.gmra.mxu1 %vm371_vm1, %v2761_v35  ;;  %v2763_v35 = vsel %vm2748_vm6, %v2760_v23, %v2762_v20  ;;  %v5650_v23 = vld [vmem:[%s5856_s25 + $0x60] sm:$0xff] }
 0x1d3   : > { %5317 = vmatmul.msk.bf16.gmra.mxu2 %vm371_vm1, %v3194_v51  ;;  %v6504_v0 = vadd.f32 %v2490_v5, %v1970_v31  ;;  %5499 = vmatmul.msk.bf16.gmra.mxu0 %vm371_vm1, %v4195_v28  ;;  %v4197_v28 = vsel %vm4182_vm7, %v4194_v41, %v4196_v13 }
 0x1d4   : > { %5410 = vmatmul.msk.bf16.gmra.mxu3 %vm371_vm1, %v3695_v54 }
 0x1d6   : > { %v1493_v47 = vpop.f32.mrf.mxu2 }
 0x1d7   : > { %v1538_v30 = vadd.f32 %v1493_v47, %v1104_v52  ;;  %v1061_v10 = vpop.f32.mrf.mxu1  ;;  %v6512_v7 = vpop.f32.mrf.mxu3  ;;  %v3706_v52 = vshrl.u32 %v5650_v23, 16  ;;  %v3709_v47 = vshll.u32 %v5650_v23, 16 }
 0x1d8   : > { %v2495_v45 = vpop.f32.mrf.mxu0  ;;  %v1105_v22 = vadd.f32 %v1061_v10, %v5997_v34  ;;  %v3704_v34 = vsel %vm3615_vm5, %v3694_v27, %v3703_v39  ;;  %v5612_v27 = vld [vmem:[%s5856_s25 + $0x48] sm:$0xff] }
 0x1d9   : > { %v1971_v3 = vadd.f32 %v6464_v33, %v1538_v30  ;;  %v3196_v33 = vsel %vm2748_vm6, %v3193_v63, %v3195_v50  ;;  %v6906_v63 = vld [vmem:[#allocation3_spill] sm:$0xff]  ;;  %v2764_v15 = vrot.slane %v5612_v27, 2  ;;  %v5631_v27 = vld [vmem:[%s5856_s25 + $0x58] sm:$0xff] }
 0x1db   : > { %v6516_v5 = vadd.f32 %v2493_v17, %v1971_v3  ;;  %v3708_v3 = vrot.slane %v3706_v52, 2 }
 0x1de   : > { %v1495_v48 = vpop.f32.mrf.mxu2 }
 0x1df   : > { %v1539_v16 = vadd.f32 %v1495_v48, %v1105_v22  ;;  %v1064_v14 = vpop.f32.mrf.mxu1  ;;  %v6521_v51 = vpop.f32.mrf.mxu3  ;;  %v6907_v22 = vld [vmem:[#allocation4_spill] sm:$0xff] }
 0x1e0   : > { %v2498_v17 = vpop.f32.mrf.mxu0  ;;  %v1106_v44 = vadd.f32 %v1064_v14, %v6906_v63 }
 0x1e1   : > { %v1972_v31 = vadd.f32 %v6473_v49, %v1539_v16  ;;  %v4198_v16 = vrot.slane %v5666_v42, 3  ;;  %v5667_v42 = vld [vmem:[%s5856_s25 + $0x58] sm:$0xff] }
 0x1e2   : > { %5227 = vmatmul.msk.bf16.gmra.mxu1 %vm371_vm1, %v2763_v35 }
 0x1e3   : > { %5318 = vmatmul.msk.bf16.gmra.mxu2 %vm371_vm1, %v3196_v33  ;;  %v6528_v54 = vadd.f32 %v2495_v45, %v1972_v31  ;;  %5500 = vmatmul.msk.bf16.gmra.mxu0 %vm371_vm1, %v4197_v28  ;;  %v3711_v45 = vrot.slane %v3709_v47, 3  ;;  %v2765_v28 = vsel %vm2748_vm6, %v2762_v20, %v2764_v15  ;;  %v4199_v63 = vsel %vm4182_vm7, %v4196_v13, %v4198_v16  ;;  %v5651_v20 = vld [vmem:[%s5856_s25 + $0x68] sm:$0xff] }
 0x1e4   : > { %5411 = vmatmul.msk.bf16.gmra.mxu3 %vm371_vm1, %v3704_v34  ;;  %v3715_v47 = vshrl.u32 %v5651_v20, 16 }
 0x1e5   : > { %v3712_v35 = vor.u32 %v3711_v45, %v3708_v3 }
 0x1e6   : > { %v1498_v49 = vpop.f32.mrf.mxu2  ;;  %v3717_v3 = vrot.slane %v3715_v47, 2 }
 0x1e7   : > { %v1540_v41 = vadd.f32 %v1498_v49, %v1106_v44  ;;  %v1066_v6 = vpop.f32.mrf.mxu1  ;;  %v6536_v30 = vpop.f32.mrf.mxu3  ;;  %v3713_v44 = vsel %vm3615_vm5, %v3703_v39, %v3712_v35  ;;  %v5613_v39 = vld [vmem:[%s5856_s25 + $0x50] sm:$0xff] }
 0x1e8   : > { %v2500_v38 = vpop.f32.mrf.mxu0  ;;  %v1107_v48 = vadd.f32 %v1066_v6, %v6907_v22 }
 0x1e9   : > { %v1973_v10 = vadd.f32 %v6488_v9, %v1540_v41  ;;  %v3198_v9 = vsel %vm2748_vm6, %v3195_v50, %v3197_v55  ;;  %v6908_v50 = vld [vmem:[#allocation5_spill] sm:$0xff]  ;;  %v3718_v41 = vshll.u32 %v5651_v20, 16 }
 0x1eb   : > { %v6540_v58 = vadd.f32 %v2498_v17, %v1973_v10  ;;  %v3720_v45 = vrot.slane %v3718_v41, 3 }
 0x1ee   : > { %v1500_v14 = vpop.f32.mrf.mxu2 }
 0x1ef   : > { %v1541_v33 = vadd.f32 %v1500_v14, %v1107_v48  ;;  %v1069_v31 = vpop.f32.mrf.mxu1  ;;  %v6545_v34 = vpop.f32.mrf.mxu3  ;;  %v2766_v48 = vrot.slane %v5613_v39, 2  ;;  %v3199_v14 = vrot.slane %v5631_v27, 2  ;;  %v6586_v27 = vld [vmem:[%s5856_s25 + $0x60] sm:$0xff] }
 0x1f0   : > { %v2503_v17 = vpop.f32.mrf.mxu0  ;;  %v1108_v52 = vadd.f32 %v1069_v31, %v6908_v50 }
 0x1f1   : > { %v1974_v23 = vadd.f32 %v6497_v21, %v1541_v33  ;;  %v6909_v33 = vld [vmem:[#allocation6_spill] sm:$0xff]  ;;  %v2767_v20 = vsel %vm2748_vm6, %v2764_v15, %v2766_v48  ;;  %v5652_v15 = vld [vmem:[%s5856_s25 + $0x70] sm:$0xff] }
 0x1f2   : > { %5228 = vmatmul.msk.bf16.gmra.mxu1 %vm371_vm1, %v2765_v28  ;;  %v4200_v28 = vrot.slane %v5667_v42, 3  ;;  %v6591_v42 = vld [vmem:[%s5856_s25 + $0x60] sm:$0xff] }
 0x1f3   : > { %5319 = vmatmul.msk.bf16.gmra.mxu2 %vm371_vm1, %v3198_v9  ;;  %v6552_v49 = vadd.f32 %v2500_v38, %v1974_v23  ;;  %5501 = vmatmul.msk.bf16.gmra.mxu0 %vm371_vm1, %v4199_v63  ;;  %v3721_v23 = vor.u32 %v3720_v45, %v3717_v3 }
 0x1f4   : > { %5412 = vmatmul.msk.bf16.gmra.mxu3 %vm371_vm1, %v3713_v44 }
 0x1f5   : > { %v3722_v47 = vsel %vm3615_vm5, %v3712_v35, %v3721_v23  ;;  %v6583_v35 = vld [vmem:[%s5856_s25 + $0x58] sm:$0xff] }
 0x1f6   : > { %v1503_v21 = vpop.f32.mrf.mxu2 }
 0x1f7   : > { %v1542_v13 = vadd.f32 %v1503_v21, %v1108_v52  ;;  %v1071_v6 = vpop.f32.mrf.mxu1  ;;  %v6560_v43 = vpop.f32.mrf.mxu3  ;;  %v4201_v21 = vsel %vm4182_vm7, %v4198_v16, %v4200_v28 }
 0x1f8   : > { %v2505_v38 = vpop.f32.mrf.mxu0  ;;  %v1109_v31 = vadd.f32 %v1071_v6, %v6909_v33  ;;  %v3727_v6 = vshll.u32 %v5652_v15, 16  ;;  %v2768_v33 = vrot.slane %v6583_v35, 2 }
 0x1f9   : > { %v1975_v10 = vadd.f32 %v6512_v7, %v1542_v13  ;;  %v3200_v7 = vsel %vm2748_vm6, %v3197_v55, %v3199_v14  ;;  %v3724_v13 = vshrl.u32 %v5652_v15, 16 }
 0x1fa   : > { %v3729_v45 = vrot.slane %v3727_v6, 3 }
 0x1fb   : > { %v6564_v22 = vadd.f32 %v2503_v17, %v1975_v10  ;;  %v3726_v3 = vrot.slane %v3724_v13, 2 }
 0x1fe   : > { %v1505_v9 = vpop.f32.mrf.mxu2 }
 0x1ff   : > { %v1543_v63 = vadd.f32 %v1505_v9, %v1109_v31  ;;  %v2852_v44 = vpop.f32.mrf.mxu1  ;;  %v6569_v50 = vpop.f32.mrf.mxu3  ;;  %v3201_v31 = vrot.slane %v6586_v27, 2 }
 0x200   : > { %v4286_v17 = vpop.f32.mrf.mxu0  ;;  %v2942_v55 = vadd.f32 %v2852_v44, %v6123_v12 }
 0x201   : > { %v1976_v52 = vadd.f32 %v6521_v51, %v1543_v63  ;;  %v4202_v63 = vrot.slane %v6591_v42, 3  ;;  %v3202_v15 = vsel %vm2748_vm6, %v3199_v14, %v3201_v31 }
 0x202   : > { %5229 = vmatmul.msk.bf16.gmra.mxu1 %vm371_vm1, %v2767_v20  ;;  %v3730_v20 = vor.u32 %v3729_v45, %v3726_v3  ;;  %v6625_v3 = vld [vmem:[%s5856_s25 + $0x60] sm:$0xff]  ;;  %v6628_v45 = vld [vmem:[%s5856_s25 + $0x68] sm:$0xff] }
 0x203   : > { %5320 = vmatmul.msk.bf16.gmra.mxu2 %vm371_vm1, %v3200_v7  ;;  %v6576_v41 = vadd.f32 %v2505_v38, %v1976_v52  ;;  %5502 = vmatmul.msk.bf16.gmra.mxu0 %vm371_vm1, %v4201_v21  ;;  %v6601_v52 = vld [vmem:[%s6893_s2] ss:$0 sm:$0xff]  ;;  %v4203_v13 = vsel %vm4182_vm7, %v4200_v28, %v4202_v63 }
 0x204   : > { %5413 = vmatmul.msk.bf16.gmra.mxu3 %vm371_vm1, %v3722_v47  ;;  %v2769_v47 = vsel %vm2748_vm6, %v2766_v48, %v2768_v33  ;;  %v5653_v48 = vld [vmem:[%s5856_s25 + $0x78] sm:$0xff] }
 0x206   : > { %v3285_v51 = vpop.f32.mrf.mxu2 }
 0x207   : > { %v3375_v16 = vadd.f32 %v3285_v51, %v2942_v55  ;;  %v2854_v39 = vpop.f32.mrf.mxu1  ;;  %v6588_v10 = vpop.f32.mrf.mxu3 }
 0x208   : > { %v4288_v38 = vpop.f32.mrf.mxu0  ;;  %v2943_v9 = vadd.f32 %v2854_v39, %v6136_v32  ;;  %v3736_v39 = vshll.u32 %v5653_v48, 16 }
 0x209   : > { %v3942_v12 = vadd.f32 %v6536_v30, %v3375_v16 }
 0x20b   : > { %v4376_v7 = vadd.f32 %v4286_v17, %v3942_v12  ;;  %v3731_v17 = vsel %vm3615_vm5, %v3721_v23, %v3730_v20  ;;  %v3733_v23 = vshrl.u32 %v5653_v48, 16 }
 0x20d   : > { %v4488_v6 = vadd.f32 %v6601_v52, %v4376_v7  ;;  %v3735_v7 = vrot.slane %v3733_v23, 2 }
 0x20e   : > { %v3287_v44 = vpop.f32.mrf.mxu2 }
 0x20f   : > { %v3376_v21 = vadd.f32 %v3287_v44, %v2943_v9  ;;  %v2857_v30 = vpop.f32.mrf.mxu1  ;;  %v6605_v55 = vpop.f32.mrf.mxu3  ;;  %v4524_v35 = vmax.f32 %v4488_v6, 0.0  ;;  %v6633_v44 = vld [vmem:[%s5856_s25 + $0x68] sm:$0xff] }
 0x210   : > { %v4291_v51 = vpop.f32.mrf.mxu0  ;;  %v2944_v14 = vadd.f32 %v2857_v30, %v6147_v60 }
 0x211   : > { %v3943_v32 = vadd.f32 %v6545_v34, %v3376_v21  ;;  %v3738_v21 = vrot.slane %v3736_v39, 3 }
 0x212   : > { %5230 = vmatmul.msk.bf16.gmra.mxu1 %vm371_vm1, %v2769_v47  ;;  %v2770_v47 = vrot.slane %v6625_v3, 2 }
 0x213   : > { %v4377_v16 = vadd.f32 %v4288_v38, %v3943_v32  ;;  %5321 = vmatmul.msk.bf16.gmra.mxu2 %vm371_vm1, %v3202_v15  ;;  %5503 = vmatmul.msk.bf16.gmra.mxu0 %vm371_vm1, %v4203_v13  ;;  %v3203_v15 = vrot.slane %v6628_v45, 2  ;;  %v4204_v13 = vrot.slane %v6633_v44, 3  ;;  %v3739_v6 = vor.u32 %v3738_v21, %v3735_v7  ;;  %v6660_v44 = vld [vmem:[%s5856_s25 + $0x70] sm:$0xff] }
 0x214   : > { %5414 = vmatmul.msk.bf16.gmra.mxu3 %vm371_vm1, %v3731_v17 }
 0x215   : > { %v4489_v34 = vadd.f32 %v6601_v52, %v4377_v16 }
 0x216   : > { %v3290_v28 = vpop.f32.mrf.mxu2 }
 0x217   : > { %v4525_v27 = vmax.f32 %v4489_v34, 0.0  ;;  %v3377_v38 = vadd.f32 %v3290_v28, %v2944_v14  ;;  %v2859_v42 = vpop.f32.mrf.mxu1  ;;  %v6630_v60 = vpop.f32.mrf.mxu3  ;;  %v2771_v14 = vsel %vm2748_vm6, %v2768_v33, %v2770_v47  ;;  %v3204_v28 = vsel %vm2748_vm6, %v3201_v31, %v3203_v15  ;;  %v5654_v33 = vld [vmem:[%s5856_s25 + $0x80] sm:$0xff] }
 0x218   : > { %v4293_v9 = vpop.f32.mrf.mxu0  ;;  %v2945_v32 = vadd.f32 %v2859_v42, %v6160_v1  ;;  %v3740_v1 = vsel %vm3615_vm5, %v3730_v20, %v3739_v6  ;;  %v3742_v20 = vshrl.u32 %v5654_v33, 16 }
 0x219   : > { %v5679_v12 = vpack.c.bf16 %v4525_v27, %v4524_v35  ;;  %v3944_v30 = vadd.f32 %v6560_v43, %v3377_v38  ;;  %v4205_v35 = vsel %vm4182_vm7, %v4202_v63, %v4204_v13 }
 0x21b   : > { %5680 = vst [vmem:[%s6622_s13] sm:$0xff] %v5679_v12   ;;  %v4378_v16 = vadd.f32 %v4291_v51, %v3944_v30  ;;  %v3745_v51 = vshll.u32 %v5654_v33, 16 }
 0x21d   : > { %v4490_v27 = vadd.f32 %v6601_v52, %v4378_v16 }
 0x21e   : > { %v3292_v17 = vpop.f32.mrf.mxu2 }
 0x21f   : > { %v3378_v48 = vadd.f32 %v3292_v17, %v2945_v32  ;;  %v2862_v34 = vpop.f32.mrf.mxu1  ;;  %v6643_v23 = vpop.f32.mrf.mxu3  ;;  %v4526_v42 = vmax.f32 %v4490_v27, 0.0  ;;  %v6665_v32 = vld [vmem:[%s5856_s25 + $0x70] sm:$0xff]  ;;  %v3747_v17 = vrot.slane %v3745_v51, 3 }
 0x220   : > { %v4296_v39 = vpop.f32.mrf.mxu0  ;;  %v2946_v31 = vadd.f32 %v2862_v34, %v6171_v61  ;;  %v3744_v61 = vrot.slane %v3742_v20, 2  ;;  %v3205_v34 = vrot.slane %v6660_v44, 2  ;;  %v6689_v44 = vld [vmem:[%s5856_s25 + $0x70] sm:$0xff] }
 0x221   : > { %v3945_v43 = vadd.f32 %v6569_v50, %v3378_v48 }
 0x222   : > { %5231 = vmatmul.msk.bf16.gmra.mxu1 %vm371_vm1, %v2771_v14 }
 0x223   : > { %v4379_v38 = vadd.f32 %v4293_v9, %v3945_v43  ;;  %5322 = vmatmul.msk.bf16.gmra.mxu2 %vm371_vm1, %v3204_v28  ;;  %5504 = vmatmul.msk.bf16.gmra.mxu0 %vm371_vm1, %v4205_v35  ;;  %v6657_v9 = vld [vmem:[%s5856_s25 + $0x68] sm:$0xff]  ;;  %v4206_v28 = vrot.slane %v6665_v32, 3  ;;  %v3748_v35 = vor.u32 %v3747_v17, %v3744_v61  ;;  %v6697_v17 = vld [vmem:[%s5856_s25 + $0x78] sm:$0xff] }
 0x224   : > { %5415 = vmatmul.msk.bf16.gmra.mxu3 %vm371_vm1, %v3740_v1  ;;  %v2772_v48 = vrot.slane %v6657_v9, 2 }
 0x225   : > { %v4491_v50 = vadd.f32 %v6601_v52, %v4379_v38  ;;  %v4207_v20 = vsel %vm4182_vm7, %v4204_v13, %v4206_v28 }
 0x226   : > { %v3295_v63 = vpop.f32.mrf.mxu2  ;;  %v2773_v33 = vsel %vm2748_vm6, %v2770_v47, %v2772_v48  ;;  %v5655_v47 = vld [vmem:[%s5856_s25 + $0x88] sm:$0xff] }
 0x227   : > { %v4527_v3 = vmax.f32 %v4491_v50, 0.0  ;;  %v3379_v45 = vadd.f32 %v3295_v63, %v2946_v31  ;;  %v2864_v12 = vpop.f32.mrf.mxu1  ;;  %v6662_v7 = vpop.f32.mrf.mxu3  ;;  %v3206_v50 = vsel %vm2748_vm6, %v3203_v15, %v3205_v34 }
 0x228   : > { %v4298_v30 = vpop.f32.mrf.mxu0  ;;  %v2947_v14 = vadd.f32 %v2864_v12, %v6184_v59  ;;  %v3749_v59 = vsel %vm3615_vm5, %v3739_v6, %v3748_v35  ;;  %v3751_v6 = vshrl.u32 %v5655_v47, 16 }
 0x229   : > { %v5684_v21 = vpack.c.bf16 %v4527_v3, %v4526_v42  ;;  %v3946_v16 = vadd.f32 %v6588_v10, %v3379_v45 }
 0x22b   : > { %5766 = vst [vmem:[%s6622_s13 + $0x8] sm:$0xff] %v5684_v21   ;;  %v4380_v1 = vadd.f32 %v4296_v39, %v3946_v16  ;;  %v3754_v39 = vshll.u32 %v5655_v47, 16  ;;  %v6692_v21 = vld [vmem:[%s5856_s25 + $0x78] sm:$0xff] }
 0x22d   : > { %v4492_v51 = vadd.f32 %v6601_v52, %v4380_v1  ;;  %v3756_v16 = vrot.slane %v3754_v39, 3  ;;  %v3207_v1 = vrot.slane %v6692_v21, 2 }
 0x22e   : > { %v3297_v43 = vpop.f32.mrf.mxu2 }
 0x22f   : > { %v3380_v27 = vadd.f32 %v3297_v43, %v2947_v14  ;;  %v2867_v38 = vpop.f32.mrf.mxu1  ;;  %v6675_v31 = vpop.f32.mrf.mxu3  ;;  %v4528_v3 = vmax.f32 %v4492_v51, 0.0  ;;  %v2774_v43 = vrot.slane %v6689_v44, 2  ;;  %v6724_v44 = vld [vmem:[%s5856_s25 + $0x80] sm:$0xff] }
 0x230   : > { %v4301_v63 = vpop.f32.mrf.mxu0  ;;  %v2948_v15 = vadd.f32 %v2867_v38, %v6195_v4  ;;  %v3753_v4 = vrot.slane %v3751_v6, 2  ;;  %v4208_v38 = vrot.slane %v6697_v17, 3  ;;  %v6729_v17 = vld [vmem:[%s5856_s25 + $0x80] sm:$0xff] }
 0x231   : > { %v3947_v10 = vadd.f32 %v6605_v55, %v3380_v27  ;;  %v2775_v51 = vsel %vm2748_vm6, %v2772_v48, %v2774_v43  ;;  %v5656_v48 = vld [vmem:[%s5856_s25 + $0x90] sm:$0xff] }
 0x232   : > { %5232 = vmatmul.msk.bf16.gmra.mxu1 %vm371_vm1, %v2773_v33 }
 0x233   : > { %v4381_v42 = vadd.f32 %v4298_v30, %v3947_v10  ;;  %5323 = vmatmul.msk.bf16.gmra.mxu2 %vm371_vm1, %v3206_v50  ;;  %5505 = vmatmul.msk.bf16.gmra.mxu0 %vm371_vm1, %v4207_v20  ;;  %v3757_v50 = vor.u32 %v3756_v16, %v3753_v4 }
 0x234   : > { %5416 = vmatmul.msk.bf16.gmra.mxu3 %vm371_vm1, %v3749_v59 }
 0x235   : > { %v4493_v55 = vadd.f32 %v6601_v52, %v4381_v42  ;;  %v3208_v42 = vsel %vm2748_vm6, %v3205_v34, %v3207_v1 }
 0x236   : > { %v3300_v13 = vpop.f32.mrf.mxu2 }
 0x237   : > { %v4529_v45 = vmax.f32 %v4493_v55, 0.0  ;;  %v3381_v12 = vadd.f32 %v3300_v13, %v2948_v15  ;;  %v2869_v9 = vpop.f32.mrf.mxu1  ;;  %v6694_v30 = vpop.f32.mrf.mxu3  ;;  %v4209_v15 = vsel %vm4182_vm7, %v4206_v28, %v4208_v38 }
 0x238   : > { %v4303_v61 = vpop.f32.mrf.mxu0  ;;  %v2949_v27 = vadd.f32 %v2869_v9, %v6208_v19  ;;  %v3758_v19 = vsel %vm3615_vm5, %v3748_v35, %v3757_v50  ;;  %v3760_v35 = vshrl.u32 %v5656_v48, 16  ;;  %v6721_v9 = vld [vmem:[%s5856_s25 + $0x78] sm:$0xff] }
 0x239   : > { %v5689_v32 = vpack.c.bf16 %v4529_v45, %v4528_v3  ;;  %v3948_v14 = vadd.f32 %v6630_v60, %v3381_v12 }
 0x23b   : > { %5767 = vst [vmem:[%s6622_s13 + $0x10] sm:$0xff] %v5689_v32   ;;  %v4382_v10 = vadd.f32 %v4301_v63, %v3948_v14  ;;  %v3763_v63 = vshll.u32 %v5656_v48, 16  ;;  %v2776_v14 = vrot.slane %v6721_v9, 2  ;;  %v6753_v9 = vld [vmem:[%s5856_s25 + $0x80] sm:$0xff] }
 0x23d   : > { %v4494_v13 = vadd.f32 %v6601_v52, %v4382_v10  ;;  %v3765_v4 = vrot.slane %v3763_v63, 3 }
 0x23e   : > { %v3302_v33 = vpop.f32.mrf.mxu2 }
 0x23f   : > { %v3382_v20 = vadd.f32 %v3302_v33, %v2949_v27  ;;  %v2872_v59 = vpop.f32.mrf.mxu1  ;;  %v6707_v47 = vpop.f32.mrf.mxu3  ;;  %v4530_v39 = vmax.f32 %v4494_v13, 0.0  ;;  %v3209_v27 = vrot.slane %v6724_v44, 2  ;;  %v6910_v33 = vld [vmem:[#allocation7_spill] sm:$0xff]  ;;  %v6756_v44 = vld [vmem:[%s5856_s25 + $0x88] sm:$0xff] }
 0x240   : > { %v4306_v55 = vpop.f32.mrf.mxu0  ;;  %v2950_v34 = vadd.f32 %v2872_v59, %v6219_v24  ;;  %v3762_v24 = vrot.slane %v3760_v35, 2 }
 0x241   : > { %v3949_v60 = vadd.f32 %v6643_v23, %v3382_v20  ;;  %v4210_v20 = vrot.slane %v6729_v17, 3  ;;  %v3210_v13 = vsel %vm2748_vm6, %v3207_v1, %v3209_v27  ;;  %v6911_v1 = vld [vmem:[#allocation8_spill] sm:$0xff] }
 0x242   : > { %5233 = vmatmul.msk.bf16.gmra.mxu1 %vm371_vm1, %v2775_v51  ;;  %v3766_v51 = vor.u32 %v3765_v4, %v3762_v24  ;;  %v6761_v24 = vld [vmem:[%s5856_s25 + $0x88] sm:$0xff] }
 0x243   : > { %v4383_v6 = vadd.f32 %v4303_v61, %v3949_v60  ;;  %5324 = vmatmul.msk.bf16.gmra.mxu2 %vm371_vm1, %v3208_v42  ;;  %5506 = vmatmul.msk.bf16.gmra.mxu0 %vm371_vm1, %v4209_v15 }
 0x244   : > { %5417 = vmatmul.msk.bf16.gmra.mxu3 %vm371_vm1, %v3758_v19  ;;  %v2777_v19 = vsel %vm2748_vm6, %v2774_v43, %v2776_v14  ;;  %v5657_v43 = vld [vmem:[%s5856_s25 + $0x98] sm:$0xff] }
 0x245   : > { %v4495_v23 = vadd.f32 %v6601_v52, %v4383_v6  ;;  %v3772_v63 = vshll.u32 %v5657_v43, 16 }
 0x246   : > { %v3305_v28 = vpop.f32.mrf.mxu2 }
 0x247   : > { %v4531_v3 = vmax.f32 %v4495_v23, 0.0  ;;  %v3383_v45 = vadd.f32 %v3305_v28, %v2950_v34  ;;  %v2874_v12 = vpop.f32.mrf.mxu1  ;;  %v6726_v21 = vpop.f32.mrf.mxu3  ;;  %v4211_v23 = vsel %vm4182_vm7, %v4208_v38, %v4210_v20  ;;  %v3767_v34 = vsel %vm3615_vm5, %v3757_v50, %v3766_v51 }
 0x248   : > { %v4308_v61 = vpop.f32.mrf.mxu0  ;;  %v2951_v10 = vadd.f32 %v2874_v12, %v6910_v33  ;;  %v3769_v50 = vshrl.u32 %v5657_v43, 16 }
 0x249   : > { %v5694_v32 = vpack.c.bf16 %v4531_v3, %v4530_v39  ;;  %v3950_v16 = vadd.f32 %v6662_v7, %v3383_v45 }
 0x24a   : > { %v3771_v4 = vrot.slane %v3769_v50, 2 }
 0x24b   : > { %5768 = vst [vmem:[%s6622_s13 + $0x18] sm:$0xff] %v5694_v32   ;;  %v4384_v42 = vadd.f32 %v4306_v55, %v3950_v16  ;;  %v3774_v16 = vrot.slane %v3772_v63, 3 }
 0x24d   : > { %v4496_v28 = vadd.f32 %v6601_v52, %v4384_v42  ;;  %v6912_v42 = vld [vmem:[#allocation9_spill] sm:$0xff] }
 0x24e   : > { %v3307_v59 = vpop.f32.mrf.mxu2 }
 0x24f   : > { %v3384_v60 = vadd.f32 %v3307_v59, %v2951_v10  ;;  %v2877_v15 = vpop.f32.mrf.mxu1  ;;  %v6739_v6 = vpop.f32.mrf.mxu3  ;;  %v4532_v39 = vmax.f32 %v4496_v28, 0.0  ;;  %v2778_v10 = vrot.slane %v6753_v9, 2  ;;  %v3211_v59 = vrot.slane %v6756_v44, 2 }
 0x250   : > { %v4311_v48 = vpop.f32.mrf.mxu0  ;;  %v2952_v55 = vadd.f32 %v2877_v15, %v6911_v1  ;;  %v4212_v15 = vrot.slane %v6761_v24, 3 }
 0x251   : > { %v3951_v7 = vadd.f32 %v6675_v31, %v3384_v60  ;;  %v2779_v28 = vsel %vm2748_vm6, %v2776_v14, %v2778_v10 }
 0x252   : > { %5234 = vmatmul.msk.bf16.gmra.mxu1 %vm371_vm1, %v2777_v19  ;;  %v4213_v1 = vsel %vm4182_vm7, %v4210_v20, %v4212_v15 }
 0x253   : > { %v4385_v35 = vadd.f32 %v4308_v61, %v3951_v7  ;;  %5325 = vmatmul.msk.bf16.gmra.mxu2 %vm371_vm1, %v3210_v13  ;;  %5507 = vmatmul.msk.bf16.gmra.mxu0 %vm371_vm1, %v4211_v23  ;;  %v3775_v13 = vor.u32 %v3774_v16, %v3771_v4 }
 0x254   : > { %5418 = vmatmul.msk.bf16.gmra.mxu3 %vm371_vm1, %v3767_v34 }
 0x255   : > { %v4497_v31 = vadd.f32 %v6601_v52, %v4385_v35  ;;  %v3212_v35 = vsel %vm2748_vm6, %v3209_v27, %v3211_v59  ;;  %v6913_v27 = vld [vmem:[#allocation10_spill] sm:$0xff] }
 0x256   : > { %v3310_v38 = vpop.f32.mrf.mxu2 }
 0x257   : > { %v4533_v3 = vmax.f32 %v4497_v31, 0.0  ;;  %v3385_v45 = vadd.f32 %v3310_v38, %v2952_v55  ;;  %v2879_v12 = vpop.f32.mrf.mxu1  ;;  %v6758_v32 = vpop.f32.mrf.mxu3  ;;  %v3519_v55 = vld [vmem:[%s5856_s25 + $0xa0] sm:$0x7]  ;;  %v3776_v38 = vsel %vm3615_vm5, %v3766_v51, %v3775_v13 }
 0x258   : > { %v4313_v17 = vpop.f32.mrf.mxu0  ;;  %v2953_v60 = vadd.f32 %v2879_v12, %v6912_v42  ;;  %v3595_v50 = vunpack.c.l.b16 %v3519_v55 }
 0x259   : > { %v5699_v61 = vpack.c.bf16 %v4533_v3, %v4532_v39  ;;  %v3952_v33 = vadd.f32 %v6694_v30, %v3385_v45 }
 0x25a   : > { %v3614_v14 = vpack.c.b16 %v3595_v50, %v3595_v50 }
 0x25b   : > { %5769 = vst [vmem:[%s6622_s13 + $0x20] sm:$0xff] %v5699_v61   ;;  %v4386_v7 = vadd.f32 %v4311_v48, %v3952_v33  ;;  %v5620_v61 = vld [vmem:[%s5856_s25 + $0x88] sm:$0xff]  ;;  %v5674_v33 = vld [vmem:[%s5856_s25 + $0x90] sm:$0xff] }
 0x25c   : > { %v3778_v39 = vshrl.u32 %v3614_v14, 16  ;;  %v3781_v3 = vshll.u32 %v3614_v14, 16 }
 0x25d   : > { %v4498_v63 = vadd.f32 %v6601_v52, %v4386_v7  ;;  %v2780_v7 = vrot.slane %v5620_v61, 2 }
 0x25e   : > { %v3312_v19 = vpop.f32.mrf.mxu2  ;;  %v3780_v42 = vrot.slane %v3778_v39, 2 }
 0x25f   : > { %v3386_v23 = vadd.f32 %v3312_v19, %v2953_v60  ;;  %v2882_v34 = vpop.f32.mrf.mxu1  ;;  %v6771_v43 = vpop.f32.mrf.mxu3  ;;  %v4534_v45 = vmax.f32 %v4498_v63, 0.0  ;;  %v3783_v60 = vrot.slane %v3781_v3, 3  ;;  %v2781_v63 = vsel %vm2748_vm6, %v2778_v10, %v2780_v7 }
 0x260   : > { %v4316_v31 = vpop.f32.mrf.mxu0  ;;  %v2954_v20 = vadd.f32 %v2882_v34, %v6913_v27  ;;  %v6914_v34 = vld [vmem:[#allocation11_spill] sm:$0xff] }
 0x261   : > { %v3953_v30 = vadd.f32 %v6707_v47, %v3386_v23 }
 0x262   : > { %5235 = vmatmul.msk.bf16.gmra.mxu1 %vm371_vm1, %v2779_v28 }
 0x263   : > { %v4387_v48 = vadd.f32 %v4313_v17, %v3953_v30  ;;  %5326 = vmatmul.msk.bf16.gmra.mxu2 %vm371_vm1, %v3212_v35  ;;  %5508 = vmatmul.msk.bf16.gmra.mxu0 %vm371_vm1, %v4213_v1  ;;  %v5638_v17 = vld [vmem:[%s5856_s25 + $0x90] sm:$0xff]  ;;  %v4214_v35 = vrot.slane %v5674_v33, 3  ;;  %v3784_v1 = vor.u32 %v3783_v60, %v3780_v42 }
 0x264   : > { %5419 = vmatmul.msk.bf16.gmra.mxu3 %vm371_vm1, %v3776_v38  ;;  %v3213_v23 = vrot.slane %v5638_v17, 2  ;;  %v5675_v17 = vld [vmem:[%s5856_s25 + $0x98] sm:$0xff] }
 0x265   : > { %v4499_v47 = vadd.f32 %v6601_v52, %v4387_v48  ;;  %v4216_v42 = vrot.slane %v5675_v17, 3 }
 0x266   : > { %v3315_v51 = vpop.f32.mrf.mxu2  ;;  %v3214_v48 = vsel %vm2748_vm6, %v3211_v59, %v3213_v23 }
 0x267   : > { %v4535_v12 = vmax.f32 %v4499_v47, 0.0  ;;  %v3387_v9 = vadd.f32 %v3315_v51, %v2954_v20  ;;  %v2884_v44 = vpop.f32.mrf.mxu1  ;;  %v6786_v24 = vpop.f32.mrf.mxu3  ;;  %v3785_v20 = vsel %vm3615_vm5, %v3775_v13, %v3784_v1 }
 0x268   : > { %v4318_v16 = vpop.f32.mrf.mxu0  ;;  %v2955_v28 = vadd.f32 %v2884_v44, %v6914_v34 }
 0x269   : > { %v5704_v4 = vpack.c.bf16 %v4535_v12, %v4534_v45  ;;  %v3954_v19 = vadd.f32 %v6726_v21, %v3387_v9  ;;  %v4215_v21 = vsel %vm4182_vm7, %v4212_v15, %v4214_v35  ;;  %v5621_v45 = vld [vmem:[%s5856_s25 + $0x90] sm:$0xff]  ;;  %v5639_v12 = vld [vmem:[%s5856_s25 + $0x98] sm:$0xff] }
 0x26b   : > { %5770 = vst [vmem:[%s6622_s13 + $0x28] sm:$0xff] %v5704_v4   ;;  %v4388_v55 = vadd.f32 %v4316_v31, %v3954_v19 }
 0x26d   : > { %v4500_v51 = vadd.f32 %v6601_v52, %v4388_v55 }
 0x26e   : > { %v3317_v30 = vpop.f32.mrf.mxu2 }
 0x26f   : > { %v3388_v38 = vadd.f32 %v3317_v30, %v2955_v28  ;;  %v2887_v50 = vpop.f32.mrf.mxu1  ;;  %v6794_v14 = vpop.f32.mrf.mxu3  ;;  %v4536_v15 = vmax.f32 %v4500_v51, 0.0 }
 0x270   : > { %v4321_v27 = vpop.f32.mrf.mxu0  ;;  %v2956_v10 = vadd.f32 %v2887_v50, %v6311_v37  ;;  %v2782_v37 = vrot.slane %v5621_v45, 2  ;;  %v4217_v50 = vsel %vm4182_vm7, %v4214_v35, %v4216_v42 }
 0x271   : > { %v3955_v47 = vadd.f32 %v6739_v6, %v3388_v38 }
 0x272   : > { %5236 = vmatmul.msk.bf16.gmra.mxu1 %vm371_vm1, %v2781_v63  ;;  %v2783_v30 = vsel %vm2748_vm6, %v2780_v7, %v2782_v37  ;;  %v2652_v63 = vld [vmem:[%s5856_s25 + $0x98] sm:$0x3] }
 0x273   : > { %v4389_v31 = vadd.f32 %v4318_v16, %v3955_v47  ;;  %5327 = vmatmul.msk.bf16.gmra.mxu2 %vm371_vm1, %v3214_v48  ;;  %5509 = vmatmul.msk.bf16.gmra.mxu0 %vm371_vm1, %v4215_v21  ;;  %v3215_v16 = vrot.slane %v5639_v12, 2  ;;  %v3086_v48 = vld [vmem:[%s5856_s25 + $0xa0] sm:$0x3]  ;;  %v2728_v7 = vunpack.c.l.b16 %v2652_v63 }
 0x274   : > { %5420 = vmatmul.msk.bf16.gmra.mxu3 %vm371_vm1, %v3785_v20  ;;  %v4086_v47 = vld [vmem:[%s5856_s25 + $0xa0] sm:$0x7] }
 0x275   : > { %v4501_v6 = vadd.f32 %v6601_v52, %v4389_v31  ;;  %v3216_v1 = vsel %vm2748_vm6, %v3213_v23, %v3215_v16  ;;  %v3162_v23 = vunpack.c.l.b16 %v3086_v48  ;;  %v4162_v35 = vunpack.c.l.b16 %v4086_v47 }
 0x276   : > { %v3320_v59 = vpop.f32.mrf.mxu2 }
 0x277   : > { %v4537_v13 = vmax.f32 %v4501_v6, 0.0  ;;  %v3389_v39 = vadd.f32 %v3320_v59, %v2956_v10  ;;  %v2889_v3 = vpop.f32.mrf.mxu1  ;;  %v6808_v9 = vpop.f32.mrf.mxu3  ;;  %v2747_v59 = vpack.c.b16 %v2728_v7, %v2728_v7 }
 0x278   : > { %v4323_v61 = vpop.f32.mrf.mxu0  ;;  %v2957_v33 = vadd.f32 %v2889_v3, %v6329_v53  ;;  %v4181_v3 = vpack.c.b16 %v4162_v35, %v4162_v35 }
 0x279   : > { %v5709_v44 = vpack.c.bf16 %v4537_v13, %v4536_v15  ;;  %v3956_v4 = vadd.f32 %v6758_v32, %v3389_v39  ;;  %v3181_v15 = vpack.c.b16 %v3162_v23, %v3162_v23 }
 0x27b   : > { %5771 = vst [vmem:[%s6622_s13 + $0x30] sm:$0xff] %v5709_v44   ;;  %v4390_v19 = vadd.f32 %v4321_v27, %v3956_v4  ;;  %v2784_v44 = vrot.slane %v2747_v59, 2 }
 0x27d   : > { %v4502_v53 = vadd.f32 %v6601_v52, %v4390_v19 }
 0x27e   : > { %v3322_v60 = vpop.f32.mrf.mxu2 }
 0x27f   : > { %v3390_v34 = vadd.f32 %v3322_v60, %v2957_v33  ;;  %v2892_v28 = vpop.f32.mrf.mxu1  ;;  %v6816_v55 = vpop.f32.mrf.mxu3  ;;  %v4538_v51 = vmax.f32 %v4502_v53, 0.0 }
 0x280   : > { %v4326_v32 = vpop.f32.mrf.mxu0  ;;  %v2958_v27 = vadd.f32 %v2892_v28, %v6339_v57  ;;  %v4218_v57 = vrot.slane %v4181_v3, 3 }
 0x281   : > { %v3957_v38 = vadd.f32 %v6771_v43, %v3390_v34  ;;  %v2785_v34 = vsel %vm2748_vm6, %v2782_v37, %v2784_v44 }
 0x282   : > { %5237 = vmatmul.msk.bf16.gmra.mxu1 %vm371_vm1, %v2783_v30 }
 0x283   : > { %v4391_v21 = vadd.f32 %v4323_v61, %v3957_v38  ;;  %5328 = vmatmul.msk.bf16.gmra.mxu2 %vm371_vm1, %v3216_v1  ;;  %5510 = vmatmul.msk.bf16.gmra.mxu0 %vm371_vm1, %v4217_v50  ;;  %v3217_v61 = vrot.slane %v3181_v15, 2  ;;  %v4219_v38 = vsel %vm4182_vm7, %v4216_v42, %v4218_v57 }
 0x285   : > { %v4503_v43 = vadd.f32 %v6601_v52, %v4391_v21  ;;  %v3218_v28 = vsel %vm2748_vm6, %v3215_v16, %v3217_v61 }
 0x286   : > { %v3325_v20 = vpop.f32.mrf.mxu2 }
 0x287   : > { %v4539_v31 = vmax.f32 %v4503_v43, 0.0  ;;  %v3391_v6 = vadd.f32 %v3325_v20, %v2958_v27  ;;  %v2894_v10 = vpop.f32.mrf.mxu1  ;;  %v3902_v45 = vpop.f32.mrf.mxu3 }
 0x288   : > { %v4328_v39 = vpop.f32.mrf.mxu0  ;;  %v2959_v17 = vadd.f32 %v2894_v10, %v6351_v36 }
 0x289   : > { %v5714_v13 = vpack.c.bf16 %v4539_v31, %v4538_v51  ;;  %v3958_v12 = vadd.f32 %v6786_v24, %v3391_v6 }
 0x28b   : > { %5772 = vst [vmem:[%s6622_s13 + $0x38] sm:$0xff] %v5714_v13   ;;  %v4392_v33 = vadd.f32 %v4326_v32, %v3958_v12 }
 0x28d   : > { %v4504_v24 = vadd.f32 %v6601_v52, %v4392_v33 }
 0x28e   : > { %v3327_v4 = vpop.f32.mrf.mxu2 }
 0x28f   : > { %v3392_v60 = vadd.f32 %v3327_v4, %v2959_v17  ;;  %v2897_v19 = vpop.f32.mrf.mxu1  ;;  %v3904_v36 = vpop.f32.mrf.mxu3 }
 0x290   : > { %v4331_v1 = vpop.f32.mrf.mxu0  ;;  %v2960_v16 = vadd.f32 %v2897_v19, %v6371_v8 }
 0x291   : > { %v3959_v30 = vadd.f32 %v6794_v14, %v3392_v60  ;;  %v4540_v14 = vmax.f32 %v4504_v24, 0.0 }
 0x292   : > { %5238 = vmatmul.msk.bf16.gmra.mxu1 %vm371_vm1, %v2785_v34 }
 0x293   : > { %v4393_v50 = vadd.f32 %v4328_v39, %v3959_v30  ;;  %5329 = vmatmul.msk.bf16.gmra.mxu2 %vm371_vm1, %v3218_v28  ;;  %5511 = vmatmul.msk.bf16.gmra.mxu0 %vm371_vm1, %v4219_v38 }
 0x295   : > { %v4505_v37 = vadd.f32 %v6601_v52, %v4393_v50 }
 0x296   : > { %v3330_v32 = vpop.f32.mrf.mxu2 }
 0x297   : > { %v4541_v63 = vmax.f32 %v4505_v37, 0.0  ;;  %v3393_v48 = vadd.f32 %v3330_v32, %v2960_v16  ;;  %v2899_v42 = vpop.f32.mrf.mxu1  ;;  %v3907_v43 = vpop.f32.mrf.mxu3 }
 0x298   : > { %v4333_v53 = vpop.f32.mrf.mxu0  ;;  %v2961_v7 = vadd.f32 %v2899_v42, %v6384_v26 }
 0x299   : > { %v5719_v47 = vpack.c.bf16 %v4541_v63, %v4540_v14  ;;  %v3960_v21 = vadd.f32 %v6808_v9, %v3393_v48 }
 0x29b   : > { %5773 = vst [vmem:[%s6622_s13 + $0x40] sm:$0xff] %v5719_v47   ;;  %v4394_v27 = vadd.f32 %v4331_v1, %v3960_v21 }
 0x29d   : > { %v4506_v31 = vadd.f32 %v6601_v52, %v4394_v27 }
 0x29e   : > { %v3332_v23 = vpop.f32.mrf.mxu2 }
 0x29f   : > { %v3394_v35 = vadd.f32 %v3332_v23, %v2961_v7  ;;  %v2902_v20 = vpop.f32.mrf.mxu1  ;;  %v4542_v9 = vmax.f32 %v4506_v31, 0.0  ;;  %v3909_v3 = vpop.f32.mrf.mxu3 }
 0x2a0   : > { %v4336_v51 = vpop.f32.mrf.mxu0  ;;  %v2962_v59 = vadd.f32 %v2902_v20, %v6396_v2 }
 0x2a1   : > { %v3961_v8 = vadd.f32 %v6816_v55, %v3394_v35 }
 0x2a3   : > { %v4395_v6 = vadd.f32 %v4333_v53, %v3961_v8 }
 0x2a5   : > { %v4507_v10 = vadd.f32 %v6601_v52, %v4395_v6 }
 0x2a6   : > { %v3335_v15 = vpop.f32.mrf.mxu2 }
 0x2a7   : > { %v4543_v13 = vmax.f32 %v4507_v10, 0.0  ;;  %v3395_v26 = vadd.f32 %v3335_v15, %v2962_v59  ;;  %v2904_v39 = vpop.f32.mrf.mxu1  ;;  %v3912_v2 = vpop.f32.mrf.mxu3 }
 0x2a8   : > { %v4338_v44 = vpop.f32.mrf.mxu0  ;;  %v2963_v55 = vadd.f32 %v2904_v39, %v6408_v62 }
 0x2a9   : > { %v5724_v12 = vpack.c.bf16 %v4543_v13, %v4542_v9  ;;  %v3962_v61 = vadd.f32 %v3902_v45, %v3395_v26 }
 0x2ab   : > { %5774 = vst [vmem:[%s6622_s13 + $0x48] sm:$0xff] %v5724_v12   ;;  %v4396_v57 = vadd.f32 %v4336_v51, %v3962_v61 }
 0x2ad   : > { %v4508_v34 = vadd.f32 %v6601_v52, %v4396_v57 }
 0x2ae   : > { %v3337_v17 = vpop.f32.mrf.mxu2 }
 0x2af   : > { %v3396_v4 = vadd.f32 %v3337_v17, %v2963_v55  ;;  %v2907_v33 = vpop.f32.mrf.mxu1  ;;  %v4544_v24 = vmax.f32 %v4508_v34, 0.0  ;;  %v3914_v14 = vpop.f32.mrf.mxu3 }
 0x2b0   : > { %v4341_v19 = vpop.f32.mrf.mxu0  ;;  %v2964_v1 = vadd.f32 %v2907_v33, %v6420_v18 }
 0x2b1   : > { %v3963_v60 = vadd.f32 %v3904_v36, %v3396_v4 }
 0x2b3   : > { %v4397_v28 = vadd.f32 %v4338_v44, %v3963_v60 }
 0x2b5   : > { %v4509_v30 = vadd.f32 %v6601_v52, %v4397_v28 }
 0x2b6   : > { %v3340_v38 = vpop.f32.mrf.mxu2 }
 0x2b7   : > { %v4545_v45 = vmax.f32 %v4509_v30, 0.0  ;;  %v3397_v50 = vadd.f32 %v3340_v38, %v2964_v1  ;;  %v2909_v62 = vpop.f32.mrf.mxu1  ;;  %v3917_v20 = vpop.f32.mrf.mxu3 }
 0x2b8   : > { %v4343_v16 = vpop.f32.mrf.mxu0  ;;  %v2965_v36 = vadd.f32 %v2909_v62, %v6432_v29 }
 0x2b9   : > { %v5729_v37 = vpack.c.bf16 %v4545_v45, %v4544_v24  ;;  %v3964_v32 = vadd.f32 %v3907_v43, %v3397_v50 }
 0x2bb   : > { %5775 = vst [vmem:[%s6622_s13 + $0x50] sm:$0xff] %v5729_v37   ;;  %v4398_v48 = vadd.f32 %v4341_v19, %v3964_v32 }
 0x2bd   : > { %v4510_v18 = vadd.f32 %v6601_v52, %v4398_v48 }
 0x2be   : > { %v3342_v63 = vpop.f32.mrf.mxu2 }
 0x2bf   : > { %v3398_v42 = vadd.f32 %v3342_v63, %v2965_v36  ;;  %v2912_v47 = vpop.f32.mrf.mxu1  ;;  %v4546_v43 = vmax.f32 %v4510_v18, 0.0  ;;  %v3919_v39 = vpop.f32.mrf.mxu3 }
 0x2c0   : > { %v4346_v21 = vpop.f32.mrf.mxu0  ;;  %v2966_v27 = vadd.f32 %v2912_v47, %v6444_v40 }
 0x2c1   : > { %v3965_v53 = vadd.f32 %v3909_v3, %v3398_v42 }
 0x2c3   : > { %v4399_v7 = vadd.f32 %v4343_v16, %v3965_v53 }
 0x2c5   : > { %v4511_v23 = vadd.f32 %v6601_v52, %v4399_v7 }
 0x2c6   : > { %v3345_v35 = vpop.f32.mrf.mxu2 }
 0x2c7   : > { %v4547_v8 = vmax.f32 %v4511_v23, 0.0  ;;  %v3399_v51 = vadd.f32 %v3345_v35, %v2966_v27  ;;  %v2914_v29 = vpop.f32.mrf.mxu1 }
 0x2c8   : > { %v4348_v6 = vpop.f32.mrf.mxu0  ;;  %v2967_v59 = vadd.f32 %v2914_v29, %v6456_v56 }
 0x2c9   : > { %v5734_v31 = vpack.c.bf16 %v4547_v8, %v4546_v43  ;;  %v3966_v10 = vadd.f32 %v3912_v2, %v3399_v51  ;;  %v3922_v2 = vpop.f32.mrf.mxu3 }
 0x2cb   : > { %5776 = vst [vmem:[%s6622_s13 + $0x58] sm:$0xff] %v5734_v31   ;;  %v4400_v9 = vadd.f32 %v4346_v21, %v3966_v10 }
 0x2cd   : > { %v4512_v12 = vadd.f32 %v6601_v52, %v4400_v9 }
 0x2ce   : > { %v3347_v15 = vpop.f32.mrf.mxu2 }
 0x2cf   : > { %v3400_v13 = vadd.f32 %v3347_v15, %v2967_v59  ;;  %v2917_v26 = vpop.f32.mrf.mxu1  ;;  %v4548_v57 = vmax.f32 %v4512_v12, 0.0 }
 0x2d0   : > { %v4351_v40 = vpop.f32.mrf.mxu0  ;;  %v2968_v55 = vadd.f32 %v2917_v26, %v6468_v46 }
 0x2d1   : > { %v3967_v3 = vadd.f32 %v3914_v14, %v3400_v13  ;;  %v3924_v37 = vpop.f32.mrf.mxu3 }
 0x2d3   : > { %v4401_v44 = vadd.f32 %v4348_v6, %v3967_v3 }
 0x2d5   : > { %v4513_v61 = vadd.f32 %v6601_v52, %v4401_v44 }
 0x2d6   : > { %v3350_v17 = vpop.f32.mrf.mxu2 }
 0x2d7   : > { %v4549_v4 = vmax.f32 %v4513_v61, 0.0  ;;  %v3401_v33 = vadd.f32 %v3350_v17, %v2968_v55  ;;  %v2919_v56 = vpop.f32.mrf.mxu1 }
 0x2d8   : > { %v4353_v19 = vpop.f32.mrf.mxu0  ;;  %v2969_v28 = vadd.f32 %v2919_v56, %v6480_v25 }
 0x2d9   : > { %v5739_v60 = vpack.c.bf16 %v4549_v4, %v4548_v57  ;;  %v3968_v34 = vadd.f32 %v3917_v20, %v3401_v33  ;;  %v3927_v7 = vpop.f32.mrf.mxu3 }
 0x2db   : > { %5777 = vst [vmem:[%s6622_s13 + $0x60] sm:$0xff] %v5739_v60   ;;  %v4402_v1 = vadd.f32 %v4351_v40, %v3968_v34 }
 0x2dd   : > { %v4514_v46 = vadd.f32 %v6601_v52, %v4402_v1 }
 0x2de   : > { %v3352_v30 = vpop.f32.mrf.mxu2 }
 0x2df   : > { %v3402_v38 = vadd.f32 %v3352_v30, %v2969_v28  ;;  %v2922_v24 = vpop.f32.mrf.mxu1  ;;  %v4550_v36 = vmax.f32 %v4514_v46, 0.0 }
 0x2e0   : > { %v4356_v50 = vpop.f32.mrf.mxu0  ;;  %v2970_v32 = vadd.f32 %v2922_v24, %v6492_v11 }
 0x2e1   : > { %v3969_v45 = vadd.f32 %v3919_v39, %v3402_v38  ;;  %v3929_v15 = vpop.f32.mrf.mxu3 }
 0x2e3   : > { %v4403_v62 = vadd.f32 %v4353_v19, %v3969_v45 }
 0x2e5   : > { %v4515_v16 = vadd.f32 %v6601_v52, %v4403_v62 }
 0x2e6   : > { %v3355_v14 = vpop.f32.mrf.mxu2 }
 0x2e7   : > { %v4551_v63 = vmax.f32 %v4515_v16, 0.0  ;;  %v3403_v48 = vadd.f32 %v3355_v14, %v2970_v32  ;;  %v2924_v25 = vpop.f32.mrf.mxu1 }
 0x2e8   : > { %v4358_v47 = vpop.f32.mrf.mxu0  ;;  %v2971_v21 = vadd.f32 %v2924_v25, %v6504_v0 }
 0x2e9   : > { %v5744_v42 = vpack.c.bf16 %v4551_v63, %v4550_v36  ;;  %v3970_v53 = vadd.f32 %v3922_v2, %v3403_v48  ;;  %v3932_v55 = vpop.f32.mrf.mxu3 }
 0x2eb   : > { %5778 = vst [vmem:[%s6622_s13 + $0x68] sm:$0xff] %v5744_v42   ;;  %v4404_v23 = vadd.f32 %v4356_v50, %v3970_v53 }
 0x2ed   : > { %v4516_v11 = vadd.f32 %v6601_v52, %v4404_v23 }
 0x2ee   : > { %v3357_v18 = vpop.f32.mrf.mxu2 }
 0x2ef   : > { %v3404_v27 = vadd.f32 %v3357_v18, %v2971_v21  ;;  %v2927_v35 = vpop.f32.mrf.mxu1  ;;  %v4552_v6 = vmax.f32 %v4516_v11, 0.0 }
 0x2f0   : > { %v4361_v43 = vpop.f32.mrf.mxu0  ;;  %v2972_v29 = vadd.f32 %v2927_v35, %v6516_v5 }
 0x2f1   : > { %v3971_v20 = vadd.f32 %v3924_v37, %v3404_v27  ;;  %v3934_v30 = vpop.f32.mrf.mxu3 }
 0x2f3   : > { %v4405_v8 = vadd.f32 %v4358_v47, %v3971_v20 }
 0x2f5   : > { %v4517_v51 = vadd.f32 %v6601_v52, %v4405_v8 }
 0x2f6   : > { %v3360_v31 = vpop.f32.mrf.mxu2 }
 0x2f7   : > { %v4553_v10 = vmax.f32 %v4517_v51, 0.0  ;;  %v3405_v59 = vadd.f32 %v3360_v31, %v2972_v29  ;;  %v2929_v0 = vpop.f32.mrf.mxu1 }
 0x2f8   : > { %v4363_v13 = vpop.f32.mrf.mxu0  ;;  %v2973_v39 = vadd.f32 %v2929_v0, %v6528_v54 }
 0x2f9   : > { %v5749_v9 = vpack.c.bf16 %v4553_v10, %v4552_v6  ;;  %v3972_v26 = vadd.f32 %v3927_v7, %v3405_v59  ;;  %v3937_v14 = vpop.f32.mrf.mxu3 }
 0x2fb   : > { %5779 = vst [vmem:[%s6622_s13 + $0x70] sm:$0xff] %v5749_v9   ;;  %v4406_v40 = vadd.f32 %v4361_v43, %v3972_v26 }
 0x2fd   : > { %v4518_v5 = vadd.f32 %v6601_v52, %v4406_v40 }
 0x2fe   : > { %v3362_v3 = vpop.f32.mrf.mxu2 }
 0x2ff   : > { %v3406_v12 = vadd.f32 %v3362_v3, %v2973_v39  ;;  %v2932_v44 = vpop.f32.mrf.mxu1  ;;  %v4554_v60 = vmax.f32 %v4518_v5, 0.0 }
 0x300   : > { %v4366_v57 = vpop.f32.mrf.mxu0  ;;  %v2974_v33 = vadd.f32 %v2932_v44, %v6540_v58  ;;  %v5797_v58 = vld [vmem:[%s6893_s2] ss:$0 sm:$0xff] }
 0x301   : > { %v3973_v61 = vadd.f32 %v3929_v15, %v3406_v12  ;;  %v3939_v27 = vpop.f32.mrf.mxu3 }
 0x303   : > { %v4407_v17 = vadd.f32 %v4363_v13, %v3973_v61 }
 0x305   : > { %v4519_v4 = vadd.f32 %v6601_v52, %v4407_v17 }
 0x306   : > { %v3365_v56 = vpop.f32.mrf.mxu2 }
 0x307   : > { %v4555_v19 = vmax.f32 %v4519_v4, 0.0  ;;  %v3407_v2 = vadd.f32 %v3365_v56, %v2974_v33  ;;  %v2934_v54 = vpop.f32.mrf.mxu1 }
 0x308   : > { %v2975_v1 = vadd.f32 %v2934_v54, %v6552_v49  ;;  %v4368_v38 = vpop.f32.mrf.mxu0 }
 0x309   : > { %v5754_v34 = vpack.c.bf16 %v4555_v19, %v4554_v60  ;;  %v3974_v28 = vadd.f32 %v3932_v55, %v3407_v2 }
 0x30b   : > { %5780 = vst [vmem:[%s6622_s13 + $0x78] sm:$0xff] %v5754_v34   ;;  %v4408_v45 = vadd.f32 %v4366_v57, %v3974_v28 }
 0x30d   : > { %v4520_v62 = vadd.f32 %v5797_v58, %v4408_v45 }
 0x30e   : > { %v3367_v24 = vpop.f32.mrf.mxu2 }
 0x30f   : > { %v3408_v50 = vadd.f32 %v3367_v24, %v2975_v1  ;;  %v2937_v46 = vpop.f32.mrf.mxu1  ;;  %v4556_v63 = vmax.f32 %v4520_v62, 0.0 }
 0x310   : > { %v2976_v32 = vadd.f32 %v2937_v46, %v6564_v22  ;;  %v4371_v25 = vpop.f32.mrf.mxu0 }
 0x311   : > { %v3975_v52 = vadd.f32 %v3934_v30, %v3408_v50 }
 0x313   : > { %v4409_v37 = vadd.f32 %v4368_v38, %v3975_v52 }
 0x315   : > { %v4521_v16 = vadd.f32 %v5797_v58, %v4409_v37 }
 0x316   : > { %v3370_v36 = vpop.f32.mrf.mxu2 }
 0x317   : > { %v4557_v49 = vmax.f32 %v4521_v16, 0.0  ;;  %v3409_v48 = vadd.f32 %v3370_v36, %v2976_v32  ;;  %v2939_v47 = vpop.f32.mrf.mxu1 }
 0x318   : > { %v2977_v21 = vadd.f32 %v2939_v47, %v6576_v41  ;;  %v4373_v20 = vpop.f32.mrf.mxu0 }
 0x319   : > { %v5759_v42 = vpack.c.bf16 %v4557_v49, %v4556_v63  ;;  %v3976_v53 = vadd.f32 %v3937_v14, %v3409_v48 }
 0x31b   : > { %5781 = vst [vmem:[%s6622_s13 + $0x80] sm:$0xff] %v5759_v42   ;;  %v4410_v7 = vadd.f32 %v4371_v25, %v3976_v53 }
 0x31d   : > { %v4522_v22 = vadd.f32 %v5797_v58, %v4410_v7 }
 0x31e   : > { %v3372_v18 = vpop.f32.mrf.mxu2 }
 0x31f   : > { %v3410_v23 = vadd.f32 %v3372_v18, %v2977_v21  ;;  %v4558_v8 = vmax.f32 %v4522_v22, 0.0 }
 0x321   : > { %v3977_v35 = vadd.f32 %v3939_v27, %v3410_v23 }
 0x323   : > { %v4411_v43 = vadd.f32 %v4373_v20, %v3977_v35 }
 0x325   : > { %v4523_v11 = vadd.f32 %v5797_v58, %v4411_v43 }
 0x327   : > { %v4559_v51 = vmax.f32 %v4523_v11, 0.0 }
 0x329   : > { %v5764_v29 = vpack.c.bf16 %v4559_v51, %v4558_v8 }
 0x32b   : > { %5782 = vst [vmem:[%s6622_s13 + $0x88] sm:$0xff] %v5764_v29  }
 0x32c PF: > { %s13_s12 = sadd.s32 1, %s5804_s12  }
 0x32d   : > { %p10_p4 = scmp.ge.s32.totalorder %s13_s12, 4  }
 0x32f   :  { %12 = sbr.rel (!%p10_p4) target bundleno = 1 (0x1), region = 70 }

</bundles_post_ra>
